<compile_context>
chip_gen: v7x
topology: tpu7x:2x2x1
jax: 0.10.0
libtpu: 0.0.40
codegen_flags: <defaults>
</compile_context>

<pallas_src>
import math
import functools

import jax
import jax.numpy as jnp
from jax import lax
from jax.experimental import pallas as pl
from jax.experimental.pallas import tpu as pltpu


def _round_up(x, m):
    return ((x + m - 1) // m) * m


# ---------------------------------------------------------------------------
# Pallas kernel: one batch-block per grid step, full spatial extent in VMEM.
#   x1  = ReLU(Conv1x1_scaled(x, pad=1) + b1)          (spatial grows to H+2, W+2)
#   x2  = ReLU(DWConv3x3_scaled(x1, pad=1) + b2)
# packed output: lanes [0,c1)=x1, [c1,2c1)=x2 (channel-padded to C1p, lane-dense).
# ---------------------------------------------------------------------------
def _ghost_kernel(x_ref, w1_ref, b1_ref, wdw_ref, b2_ref, *refs,
                  NB, H, W, C1p, Ws, c1, pack):
    if pack:
        out_ref, x1pad_ref = refs
    else:
        x1_ref, x2_ref, x1pad_ref = refs

    Hp, Wp = H + 2, W + 2
    C = C1p

    # -- primary 1x1 conv (interior pixels only); BN scale pre-folded into w1 --
    xi = x_ref[...].astype(jnp.float32)                        # (NB, H, W, Cin)
    Cin = xi.shape[-1]
    w1 = w1_ref[...].astype(jnp.float32)                       # (Cin, C)
    y = jnp.dot(xi.reshape(NB * H * W, Cin), w1,
                preferred_element_type=jnp.float32)            # (NB*H*W, C)
    x1_int = jnp.maximum(y + b1_ref[...], 0.0).reshape(NB, H, W, C)

    # -- stage x1 (incl. its constant border) + dw zero halo in the scratch ----
    # x1's 1-pixel border comes from the primary conv's zero padding:
    #     x1_border = relu(0 @ w1_scaled + b1) = relu(b1)   (per channel)
    # Exactly three wide aligned stores; the frame is rewritten every step
    # (no cross-step scratch state -> the batch axis can stay "parallel").
    relu_b1 = jnp.maximum(b1_ref[...], 0.0)                             # (1, C)
    col = lax.broadcasted_iota(jnp.int32, (Ws, 1), 0)                   # (Ws, 1)
    brow = jnp.where((col >= 1) & (col <= Wp), relu_b1, 0.0)            # (Ws, C)
    border_row = jnp.broadcast_to(brow.reshape(1, 1, Ws, C), (NB, 1, Ws, C))
    zero_row = jnp.zeros((NB, 1, Ws, C), jnp.float32)
    bcol = jnp.broadcast_to(relu_b1.reshape(1, 1, 1, C), (NB, H, 1, C))
    zcol = jnp.zeros((NB, H, 1, C), jnp.float32)
    zright = jnp.zeros((NB, H, Ws - W - 3, C), jnp.float32)

    # rows 0..1 : dw zero halo + x1 top border row
    x1pad_ref[:, 0:2, :, :] = jnp.concatenate([zero_row, border_row], axis=1)
    # rows 2..2+H : [halo | left border | x1 interior | right border | zero pad]
    x1pad_ref[:, 2:2 + H, :, :] = jnp.concatenate(
        [zcol, bcol, x1_int, bcol, zright], axis=2)
    # rows 2+H..4+H : x1 bottom border row + dw zero halo
    x1pad_ref[:, 2 + H:4 + H, :, :] = jnp.concatenate(
        [border_row, zero_row], axis=1)

    # -- cheap op: depthwise 3x3 over the zero-padded x1 -----------------------
    # One aligned full-width row load per kh; kw shifts via XLU sublane rolls.
    # The roll wrap-around only touches columns >= Wp (sliced away below).
    w_dw = wdw_ref[...].astype(jnp.float32)                    # (9, C), once
    acc = None
    x1_full = None
    for kh in range(3):
        row = x1pad_ref[:, kh:kh + Hp, :, :]                   # (NB, Hp, Ws, C)
        for kw in range(3):
            tap = row if kw == 0 else pltpu.roll(row, shift=Ws - kw, axis=2)
            if kh == 1 and kw == 1:                            # center tap == x1
                x1_full = tap[:, :, :Wp, :]
            term = tap * w_dw[3 * kh + kw]
            acc = term if acc is None else acc + term
    x2 = jnp.maximum(acc[:, :, :Wp, :] + b2_ref[...], 0.0)     # (NB, Hp, Wp, C)

    # -- lane-dense output(s) ---------------------------------------------------
    if pack:
        # x2's padded lanes are exactly zero, so the lane roll puts its real
        # channels into lanes [c1, 2*c1) and zeros elsewhere; x1's padded lanes
        # are zero too, so a plain add packs both into one bf16 buffer.
        packed = x1_full + pltpu.roll(x2, shift=c1, axis=3)
        out_ref[...] = packed.astype(out_ref.dtype)
    else:
        x1_ref[...] = x1_full.astype(x1_ref.dtype)
        x2_ref[...] = x2.astype(x2_ref.dtype)


# ---------------------------------------------------------------------------
# Wrapper (NCHW in / NCHW out, like the PyTorch module)
# ---------------------------------------------------------------------------
def ghost_module_forward(x_nchw, params, *, oup):
    w1, b1, wdw, b2 = params
    N, Cin, H, W = x_nchw.shape
    C1p = w1.shape[1]                     # channel count padded to 128 lanes
    c1 = -(-oup // 2)                     # real init_channels (ratio=2)
    Hp, Wp = H + 2, W + 2                 # padding=1 on a 1x1 conv grows HW
    Ws = _round_up(Wp + 2, 8)             # scratch W extent, sublane-aligned
    pack = (2 * c1) <= C1p                # single packed output when it fits

    # bf16 on the HBM/DMA path for activations; no spatial pre-padding.
    x = jnp.transpose(x_nchw, (0, 2, 3, 1)).astype(jnp.bfloat16)   # -> NHWC

    # exact per-step VMEM footprint: double-buffered bf16 I/O + f32 staging.
    def step_bytes(nb):
        n_out = 1 if pack else 2
        io = (nb * H * W * Cin * 2                         # input block (bf16)
              + n_out * nb * Hp * Wp * C1p * 2             # output block(s) (bf16)
              + (Cin + 9) * C1p * 2 + 2 * C1p * 4)         # weights + biases
        scratch = nb * (Hp + 2) * Ws * C1p * 4             # f32 staging scratch
        return 2 * io + scratch

    # cap NB at N//2 so the grid has >= 2 steps (v7x megacore gets both TCs),
    # then shrink until the block fits the budget and divides N.
    NB = max(1, N // 2) if N >= 2 else N
    budget = 24 << 20
    while NB > 1 and (N % NB != 0 or step_bytes(NB) > budget):
        NB -= 1
    assert N % NB == 0
    vmem_limit = min(64 << 20,                              # v7x-physical-safe
                     max(32 << 20, int(step_bytes(NB) * 1.5) + (4 << 20)))

    kern = functools.partial(_ghost_kernel, NB=NB, H=H, W=W,
                             C1p=C1p, Ws=Ws, c1=c1, pack=pack)

    out_struct = jax.ShapeDtypeStruct((N, Hp, Wp, C1p), jnp.bfloat16)
    out_block = pl.BlockSpec((NB, Hp, Wp, C1p), lambda n: (n, 0, 0, 0))
    if pack:
        out_shape, out_specs = out_struct, out_block
    else:
        out_shape, out_specs = (out_struct, out_struct), [out_block, out_block]

    res = pl.pallas_call(
        kern,
        out_shape=out_shape,
        grid_spec=pltpu.PrefetchScalarGridSpec(
            num_scalar_prefetch=0,
            grid=(N // NB,),
            in_specs=[
                pl.BlockSpec((NB, H, W, Cin), lambda n: (n, 0, 0, 0)),
                pl.BlockSpec((Cin, C1p), lambda n: (0, 0)),
                pl.BlockSpec((1, C1p), lambda n: (0, 0)),
                pl.BlockSpec((9, C1p), lambda n: (0, 0)),
                pl.BlockSpec((1, C1p), lambda n: (0, 0)),
            ],
            out_specs=out_specs,
            scratch_shapes=[pltpu.VMEM((NB, Hp + 2, Ws, C1p), jnp.float32)],
        ),
        compiler_params=pltpu.CompilerParams(
            dimension_semantics=("parallel",),
            vmem_limit_bytes=vmem_limit),
    )(x, w1, b1, wdw, b2)

    # channel slice (+ concat on the fallback path) and NCHW transpose fuse in XLA.
    if pack:
        out_nhwc = res[..., :oup]
    else:
        x1o, x2o = res
        out_nhwc = jnp.concatenate([x1o[..., :c1], x2o[..., :c1]], axis=-1)[..., :oup]
    return jnp.transpose(out_nhwc, (0, 3, 1, 2)).astype(x_nchw.dtype)


# ---------------------------------------------------------------------------
# Deterministic parameter init (mirrors the torch layer shapes).
# BN (eval mode) is folded: scale into the conv weight, shift kept as a bias.
# Folded conv weights are bf16-rounded once so kernel and reference agree.
# ---------------------------------------------------------------------------
def init_ghost_params(key, inp, oup, ratio=2, dw_size=3, eps=1e-5):
    init_c = math.ceil(oup / ratio)
    new_c = init_c * (ratio - 1)
    assert new_c == init_c, "kernel implements the default ratio=2 path"
    assert dw_size == 3, "kernel implements the default 3x3 cheap op"
    c1p = _round_up(init_c, 128)

    ks = jax.random.split(key, 10)
    # primary conv weight, torch shape (init_c, inp, 1, 1)
    w1_t = 0.3 * jax.random.normal(ks[0], (init_c, inp, 1, 1), jnp.float32)
    # BN1 (inference-mode): gamma, beta, running_mean, running_var
    g1 = 1.0 + 0.1 * jax.random.normal(ks[1], (init_c,), jnp.float32)
    be1 = 0.1 * jax.random.normal(ks[2], (init_c,), jnp.float32)
    rm1 = 0.05 * jax.random.normal(ks[3], (init_c,), jnp.float32)
    rv1 = 1.0 + 0.1 * jax.random.uniform(ks[4], (init_c,), jnp.float32)
    s1 = g1 / jnp.sqrt(rv1 + eps)
    b1 = be1 - rm1 * s1
    w1_f = (w1_t * s1[:, None, None, None]).astype(jnp.bfloat16).astype(jnp.float32)

    # cheap (depthwise) conv weight, torch shape (new_c, 1, 3, 3)
    wdw_t = 0.3 * jax.random.normal(ks[5], (new_c, 1, dw_size, dw_size), jnp.float32)
    g2 = 1.0 + 0.1 * jax.random.normal(ks[6], (new_c,), jnp.float32)
    be2 = 0.1 * jax.random.normal(ks[7], (new_c,), jnp.float32)
    rm2 = 0.05 * jax.random.normal(ks[8], (new_c,), jnp.float32)
    rv2 = 1.0 + 0.1 * jax.random.uniform(ks[9], (new_c,), jnp.float32)
    s2 = g2 / jnp.sqrt(rv2 + eps)
    b2 = be2 - rm2 * s2
    wdw_f = (wdw_t * s2[:, None, None, None]).astype(jnp.bfloat16).astype(jnp.float32)

    # kernel-layout params, channel-padded to 128 lanes (padded columns are zero
    # so padded lanes stay exactly zero through bias+ReLU and the lane packing).
    w1 = jnp.zeros((inp, c1p), jnp.float32).at[:, :init_c].set(
        jnp.transpose(w1_f[:, :, 0, 0], (1, 0)))
    wdw = jnp.zeros((9, c1p), jnp.float32).at[:, :new_c].set(
        jnp.transpose(wdw_f[:, 0, :, :], (1, 2, 0)).reshape(9, new_c))

    def _padvec(v):
        return jnp.zeros((1, c1p), jnp.float32).at[0, :v.shape[0]].set(v)

    kernel_params = (w1.astype(jnp.bfloat16), _padvec(b1),
                     wdw.astype(jnp.bfloat16), _padvec(b2))
    ref_params = (w1_f, b1, wdw_f, b2)
    return kernel_params, ref_params


# ---------------------------------------------------------------------------
# Pure-JAX reference (lax convs, f32) for correctness check.
# Uses the same BN-folded weights (exact algebraic identity in eval mode).
# ---------------------------------------------------------------------------
def ghost_reference(x, ref_params, oup):
    w1_f, b1, wdw_f, b2 = ref_params
    y = lax.conv_general_dilated(
        x, w1_f, (1, 1), ((1, 1), (1, 1)),
        dimension_numbers=("NCHW", "OIHW", "NCHW"),
        precision=lax.Precision.HIGHEST)
    x1 = jnp.maximum(y + b1[None, :, None, None], 0.0)
    y2 = lax.conv_general_dilated(
        x1, wdw_f, (1, 1), ((1, 1), (1, 1)),
        dimension_numbers=("NCHW", "OIHW", "NCHW"),
        feature_group_count=x1.shape[1],
        precision=lax.Precision.HIGHEST)
    x2 = jnp.maximum(y2 + b2[None, :, None, None], 0.0)
    out = jnp.concatenate([x1, x2], axis=1)
    return out[:, :oup, :, :]


if __name__ == "__main__":
    key = jax.random.PRNGKey(0)
    k_x, k_p = jax.random.split(key)

    N, INP, OUP, H, W = 2, 4, 8, 16, 16
    x = jax.random.normal(k_x, (N, INP, H, W), jnp.float32)
    # the kernel carries activations as bf16 on the DMA path; give the f32
    # reference the same bf16-rounded input so only output rounding differs.
    x = x.astype(jnp.bfloat16).astype(jnp.float32)

    kernel_params, ref_params = init_ghost_params(k_p, INP, OUP)

    out = jax.block_until_ready(ghost_module_forward(x, kernel_params, oup=OUP))
    ref = jax.block_until_ready(ghost_reference(x, ref_params, OUP))

    assert out.shape == (N, OUP, H + 2, W + 2), out.shape
    max_err = float(jnp.max(jnp.abs(out - ref)))
    # bf16 output rounding dominates the tolerance.
    assert jnp.allclose(out, ref, atol=2e-2, rtol=2e-2), max_err
    print("KERNEL_OK")
</pallas_src>

<mosaic_0001>
module attributes {stable_mosaic.version = 11 : i64} {
  func.func @_ghost_kernel(%arg0: i32, %arg1: memref<1x16x16x4xbf16, #tpu.memory_space<vmem>>, %arg2: memref<4x128xbf16, #tpu.memory_space<vmem>>, %arg3: memref<1x128xf32, #tpu.memory_space<vmem>>, %arg4: memref<9x128xbf16, #tpu.memory_space<vmem>>, %arg5: memref<1x128xf32, #tpu.memory_space<vmem>>, %arg6: memref<1x18x18x128xbf16, #tpu.memory_space<vmem>>, %arg7: memref<1x20x24x128xf32, #tpu.memory_space<vmem>>) attributes {dimension_semantics = [#tpu.dimension_semantics<parallel>], iteration_bounds = array<i64: 2>, scalar_prefetch = 0 : i64, scratch_operands = 1 : i64, tpu.core_type = #tpu.core_type<tc>, window_params = [{transform_indices = @transform_0, window_bounds = array<i64: 1, 16, 16, 4>}, {pipeline_mode = #tpu.pipeline_mode<synchronous>, transform_indices = @transform_1, window_bounds = array<i64: 4, 128>}, {pipeline_mode = #tpu.pipeline_mode<synchronous>, transform_indices = @transform_2, window_bounds = array<i64: 1, 128>}, {pipeline_mode = #tpu.pipeline_mode<synchronous>, transform_indices = @transform_3, window_bounds = array<i64: 9, 128>}, {pipeline_mode = #tpu.pipeline_mode<synchronous>, transform_indices = @transform_4, window_bounds = array<i64: 1, 128>}, {transform_indices = @transform_5, window_bounds = array<i64: 1, 18, 18, 128>}]} {
    %c0 = arith.constant 0 : index
    %c0_0 = arith.constant 0 : index
    %c0_1 = arith.constant 0 : index
    %c0_2 = arith.constant 0 : index
    %0 = vector.load %arg1[%c0, %c0_0, %c0_1, %c0_2] : memref<1x16x16x4xbf16, #tpu.memory_space<vmem>>, vector<1x16x16x4xbf16>
    %1 = arith.extf %0 : vector<1x16x16x4xbf16> to vector<1x16x16x4xf32>
    %c0_3 = arith.constant 0 : index
    %c0_4 = arith.constant 0 : index
    %2 = vector.load %arg2[%c0_3, %c0_4] : memref<4x128xbf16, #tpu.memory_space<vmem>>, vector<4x128xbf16>
    %3 = arith.extf %2 : vector<4x128xbf16> to vector<4x128xf32>
    %4 = vector.shape_cast %1 : vector<1x16x16x4xf32> to vector<256x4xf32>
    %cst = arith.constant dense<0.000000e+00> : vector<256x128xf32>
    %5 = tpu.matmul %4, %3, %cst {dimension_numbers = #tpu.dot_dimension_numbers<[1], [0], [0], [1], [0, 0, 1, 1], [], []>} : vector<256x4xf32>, vector<4x128xf32>, vector<256x128xf32> -> vector<256x128xf32>
    %c0_5 = arith.constant 0 : index
    %c0_6 = arith.constant 0 : index
    %6 = vector.load %arg3[%c0_5, %c0_6] : memref<1x128xf32, #tpu.memory_space<vmem>>, vector<1x128xf32>
    %7 = vector.broadcast %6 : vector<1x128xf32> to vector<256x128xf32>
    %8 = arith.addf %5, %7 : vector<256x128xf32>
    %cst_7 = arith.constant 0.000000e+00 : f32
    %9 = vector.broadcast %cst_7 : f32 to vector<256x128xf32>
    %10 = arith.maximumf %8, %9 : vector<256x128xf32>
    %11 = vector.shape_cast %10 : vector<256x128xf32> to vector<1x16x16x128xf32>
    %c0_8 = arith.constant 0 : index
    %c0_9 = arith.constant 0 : index
    %12 = vector.load %arg3[%c0_8, %c0_9] : memref<1x128xf32, #tpu.memory_space<vmem>>, vector<1x128xf32>
    %cst_10 = arith.constant 0.000000e+00 : f32
    %13 = vector.broadcast %cst_10 : f32 to vector<1x128xf32>
    %14 = arith.maximumf %12, %13 : vector<1x128xf32>
    %15 = tpu.iota {dimensions = array<i32: 0>} : vector<24x1xi32>
    %c1_i32 = arith.constant 1 : i32
    %16 = vector.broadcast %c1_i32 : i32 to vector<24x1xi32>
    %17 = arith.cmpi sge, %15, %16 : vector<24x1xi32>
    %c18_i32 = arith.constant 18 : i32
    %18 = vector.broadcast %c18_i32 : i32 to vector<24x1xi32>
    %19 = arith.cmpi sle, %15, %18 : vector<24x1xi32>
    %20 = arith.andi %17, %19 : vector<24x1xi1>
    %cst_11 = arith.constant 0.000000e+00 : f32
    %21 = vector.shape_cast %20 : vector<24x1xi1> to vector<24x1xi1>
    %22 = vector.broadcast %21 : vector<24x1xi1> to vector<24x128xi1>
    %23 = vector.shape_cast %14 : vector<1x128xf32> to vector<1x128xf32>
    %24 = vector.broadcast %23 : vector<1x128xf32> to vector<24x128xf32>
    %25 = vector.broadcast %cst_11 : f32 to vector<24x128xf32>
    %26 = arith.select %22, %24, %25 : vector<24x128xi1>, vector<24x128xf32>
    %27 = vector.shape_cast %26 : vector<24x128xf32> to vector<1x1x24x128xf32>
    %cst_12 = arith.constant 0.000000e+00 : f32
    %28 = vector.broadcast %cst_12 : f32 to vector<1x1x24x128xf32>
    %29 = vector.shape_cast %14 : vector<1x128xf32> to vector<1x1x1x128xf32>
    %30 = vector.shape_cast %29 : vector<1x1x1x128xf32> to vector<1x1x1x128xf32>
    %31 = vector.broadcast %30 : vector<1x1x1x128xf32> to vector<1x16x1x128xf32>
    %cst_13 = arith.constant 0.000000e+00 : f32
    %32 = vector.broadcast %cst_13 : f32 to vector<1x16x1x128xf32>
    %cst_14 = arith.constant 0.000000e+00 : f32
    %33 = vector.broadcast %cst_14 : f32 to vector<1x16x5x128xf32>
    %34 = tpu.concatenate %28, %27 in 1 : vector<1x1x24x128xf32>, vector<1x1x24x128xf32> -> vector<1x2x24x128xf32>
    %c0_15 = arith.constant 0 : index
    %c0_16 = arith.constant 0 : index
    %c0_17 = arith.constant 0 : index
    %c0_18 = arith.constant 0 : index
    %35 = vector.load %arg7[%c0_15, %c0_16, %c0_17, %c0_18] : memref<1x20x24x128xf32, #tpu.memory_space<vmem>>, vector<1x2x24x128xf32>
    tpu.vector_store %arg7[%c0_15, %c0_16, %c0_17, %c0_18], %34 {strides = array<i32>} : memref<1x20x24x128xf32, #tpu.memory_space<vmem>>, vector<1x2x24x128xf32>,
    %36 = tpu.concatenate %32, %31, %11, %31, %33 in 2 : vector<1x16x1x128xf32>, vector<1x16x1x128xf32>, vector<1x16x16x128xf32>, vector<1x16x1x128xf32>, vector<1x16x5x128xf32> -> vector<1x16x24x128xf32>
    %c0_19 = arith.constant 0 : index
    %c2 = arith.constant 2 : index
    %c0_20 = arith.constant 0 : index
    %c0_21 = arith.constant 0 : index
    %37 = vector.load %arg7[%c0_19, %c2, %c0_20, %c0_21] : memref<1x20x24x128xf32, #tpu.memory_space<vmem>>, vector<1x16x24x128xf32>
    tpu.vector_store %arg7[%c0_19, %c2, %c0_20, %c0_21], %36 {strides = array<i32>} : memref<1x20x24x128xf32, #tpu.memory_space<vmem>>, vector<1x16x24x128xf32>,
    %38 = tpu.concatenate %27, %28 in 1 : vector<1x1x24x128xf32>, vector<1x1x24x128xf32> -> vector<1x2x24x128xf32>
    %c0_22 = arith.constant 0 : index
    %c18 = arith.constant 18 : index
    %c0_23 = arith.constant 0 : index
    %c0_24 = arith.constant 0 : index
    %39 = vector.load %arg7[%c0_22, %c18, %c0_23, %c0_24] : memref<1x20x24x128xf32, #tpu.memory_space<vmem>>, vector<1x2x24x128xf32>
    tpu.vector_store %arg7[%c0_22, %c18, %c0_23, %c0_24], %38 {strides = array<i32>} : memref<1x20x24x128xf32, #tpu.memory_space<vmem>>, vector<1x2x24x128xf32>,
    %c0_25 = arith.constant 0 : index
    %c0_26 = arith.constant 0 : index
    %40 = vector.load %arg4[%c0_25, %c0_26] : memref<9x128xbf16, #tpu.memory_space<vmem>>, vector<9x128xbf16>
    %41 = arith.extf %40 : vector<9x128xbf16> to vector<9x128xf32>
    %c0_27 = arith.constant 0 : index
    %c0_28 = arith.constant 0 : index
    %c0_29 = arith.constant 0 : index
    %c0_30 = arith.constant 0 : index
    %42 = vector.load %arg7[%c0_27, %c0_28, %c0_29, %c0_30] : memref<1x20x24x128xf32, #tpu.memory_space<vmem>>, vector<1x18x24x128xf32>
    %43 = vector.extract_strided_slice %41 {offsets = [0, 0], sizes = [1, 128], strides = [1, 1]} : vector<9x128xf32> to vector<1x128xf32>
    %44 = vector.shape_cast %43 : vector<1x128xf32> to vector<128xf32>
    %45 = vector.shape_cast %44 : vector<128xf32> to vector<1x1x1x128xf32>
    %46 = vector.broadcast %45 : vector<1x1x1x128xf32> to vector<1x18x24x128xf32>
    %47 = arith.mulf %42, %46 : vector<1x18x24x128xf32>
    %c23_i32 = arith.constant 23 : i32
    %48 = tpu.dynamic_rotate %42 by %c23_i32 dim 2 : vector<1x18x24x128xf32>, i32 -> vector<1x18x24x128xf32>
    %49 = vector.extract_strided_slice %41 {offsets = [1, 0], sizes = [1, 128], strides = [1, 1]} : vector<9x128xf32> to vector<1x128xf32>
    %50 = vector.shape_cast %49 : vector<1x128xf32> to vector<128xf32>
    %51 = vector.shape_cast %50 : vector<128xf32> to vector<1x1x1x128xf32>
    %52 = vector.broadcast %51 : vector<1x1x1x128xf32> to vector<1x18x24x128xf32>
    %53 = arith.mulf %48, %52 : vector<1x18x24x128xf32>
    %54 = arith.addf %47, %53 : vector<1x18x24x128xf32>
    %c22_i32 = arith.constant 22 : i32
    %55 = tpu.dynamic_rotate %42 by %c22_i32 dim 2 : vector<1x18x24x128xf32>, i32 -> vector<1x18x24x128xf32>
    %56 = vector.extract_strided_slice %41 {offsets = [2, 0], sizes = [1, 128], strides = [1, 1]} : vector<9x128xf32> to vector<1x128xf32>
    %57 = vector.shape_cast %56 : vector<1x128xf32> to vector<128xf32>
    %58 = vector.shape_cast %57 : vector<128xf32> to vector<1x1x1x128xf32>
    %59 = vector.broadcast %58 : vector<1x1x1x128xf32> to vector<1x18x24x128xf32>
    %60 = arith.mulf %55, %59 : vector<1x18x24x128xf32>
    %61 = arith.addf %54, %60 : vector<1x18x24x128xf32>
    %c0_31 = arith.constant 0 : index
    %c1 = arith.constant 1 : index
    %c0_32 = arith.constant 0 : index
    %c0_33 = arith.constant 0 : index
    %62 = vector.load %arg7[%c0_31, %c1, %c0_32, %c0_33] : memref<1x20x24x128xf32, #tpu.memory_space<vmem>>, vector<1x18x24x128xf32>
    %63 = vector.extract_strided_slice %41 {offsets = [3, 0], sizes = [1, 128], strides = [1, 1]} : vector<9x128xf32> to vector<1x128xf32>
    %64 = vector.shape_cast %63 : vector<1x128xf32> to vector<128xf32>
    %65 = vector.shape_cast %64 : vector<128xf32> to vector<1x1x1x128xf32>
    %66 = vector.broadcast %65 : vector<1x1x1x128xf32> to vector<1x18x24x128xf32>
    %67 = arith.mulf %62, %66 : vector<1x18x24x128xf32>
    %68 = arith.addf %61, %67 : vector<1x18x24x128xf32>
    %c23_i32_34 = arith.constant 23 : i32
    %69 = tpu.dynamic_rotate %62 by %c23_i32_34 dim 2 : vector<1x18x24x128xf32>, i32 -> vector<1x18x24x128xf32>
    %70 = vector.extract_strided_slice %69 {offsets = [0, 0, 0, 0], sizes = [1, 18, 18, 128], strides = [1, 1, 1, 1]} : vector<1x18x24x128xf32> to vector<1x18x18x128xf32>
    %71 = vector.extract_strided_slice %41 {offsets = [4, 0], sizes = [1, 128], strides = [1, 1]} : vector<9x128xf32> to vector<1x128xf32>
    %72 = vector.shape_cast %71 : vector<1x128xf32> to vector<128xf32>
    %73 = vector.shape_cast %72 : vector<128xf32> to vector<1x1x1x128xf32>
    %74 = vector.broadcast %73 : vector<1x1x1x128xf32> to vector<1x18x24x128xf32>
    %75 = arith.mulf %69, %74 : vector<1x18x24x128xf32>
    %76 = arith.addf %68, %75 : vector<1x18x24x128xf32>
    %c22_i32_35 = arith.constant 22 : i32
    %77 = tpu.dynamic_rotate %62 by %c22_i32_35 dim 2 : vector<1x18x24x128xf32>, i32 -> vector<1x18x24x128xf32>
    %78 = vector.extract_strided_slice %41 {offsets = [5, 0], sizes = [1, 128], strides = [1, 1]} : vector<9x128xf32> to vector<1x128xf32>
    %79 = vector.shape_cast %78 : vector<1x128xf32> to vector<128xf32>
    %80 = vector.shape_cast %79 : vector<128xf32> to vector<1x1x1x128xf32>
    %81 = vector.broadcast %80 : vector<1x1x1x128xf32> to vector<1x18x24x128xf32>
    %82 = arith.mulf %77, %81 : vector<1x18x24x128xf32>
    %83 = arith.addf %76, %82 : vector<1x18x24x128xf32>
    %c0_36 = arith.constant 0 : index
    %c2_37 = arith.constant 2 : index
    %c0_38 = arith.constant 0 : index
    %c0_39 = arith.constant 0 : index
    %84 = vector.load %arg7[%c0_36, %c2_37, %c0_38, %c0_39] : memref<1x20x24x128xf32, #tpu.memory_space<vmem>>, vector<1x18x24x128xf32>
    %85 = vector.extract_strided_slice %41 {offsets = [6, 0], sizes = [1, 128], strides = [1, 1]} : vector<9x128xf32> to vector<1x128xf32>
    %86 = vector.shape_cast %85 : vector<1x128xf32> to vector<128xf32>
    %87 = vector.shape_cast %86 : vector<128xf32> to vector<1x1x1x128xf32>
    %88 = vector.broadcast %87 : vector<1x1x1x128xf32> to vector<1x18x24x128xf32>
    %89 = arith.mulf %84, %88 : vector<1x18x24x128xf32>
    %90 = arith.addf %83, %89 : vector<1x18x24x128xf32>
    %c23_i32_40 = arith.constant 23 : i32
    %91 = tpu.dynamic_rotate %84 by %c23_i32_40 dim 2 : vector<1x18x24x128xf32>, i32 -> vector<1x18x24x128xf32>
    %92 = vector.extract_strided_slice %41 {offsets = [7, 0], sizes = [1, 128], strides = [1, 1]} : vector<9x128xf32> to vector<1x128xf32>
    %93 = vector.shape_cast %92 : vector<1x128xf32> to vector<128xf32>
    %94 = vector.shape_cast %93 : vector<128xf32> to vector<1x1x1x128xf32>
    %95 = vector.broadcast %94 : vector<1x1x1x128xf32> to vector<1x18x24x128xf32>
    %96 = arith.mulf %91, %95 : vector<1x18x24x128xf32>
    %97 = arith.addf %90, %96 : vector<1x18x24x128xf32>
    %c22_i32_41 = arith.constant 22 : i32
    %98 = tpu.dynamic_rotate %84 by %c22_i32_41 dim 2 : vector<1x18x24x128xf32>, i32 -> vector<1x18x24x128xf32>
    %99 = vector.extract_strided_slice %41 {offsets = [8, 0], sizes = [1, 128], strides = [1, 1]} : vector<9x128xf32> to vector<1x128xf32>
    %100 = vector.shape_cast %99 : vector<1x128xf32> to vector<128xf32>
    %101 = vector.shape_cast %100 : vector<128xf32> to vector<1x1x1x128xf32>
    %102 = vector.broadcast %101 : vector<1x1x1x128xf32> to vector<1x18x24x128xf32>
    %103 = arith.mulf %98, %102 : vector<1x18x24x128xf32>
    %104 = arith.addf %97, %103 : vector<1x18x24x128xf32>
    %105 = vector.extract_strided_slice %104 {offsets = [0, 0, 0, 0], sizes = [1, 18, 18, 128], strides = [1, 1, 1, 1]} : vector<1x18x24x128xf32> to vector<1x18x18x128xf32>
    %c0_42 = arith.constant 0 : index
    %c0_43 = arith.constant 0 : index
    %106 = vector.load %arg5[%c0_42, %c0_43] : memref<1x128xf32, #tpu.memory_space<vmem>>, vector<1x128xf32>
    %107 = vector.shape_cast %106 : vector<1x128xf32> to vector<1x1x1x128xf32>
    %108 = vector.broadcast %107 : vector<1x1x1x128xf32> to vector<1x18x18x128xf32>
    %109 = arith.addf %105, %108 : vector<1x18x18x128xf32>
    %cst_44 = arith.constant 0.000000e+00 : f32
    %110 = vector.broadcast %cst_44 : f32 to vector<1x18x18x128xf32>
    %111 = arith.maximumf %109, %110 : vector<1x18x18x128xf32>
    %c4_i32 = arith.constant 4 : i32
    %112 = tpu.dynamic_rotate %111 by %c4_i32 dim 3 : vector<1x18x18x128xf32>, i32 -> vector<1x18x18x128xf32>
    %113 = arith.addf %70, %112 : vector<1x18x18x128xf32>
    %114 = arith.truncf %113 : vector<1x18x18x128xf32> to vector<1x18x18x128xbf16>
    %c0_45 = arith.constant 0 : index
    %c0_46 = arith.constant 0 : index
    %c0_47 = arith.constant 0 : index
    %c0_48 = arith.constant 0 : index
    %115 = vector.load %arg6[%c0_45, %c0_46, %c0_47, %c0_48] : memref<1x18x18x128xbf16, #tpu.memory_space<vmem>>, vector<1x18x18x128xbf16>
    tpu.vector_store %arg6[%c0_45, %c0_46, %c0_47, %c0_48], %114 {strides = array<i32>} : memref<1x18x18x128xbf16, #tpu.memory_space<vmem>>, vector<1x18x18x128xbf16>,
    return
  }
  func.func @transform_0(%arg0: i32) -> (i32, i32, i32, i32) {
    %c0_i32 = arith.constant 0 : i32
    %c0_i32_0 = arith.constant 0 : i32
    %c0_i32_1 = arith.constant 0 : i32
    %c0_i32_2 = arith.constant 0 : i32
    return %arg0, %c0_i32, %c0_i32_0, %c0_i32_1 : i32, i32, i32, i32
  }
  func.func @transform_1(%arg0: i32) -> (i32, i32) {
    %c0_i32 = arith.constant 0 : i32
    %c0_i32_0 = arith.constant 0 : i32
    %c0_i32_1 = arith.constant 0 : i32
    return %c0_i32, %c0_i32_0 : i32, i32
  }
  func.func @transform_2(%arg0: i32) -> (i32, i32) {
    %c0_i32 = arith.constant 0 : i32
    %c0_i32_0 = arith.constant 0 : i32
    %c0_i32_1 = arith.constant 0 : i32
    return %c0_i32, %c0_i32_0 : i32, i32
  }
  func.func @transform_3(%arg0: i32) -> (i32, i32) {
    %c0_i32 = arith.constant 0 : i32
    %c0_i32_0 = arith.constant 0 : i32
    %c0_i32_1 = arith.constant 0 : i32
    return %c0_i32, %c0_i32_0 : i32, i32
  }
  func.func @transform_4(%arg0: i32) -> (i32, i32) {
    %c0_i32 = arith.constant 0 : i32
    %c0_i32_0 = arith.constant 0 : i32
    %c0_i32_1 = arith.constant 0 : i32
    return %c0_i32, %c0_i32_0 : i32, i32
  }
  func.func @transform_5(%arg0: i32) -> (i32, i32, i32, i32) {
    %c0_i32 = arith.constant 0 : i32
    %c0_i32_0 = arith.constant 0 : i32
    %c0_i32_1 = arith.constant 0 : i32
    %c0_i32_2 = arith.constant 0 : i32
    return %arg0, %c0_i32, %c0_i32_0, %c0_i32_1 : i32, i32, i32, i32
  }
}

</mosaic_0001>

<bundles_post_ra>
// kernel: tpu_custom_call.1
= control target key start
LH: loop header
LB: loop body
LE: loop exit
PB: predicated region body
PF: predicated region fallthrough
CT: control target
= control target key end

     0   :  { %s3741_s18 = smov 0   ;;  %s6634_s0 = inlined_call_operand.vmem [shape: bf16[2,16,16,4], index: 0, kind: input, shape index: {}]   ;;  %s6635_s1 = inlined_call_operand.vmem [shape: bf16[4,128], index: 1, kind: input, shape index: {}]   ;;  %s6636_s2 = inlined_call_operand.vmem [shape: f32[1,128], index: 2, kind: input, shape index: {}]   ;;  %s6637_s3 = inlined_call_operand.vmem [shape: bf16[9,128], index: 3, kind: input, shape index: {}]   ;;  %s6638_s4 = inlined_call_operand.vmem [shape: f32[1,128], index: 4, kind: input, shape index: {}]   ;;  %s6639_s5 = inlined_call_operand.vmem [shape: bf16[2,18,18,128], index: 5, kind: output, shape index: {}]  }
   0x1 LB: > { %s3318_s19 = sadd.s32 4294967295, %s3707_s18   ;;  %p3322_p0 = scmp.ge.s32.totalorder %s3707_s18, 1  ;;  %s3707_s18 = sphi %s3741_s18, %s15_s18  }
   0x2   : > { %p187_p1 = scmp.lt.s32.totalorder %s3707_s18, 3 }
   0x4   : > { %p188_p2 = pnand %p3322_p0, %p187_p1 }
   0x6   : > { %191 = sbr.rel (%p188_p2) target bundleno = 722 (0x2d2), region = 40 }
   0xd   : > { %v289_v0 = vld [vmem:[%s6635_s1] sm:$0x3]  ;;  %vm395_vm0 = vcmask 1043456   ;;  %p215_p3 = scmp.lt.s32.totalorder %s3318_s19, 1  ;;  %vm298_vm1 = vcmask 31744   ;;  %v293_v50 = vlaneseq  ;;  %vm820_vm6 = vcmask 1040384  }
   0xe   : > { %v290_v1 = vunpack.c.l.bf16 %v289_v0  ;;  %v291_v51 = vld [vmem:[%s6636_s2] sm:$0x1]  ;;  %v3709_v0 = vmov 0.0   ;;  %vm723_vm7 = vcmask 1041408   ;;  %vm854_vm8 = vcmask 1042432   ;;  %s3710_s9 = smov 4  }
   0xf   : > { %s7462_s19 = smov (!%p215_p3, %s3318_s19), 1  ;;  %v3811_v52 = vshrl.u32 %v293_v50, 7  ;;  %v656_v53 = vmax.f32 %v291_v51, 0.0  ;;  %v927_v54 = vld [vmem:[%s6637_s3] sm:$0xf] }
  0x10   : > { %3636 = vmatprep.subr.msk.mxu0 %vm395_vm0, %v290_v1  ;;  %3686 = vmatprep.subr.msk.mxu1 %vm395_vm0, %v290_v1  ;;  %s3416_s22 = sshll.u32 %s7462_s19, 7  ;;  %v3819_v56 = vunpack.c.l.bf16 %v927_v54  ;;  %s3688_s12 = smul.u32 216, %s7462_s19 }
  0x11   : > { %3637 = vmatpush3.msk.msra.mxu0 %vm395_vm0, %v290_v1  ;;  %3687 = vmatpush3.msk.msra.mxu1 %vm395_vm0, %v290_v1  ;;  %s3758_s25 = scalar_lea.vmem %s6634_s0, %s3416_s22  ;;  %v3817_v55 = vsub.s32 0, %v3811_v52  ;;  %v660_v58 = vadd.s32 16, %v3811_v52  ;;  %v1154_v59 = vsub.s32 1, %v3811_v52  ;;  %vm661_vm2 = vcmp.ge.s32.totalorder %v3811_v52, 1 }
  0x12   : > { %v3472_v2 = vld [vmem:[%s3758_s25] sm:$0xff]   ;;  %v3580_v4 = vld [vmem:[%s3758_s25 + $0x8] sm:$0xff]   ;;  %v3581_v11 = vld [vmem:[%s3758_s25 + $0x10] sm:$0xff]   ;;  %v1375_v61 = vsub.s32 2, %v3811_v52  ;;  %v3838_v1 = vrot.slane %v3709_v0, 1  ;;  %vm1097_vm4 = vcmp.lt.s32.totalorder %v3811_v52, 7  ;;  %s6496_s17 = scalar_lea.vmem %s6639_s5, %s3688_s12 }
  0x13   : > { %v3587_v3 = vld [vmem:[%s3758_s25 + $0x40] sm:$0xff]   ;;  %v3473_v5 = vunpack.c.l.bf16 %v3472_v2  ;;  %v3474_v6 = vunpack.c.h.bf16 %v3472_v2  ;;  %v3588_v9 = vld [vmem:[%s3758_s25 + $0x48] sm:$0xff]   ;;  %v3477_v10 = vunpack.c.l.bf16 %v3580_v4  ;;  %v3589_v13 = vld [vmem:[%s3758_s25 + $0x50] sm:$0xff]   ;;  %v3478_v14 = vunpack.c.h.bf16 %v3580_v4 }
  0x14   : > { %v3505_v7 = vunpack.c.l.bf16 %v3587_v3  ;;  %v3506_v8 = vunpack.c.h.bf16 %v3587_v3  ;;  %v3509_v12 = vunpack.c.l.bf16 %v3588_v9  ;;  %v3510_v15 = vunpack.c.h.bf16 %v3588_v9  ;;  %v3582_v18 = vld [vmem:[%s3758_s25 + $0x18] sm:$0xff]   ;;  %v3583_v24 = vld [vmem:[%s3758_s25 + $0x20] sm:$0xff]   ;;  %v3584_v30 = vld [vmem:[%s3758_s25 + $0x28] sm:$0xff]   ;;  %6853 = vst [vmem:[#allocation5_spill] sm:$0xff] %v3838_v1 }
  0x15   : > { %3638 = vmatprep.mubr.msk.f32.mxu0 %vm298_vm1, %v3473_v5  ;;  %v3481_v16 = vunpack.c.l.bf16 %v3581_v11  ;;  %v3513_v17 = vunpack.c.l.bf16 %v3589_v13  ;;  %v3590_v19 = vld [vmem:[%s3758_s25 + $0x58] sm:$0xff]   ;;  %v3482_v20 = vunpack.c.h.bf16 %v3581_v11  ;;  %v3514_v21 = vunpack.c.h.bf16 %v3589_v13  ;;  %v3591_v25 = vld [vmem:[%s3758_s25 + $0x60] sm:$0xff]   ;;  %v3592_v31 = vld [vmem:[%s3758_s25 + $0x68] sm:$0xff]  }
  0x16   : > { %3662 = vmatprep.mubr.msk.f32.mxu1 %vm298_vm1, %v3505_v7  ;;  %3639 = vmatmul.mubr.msk.f32.vlgmr.msra.gmra.mrb[0].mxu0 %vm298_vm1, %v3474_v6  ;;  %v3485_v22 = vunpack.c.l.bf16 %v3582_v18  ;;  %v3517_v23 = vunpack.c.l.bf16 %v3590_v19  ;;  %v3486_v26 = vunpack.c.h.bf16 %v3582_v18  ;;  %v3518_v27 = vunpack.c.h.bf16 %v3590_v19  ;;  %v3585_v36 = vld [vmem:[%s3758_s25 + $0x30] sm:$0xff]   ;;  %v3586_v42 = vld [vmem:[%s3758_s25 + $0x38] sm:$0xff]  }
  0x17   : > { %3663 = vmatmul.mubr.msk.f32.vlgmr.msra.gmra.mrb[0].mxu1 %vm298_vm1, %v3506_v8  ;;  %3641 = vmatprep.mubr.msk.f32.mxu0 %vm298_vm1, %v3477_v10  ;;  %v3489_v28 = vunpack.c.l.bf16 %v3583_v24  ;;  %v3521_v29 = vunpack.c.l.bf16 %v3591_v25  ;;  %v3490_v32 = vunpack.c.h.bf16 %v3583_v24  ;;  %v3522_v33 = vunpack.c.h.bf16 %v3591_v25  ;;  %v3593_v37 = vld [vmem:[%s3758_s25 + $0x70] sm:$0xff]   ;;  %v3594_v43 = vld [vmem:[%s3758_s25 + $0x78] sm:$0xff]  }
  0x18   : > { %3665 = vmatprep.mubr.msk.f32.mxu1 %vm298_vm1, %v3509_v12  ;;  %v3493_v34 = vunpack.c.l.bf16 %v3584_v30  ;;  %v3525_v35 = vunpack.c.l.bf16 %v3592_v31  ;;  %v3494_v38 = vunpack.c.h.bf16 %v3584_v30  ;;  %v3526_v39 = vunpack.c.h.bf16 %v3592_v31 }
  0x19   : > { %v3497_v40 = vunpack.c.l.bf16 %v3585_v36  ;;  %v3529_v41 = vunpack.c.l.bf16 %v3593_v37  ;;  %v3498_v44 = vunpack.c.h.bf16 %v3585_v36  ;;  %v3530_v45 = vunpack.c.h.bf16 %v3593_v37 }
  0x1a   : > { %3642 = vmatmul.mubr.msk.f32.gmra.mrb[2].mxu0 %vm298_vm1, %v3478_v14  ;;  %v3501_v46 = vunpack.c.l.bf16 %v3586_v42  ;;  %v3533_v47 = vunpack.c.l.bf16 %v3594_v43  ;;  %v3502_v48 = vunpack.c.h.bf16 %v3586_v42  ;;  %v3534_v49 = vunpack.c.h.bf16 %v3594_v43 }
  0x1b   : > { %3666 = vmatmul.mubr.msk.f32.gmra.mrb[2].mxu1 %vm298_vm1, %v3510_v15  ;;  %3644 = vmatprep.mubr.msk.f32.mxu0 %vm298_vm1, %v3481_v16  ;;  %v3822_v57 = vrot.slane %v656_v53, %v3817_v55  ;;  %v3829_v60 = vrot.slane %v3819_v56, %v3817_v55  ;;  %vm666_vm3 = vcmp.le.s32.totalorder %v660_v58, 18  ;;  %v3836_v63 = vrot.slane %v3819_v56, %v1154_v59 }
  0x1c   : > { %3668 = vmatprep.mubr.msk.f32.mxu1 %vm298_vm1, %v3513_v17  ;;  %v1542_v2 = vsub.s32 3, %v3811_v52  ;;  %v3847_v6 = vrot.slane %v3819_v56, %v1375_v61  ;;  %v3853_v9 = vrot.slane %v3709_v0, 2  ;;  %vm1318_vm5 = vcmp.lt.s32.totalorder %v3811_v52, 6 }
  0x1d   : > { %6851 = vst [vmem:[#allocation3_spill] sm:$0xff] %v3822_v57  ;;  %v3833_v62 = vsel %vm661_vm2, %v3822_v57, 0.0  ;;  %v3842_v3 = vsel %vm666_vm3, %v3822_v57, 0.0  ;;  %v1062_v5 = vrot.slane %v3822_v57, 1  ;;  %v989_v7 = vmul.f32 0.0, %v3829_v60 }
  0x1e   : > { %3645 = vmatmul.mubr.msk.f32.gmra.mrb[4].mxu0 %vm298_vm1, %v3482_v20  ;;  %6852 = vst [vmem:[#allocation4_spill] sm:$0xff] %v3833_v62  ;;  %6854 = vst [vmem:[#allocation6_spill] sm:$0xff] %v3842_v3  ;;  %v1044_v4 = vrot.slane %v3833_v62, 1  ;;  %v1156_v8 = vmul.f32 %v3836_v63, %v3838_v1  ;;  %v3856_v10 = vrot.slane %v3819_v56, %v1542_v2  ;;  %v1080_v11 = vrot.slane %v3842_v3, 1 }
  0x1f   : > { %3669 = vmatmul.mubr.msk.f32.gmra.mrb[4].mxu1 %vm298_vm1, %v3514_v21  ;;  %3647 = vmatprep.mubr.msk.f32.mxu0 %vm298_vm1, %v3485_v22  ;;  %6855 = vst [vmem:[#allocation7_spill] sm:$0xff] %v3853_v9  ;;  %v1265_v13 = vrot.slane %v3833_v62, 2  ;;  %v1283_v14 = vrot.slane %v3822_v57, 2  ;;  %v1762_v15 = vsub.s32 4, %v3811_v52  ;;  %v1377_v17 = vmul.f32 %v3847_v6, %v3853_v9 }
  0x20   : > { %3671 = vmatprep.mubr.msk.f32.mxu1 %vm298_vm1, %v3517_v23  ;;  %v3861_v12 = vsel %vm1097_vm4, %v1044_v4, %v1062_v5  ;;  %v1210_v16 = vadd.f32 %v1156_v8, %v989_v7  ;;  %v992_v18 = vmul.f32 %v3829_v60, %v3833_v62  ;;  %v3875_v20 = vsel %vm1097_vm4, %v1062_v5, %v1080_v11 }
  0x21   : > { %6856 = vst [vmem:[#allocation8_spill] sm:$0xff] %v3861_v12  ;;  %v1159_v19 = vmul.f32 %v3836_v63, %v3861_v12  ;;  %6857 = vst [vmem:[#allocation9_spill] sm:$0xff] %v3875_v20  ;;  %v1301_v21 = vrot.slane %v3842_v3, 2  ;;  %v3880_v22 = vsel %vm1318_vm5, %v1265_v13, %v1283_v14  ;;  %v1982_v23 = vsub.s32 5, %v3811_v52 }
  0x22   : > { %3648 = vmatmul.mubr.msk.f32.gmra.mrb[6].mxu0 %vm298_vm1, %v3486_v26  ;;  %6858 = vst [vmem:[#allocation10_spill] sm:$0xff] %v3880_v22  ;;  %v3884_v24 = vrot.slane %v3819_v56, %v1762_v15  ;;  %v1431_v25 = vadd.f32 %v1377_v17, %v1210_v16  ;;  %v3888_v26 = vmul.f32 %v3856_v10, %v3842_v3  ;;  %v3949_v50 = vsel %vm820_vm6, 0.0, %v3822_v57 }
  0x23   : > { %3672 = vmatmul.mubr.msk.f32.gmra.mrb[6].mxu1 %vm298_vm1, %v3518_v27  ;;  %3650 = vmatprep.mubr.msk.f32.mxu0 %vm298_vm1, %v3489_v28  ;;  %v3892_v27 = vmul.f32 %v3856_v10, %v3833_v62  ;;  %v3895_v28 = vrot.slane %v291_v51, %v3817_v55  ;;  %v3903_v30 = vmul.f32 %v3856_v10, %v3822_v57  ;;  %v2368_v54 = vsub.s32 7, %v3811_v52 }
  0x24   : > { %3674 = vmatprep.mubr.msk.f32.mxu1 %vm298_vm1, %v3521_v29  ;;  %6859 = vst [vmem:[#allocation11_spill] sm:$0xff] %v3888_v26  ;;  %v3899_v29 = vsel %vm1097_vm4, %v1080_v11, %v1044_v4  ;;  %v993_v31 = vmul.f32 %v3829_v60, %v3822_v57  ;;  %v3916_v36 = vrot.slane %v3819_v56, %v1982_v23 }
  0x25   : > { %6860 = vst [vmem:[#allocation12_spill] sm:$0xff] %v3892_v27  ;;  %6861 = vst [vmem:[#allocation13_spill] sm:$0xff] %v3899_v29  ;;  %v3920_v37 = vsel %vm1318_vm5, %v1301_v21, %v1265_v13  ;;  %v3933_v42 = vmul.f32 %v3884_v24, %v3861_v12  ;;  %v1599_v43 = vadd.f32 %v3903_v30, %v1431_v25 }
  0x26   : > { %3651 = vmatmul.mubr.msk.f32.gmra.mrb[8].mxu0 %vm298_vm1, %v3490_v32  ;;  %6862 = vst [vmem:[#allocation14_spill] sm:$0xff] %v3903_v30  ;;  %v1160_v32 = vmul.f32 %v3836_v63, %v3875_v20  ;;  %6864 = vst [vmem:[#allocation16_spill] sm:$0xff] %v3920_v37  ;;  %v3957_v59 = vmul.f32 %v3916_v36, %v3920_v37  ;;  %v3962_v0 = vmul.f32 %v3916_v36, %v3880_v22 }
  0x27   : > { %3675 = vmatmul.mubr.msk.f32.gmra.mrb[8].mxu1 %vm298_vm1, %v3522_v33  ;;  %3653 = vmatprep.mubr.msk.f32.mxu0 %vm298_vm1, %v3493_v34  ;;  %v1213_v33 = vadd.f32 %v1159_v19, %v992_v18  ;;  %v3911_v34 = vsel %vm1318_vm5, %v1283_v14, %v1301_v21  ;;  %6866 = vst [vmem:[#allocation18_spill] sm:$0xff] %v3933_v42 }
  0x28   : > { %3677 = vmatprep.mubr.msk.f32.mxu1 %vm298_vm1, %v3525_v35  ;;  %6863 = vst [vmem:[#allocation15_spill] sm:$0xff] %v3911_v34  ;;  %v1380_v35 = vmul.f32 %v3847_v6, %v3880_v22  ;;  %6868 = vst [vmem:[#allocation20_spill] sm:$0xff] %v3957_v59  ;;  %v1382_v5 = vmul.f32 %v3847_v6, %v3920_v37  ;;  %v3969_v8 = vmul.f32 %v3916_v36, %v3911_v34 }
  0x29   : > { %6869 = vst [vmem:[#allocation21_spill] sm:$0xff] %v3962_v0  ;;  %v3978_v21 = vrot.slane %v3819_v56, %v2368_v54 }
  0x2a   : > { %3654 = vmatmul.mubr.msk.f32.gmra.mrb[10].mxu0 %vm298_vm1, %v3494_v38  ;;  %v928_v38 = vld [vmem:[%s6637_s3 + $0x4] sm:$0x1]  ;;  %v3951_v53 = vadd.f32 %v1380_v35, %v1213_v33  ;;  %6870 = vst [vmem:[#allocation22_spill] sm:$0xff] %v3969_v8 }
  0x2b   : > { %3678 = vmatmul.mubr.msk.f32.gmra.mrb[10].mxu1 %vm298_vm1, %v3526_v39  ;;  %3656 = vmatprep.mubr.msk.f32.mxu0 %vm298_vm1, %v3497_v40  ;;  %v1600_v39 = vadd.f32 %v3888_v26, %v1431_v25  ;;  %v3928_v40 = vmul.f32 %v3884_v24, %v3899_v29  ;;  %v930_v51 = vunpack.c.l.bf16 %v928_v38 }
  0x2c   : > { %3680 = vmatprep.mubr.msk.f32.mxu1 %vm298_vm1, %v3529_v41  ;;  %v1598_v41 = vadd.f32 %v3892_v27, %v1431_v25 }
  0x2d   : > { %6865 = vst [vmem:[#allocation17_spill] sm:$0xff] %v3928_v40  ;;  %v1820_v58 = vadd.f32 %v3928_v40, %v1600_v39  ;;  %v3981_v23 = vrot.slane %v930_v51, %v3817_v55 }
  0x2e   : > { %3657 = vmatmul.mubr.msk.f32.gmra.mrb[12].mxu0 %vm298_vm1, %v3498_v44  ;;  %v3938_v44 = vmul.f32 %v3884_v24, %v3875_v20  ;;  %v1818_v61 = vadd.f32 %v3933_v42, %v1598_v41 }
  0x2f   : > { %3681 = vmatmul.mubr.msk.f32.gmra.mrb[12].mxu1 %vm298_vm1, %v3530_v45  ;;  %3659 = vmatprep.mubr.msk.f32.mxu0 %vm298_vm1, %v3501_v46  ;;  %v994_v45 = vmul.f32 %v3829_v60, %v3842_v3  ;;  %v1161_v46 = vmul.f32 %v3836_v63, %v3899_v29  ;;  %v3985_v33 = vadd.f32 %v3957_v59, %v1820_v58 }
  0x30   : > { %3683 = vmatprep.mubr.msk.f32.mxu1 %vm298_vm1, %v3533_v47  ;;  %6867 = vst [vmem:[#allocation19_spill] sm:$0xff] %v3938_v44  ;;  %v1214_v47 = vadd.f32 %v1160_v32, %v993_v31  ;;  %v1819_v7 = vadd.f32 %v3938_v44, %v1599_v43  ;;  %v3988_v35 = vadd.f32 %v3962_v0, %v1818_v61 }
  0x31   : > { %v1215_v11 = vadd.f32 %v1161_v46, %v994_v45 }
  0x32   : > { %3660 = vmatmul.mubr.msk.f32.gmra.mrb[14].mxu0 %vm298_vm1, %v3502_v48  ;;  %v1381_v48 = vmul.f32 %v3847_v6, %v3911_v34 }
  0x33   : > { %3684 = vmatmul.mubr.msk.f32.gmra.mrb[14].mxu1 %vm298_vm1, %v3534_v49  ;;  %v2148_v49 = vsub.s32 6, %v3811_v52  ;;  %v3993_v45 = vadd.f32 %v1382_v5, %v1215_v11 }
  0x34   : > { %v1435_v15 = vadd.f32 %v1381_v48, %v1214_v47 }
  0x35   : > { %v3973_v16 = vrot.slane %v3819_v56, %v2148_v49  ;;  %v3991_v56 = vadd.f32 %v3969_v8, %v1819_v7  ;;  %6871 = vst [vmem:[#allocation23_spill] sm:$0xff] %v3993_v45 }
  0xe9   : > { %v3640_v2 = vpop.f32.mrb[0].mxu0 }
  0xea   : > { %v3664_v4 = vpop.f32.mrb[0].mxu1  ;;  %v471_v13 = vadd.f32 %v3640_v2, %v3895_v28  ;;  %v465_v14 = vpop.f32.mrb[1].mxu0 }
  0xeb   : > { %v551_v17 = vadd.f32 %v3664_v4, %v3895_v28  ;;  %v545_v18 = vpop.f32.mrb[1].mxu1  ;;  %v466_v19 = vadd.f32 %v465_v14, %v3895_v28 }
  0xec   : > { %v546_v25 = vadd.f32 %v545_v18, %v3895_v28  ;;  %v625_v31 = vmax.f32 %v471_v13, 0.0 }
  0xed   : > { %v641_v32 = vmax.f32 %v551_v17, 0.0  ;;  %v624_v38 = vmax.f32 %v466_v19, 0.0  ;;  %v3643_v41 = vpop.f32.mrb[2].mxu0 }
  0xee   : > { %v640_v39 = vmax.f32 %v546_v25, 0.0  ;;  %v3667_v43 = vpop.f32.mrb[2].mxu1  ;;  %v725_v55 = vrot.slane %v625_v31, 6  ;;  %v481_v47 = vadd.f32 %v3643_v41, %v3895_v28  ;;  %v475_v48 = vpop.f32.mrb[3].mxu0 }
  0xef   : > { %v749_v46 = vrot.slane %v641_v32, 6  ;;  %v3997_v49 = vadd.f32 %v3667_v43, %v3895_v28  ;;  %v555_v51 = vpop.f32.mrb[3].mxu1  ;;  %v724_v54 = vrot.slane %v624_v38, 6  ;;  %v4000_v61 = vadd.f32 %v475_v48, %v3895_v28 }
  0xf0   : > { %v748_v58 = vrot.slane %v640_v39, 6  ;;  %v4003_v2 = vadd.f32 %v555_v51, %v3895_v28  ;;  %v838_v4 = vsel %vm723_vm7, %v725_v55, %v3822_v57  ;;  %v627_v7 = vmax.f32 %v481_v47, 0.0 }
  0xf1   : > { %v846_v5 = vsel %vm723_vm7, %v749_v46, %v3822_v57  ;;  %v4011_v13 = vsel %vm854_vm8, %v838_v4, 0.0  ;;  %v4014_v14 = vsel %vm723_vm7, %v724_v54, %v725_v55  ;;  %v4018_v17 = vsel %vm723_vm7, %v3949_v50, %v724_v54  ;;  %v4023_v19 = vpop.f32.mrb[4].mxu0 }
  0xf2   : > { %v4021_v18 = vsel %vm854_vm8, %v846_v5, 0.0  ;;  %v4025_v25 = vpop.f32.mrb[4].mxu1  ;;  %v4029_v31 = vmul.f32 %v3829_v60, %v4011_v13  ;;  %v6647_v32 = vrot.slane %v4011_v13, 1  ;;  %v4034_v38 = vmul.f32 %v3856_v10, %v4011_v13  ;;  %v4040_v41 = vpop.f32.mrb[5].mxu0 }
  0xf3   : > { %6872 = vst [vmem:[#allocation24_spill] sm:$0xff] %v4021_v18  ;;  %v4038_v39 = vmul.f32 %v3829_v60, %v4018_v17  ;;  %v4042_v43 = vpop.f32.mrb[5].mxu1  ;;  %v996_v55 = vmul.f32 %v3829_v60, %v4014_v14  ;;  %v6646_v48 = vrot.slane %v4014_v14, 1  ;;  %v1547_v4 = vmul.f32 %v3856_v10, %v4018_v17 }
  0xf4   : > { %6873 = vst [vmem:[#allocation25_spill] sm:$0xff] %v4034_v38  ;;  %v1548_v5 = vmul.f32 %v3856_v10, %v4014_v14  ;;  %v4056_v11 = vmul.f32 %v3973_v16, %v4014_v14  ;;  %v1021_v54 = vmul.f32 %v3829_v60, %v4021_v18  ;;  %v1089_v51 = vrot.slane %v4021_v18, 1 }
  0xf5   : > { %v4064_v47 = vsel %vm1097_vm4, %v6646_v48, %v6647_v32  ;;  %v1310_v59 = vrot.slane %v4021_v18, 2  ;;  %v4070_v8 = vpop.f32.mrb[6].mxu0  ;;  %v4077_v0 = vadd.f32 %v1547_v4, %v3951_v53  ;;  %v4083_v48 = vmul.f32 %v3856_v10, %v4021_v18 }
  0xf6   : > { %6874 = vst [vmem:[#allocation26_spill] sm:$0xff] %v4056_v11  ;;  %6875 = vst [vmem:[#allocation27_spill] sm:$0xff] %v4064_v47  ;;  %v4072_v40 = vpop.f32.mrb[6].mxu1  ;;  %v1163_v44 = vmul.f32 %v3836_v63, %v4064_v47  ;;  %v4079_v26 = vadd.f32 %v1548_v5, %v1435_v15  ;;  %v4085_v32 = vpop.f32.mrb[7].mxu0  ;;  %v750_v42 = vsel %vm723_vm7, %v748_v58, %v749_v46  ;;  %v728_v1 = vrot.slane %v627_v7, 6 }
  0xf7   : > { %6876 = vst [vmem:[#allocation28_spill] sm:$0xff] %v4077_v0  ;;  %6878 = vst [vmem:[#allocation30_spill] sm:$0xff] %v4083_v48  ;;  %v4087_v30 = vpop.f32.mrb[7].mxu1  ;;  %v830_v9 = vsel %vm723_vm7, %v3949_v50, %v748_v58  ;;  %v626_v27 = vmax.f32 %v4000_v61, 0.0  ;;  %v1020_v4 = vmul.f32 %v3829_v60, %v750_v42  ;;  %v1071_v48 = vrot.slane %v750_v42, 1 }
  0xf8   : > { %6877 = vst [vmem:[#allocation29_spill] sm:$0xff] %v4079_v26  ;;  %v4093_v53 = vadd.f32 %v1163_v44, %v996_v55  ;;  %v1019_v15 = vmul.f32 %v3829_v60, %v830_v9  ;;  %v1053_v5 = vrot.slane %v830_v9, 1  ;;  %v1274_v37 = vrot.slane %v830_v9, 2 }
  0xf9   : > { %v1292_v29 = vrot.slane %v750_v42, 2  ;;  %v4098_v3 = vmul.f32 %v3856_v10, %v830_v9  ;;  %v4100_v46 = vpop.f32.mrb[8].mxu0  ;;  %v4109_v44 = vmul.f32 %v3856_v10, %v750_v42  ;;  %v4112_v61 = vmul.f32 %v3973_v16, %v830_v9 }
  0xfa   : > { %6879 = vst [vmem:[#allocation31_spill] sm:$0xff] %v4093_v53  ;;  %v4102_v22 = vpop.f32.mrb[8].mxu1  ;;  %v4106_v58 = vsel %vm1097_vm4, %v1089_v51, %v1053_v5  ;;  %v4115_v7 = vmul.f32 %v3973_v16, %v750_v42  ;;  %v4117_v55 = vpop.f32.mrb[9].mxu0  ;;  %v4123_v12 = vsel %vm1097_vm4, %v1071_v48, %v1089_v51  ;;  %v4127_v62 = vsel %vm1097_vm4, %v1053_v5, %v1071_v48 }
  0xfb   : > { %6880 = vst [vmem:[#allocation32_spill] sm:$0xff] %v4098_v3  ;;  %6881 = vst [vmem:[#allocation33_spill] sm:$0xff] %v4106_v58  ;;  %v4119_v3 = vpop.f32.mrb[9].mxu1  ;;  %v4133_v9 = vsel %vm1318_vm5, %v1292_v29, %v1310_v59  ;;  %v1186_v42 = vmul.f32 %v3836_v63, %v4127_v62  ;;  %v1187_v34 = vmul.f32 %v3836_v63, %v4123_v12 }
  0xfc   : > { %6882 = vst [vmem:[#allocation34_spill] sm:$0xff] %v4109_v44  ;;  %6883 = vst [vmem:[#allocation35_spill] sm:$0xff] %v4112_v61  ;;  %v1188_v44 = vmul.f32 %v3836_v63, %v4106_v58  ;;  %v4141_v51 = vsel %vm1318_vm5, %v1274_v37, %v1292_v29  ;;  %v4145_v48 = vsel %vm1318_vm5, %v1310_v59, %v1274_v37  ;;  %v6891_v61 = vmax.f32 %v3997_v49, 0.0 }
  0xfd   : > { %6884 = vst [vmem:[#allocation36_spill] sm:$0xff] %v4115_v7  ;;  %6885 = vst [vmem:[#allocation37_spill] sm:$0xff] %v4119_v3  ;;  %v1409_v5 = vmul.f32 %v3847_v6, %v4145_v48  ;;  %v839_v20 = vsel %vm723_vm7, %v728_v1, %v3822_v57  ;;  %v727_v7 = vrot.slane %v626_v27, 6  ;;  %v4153_v18 = vpop.f32.mrb[10].mxu0  ;;  %v1240_v29 = vadd.f32 %v1186_v42, %v1019_v15 }
  0xfe   : > { %6886 = vst [vmem:[#allocation38_spill] sm:$0xff] %v4123_v12  ;;  %6887 = vst [vmem:[#allocation39_spill] sm:$0xff] %v4127_v62  ;;  %v752_v58 = vrot.slane %v6891_v61, 6  ;;  %v4155_v12 = vpop.f32.mrb[10].mxu1  ;;  %v1241_v62 = vadd.f32 %v1187_v34, %v1020_v4  ;;  %v4158_v38 = vsel %vm854_vm8, %v839_v20, 0.0  ;;  %v1242_v37 = vadd.f32 %v1188_v44, %v1021_v54  ;;  %v4160_v59 = vpop.f32.mrb[11].mxu0 }
  0xff   : > { %6888 = vst [vmem:[#allocation40_spill] sm:$0xff] %v4133_v9  ;;  %6889 = vst [vmem:[#allocation41_spill] sm:$0xff] %v4141_v51  ;;  %v4170_v61 = vmul.f32 %v3856_v10, %v4158_v38  ;;  %v4173_v34 = vsel %vm723_vm7, %v727_v7, %v728_v1  ;;  %v4177_v20 = vsel %vm723_vm7, %v3949_v50, %v727_v7  ;;  %v4189_v27 = vpop.f32.mrb[11].mxu1  ;;  %v6900_v42 = vrot.slane %v4158_v38, 1 }
 0x100   : > { %6890 = vst [vmem:[#allocation42_spill] sm:$0xff] %v4145_v48  ;;  %6892 = vst [vmem:[#allocation43_spill] sm:$0xff] %v4155_v12  ;;  %v4164_v48 = vmul.f32 %v3829_v60, %v4158_v38  ;;  %v847_v54 = vsel %vm723_vm7, %v752_v58, %v3822_v57  ;;  %v1463_v15 = vadd.f32 %v1409_v5, %v1242_v37  ;;  %v1064_v49 = vrot.slane %v4173_v34, 1 }
 0x101   : > { %6893 = vst [vmem:[#allocation44_spill] sm:$0xff] %v4158_v38  ;;  %6895 = vst [vmem:[#allocation46_spill] sm:$0xff] %v4173_v34  ;;  %v998_v4 = vmul.f32 %v3829_v60, %v4177_v20  ;;  %v999_v44 = vmul.f32 %v3829_v60, %v4173_v34  ;;  %v4187_v1 = vpop.f32.mrb[12].mxu0  ;;  %v4195_v5 = vmul.f32 %v3856_v10, %v4177_v20  ;;  %v6902_v7 = vrot.slane %v4177_v20, 1 }
 0x102   : > { %6894 = vst [vmem:[#allocation45_spill] sm:$0xff] %v4164_v48  ;;  %6896 = vst [vmem:[#allocation47_spill] sm:$0xff] %v4177_v20  ;;  %v4199_v37 = vmul.f32 %v3856_v10, %v4173_v34  ;;  %v4201_v48 = vpop.f32.mrb[13].mxu0  ;;  %v4207_v45 = vsel %vm1097_vm4, %v1064_v49, %v6900_v42  ;;  %v4228_v38 = vsel %vm854_vm8, %v847_v54, 0.0  ;;  %v1408_v53 = vmul.f32 %v3847_v6, %v4133_v9 }
 0x103   : > { %6897 = vst [vmem:[#allocation48_spill] sm:$0xff] %v4189_v27  ;;  %6898 = vst [vmem:[#allocation49_spill] sm:$0xff] %v4195_v5  ;;  %v4213_v12 = vsel %vm1097_vm4, %v6902_v7, %v1064_v49  ;;  %v4217_v27 = vmul.f32 %v3973_v16, %v4177_v20  ;;  %v1166_v42 = vmul.f32 %v3836_v63, %v4207_v45  ;;  %v642_v49 = vmax.f32 %v4003_v2, 0.0 }
 0x104   : > { %6899 = vst [vmem:[#allocation50_spill] sm:$0xff] %v4199_v37  ;;  %6901 = vst [vmem:[#allocation51_spill] sm:$0xff] %v4207_v45  ;;  %v4221_v37 = vmul.f32 %v3973_v16, %v4173_v34  ;;  %v1165_v26 = vmul.f32 %v3836_v63, %v4213_v12  ;;  %v1024_v7 = vmul.f32 %v3829_v60, %v4228_v38  ;;  %v1311_v0 = vrot.slane %v4228_v38, 2 }
 0x105   : > { %6903 = vst [vmem:[#allocation52_spill] sm:$0xff] %v4213_v12  ;;  %6904 = vst [vmem:[#allocation53_spill] sm:$0xff] %v4217_v27  ;;  %v1090_v27 = vrot.slane %v4228_v38, 1  ;;  %v4237_v20 = vpop.f32.mrb[14].mxu0  ;;  %v4241_v45 = vadd.f32 %v1166_v42, %v999_v44  ;;  %v751_v54 = vrot.slane %v642_v49, 6  ;;  %v1407_v2 = vmul.f32 %v3847_v6, %v4141_v51 }
 0x106   : > { %6905 = vst [vmem:[#allocation54_spill] sm:$0xff] %v4221_v37  ;;  %6906 = vst [vmem:[#allocation55_spill] sm:$0xff] %v4228_v38  ;;  %v1576_v37 = vmul.f32 %v3856_v10, %v4228_v38  ;;  %v4239_v12 = vadd.f32 %v1165_v26, %v998_v4  ;;  %v4245_v34 = vpop.f32.mrb[15].mxu0  ;;  %v491_v38 = vadd.f32 %v4023_v19, %v3895_v28 }
 0x107   : > { %6907 = vst [vmem:[#allocation56_spill] sm:$0xff] %v4237_v20  ;;  %6909 = vst [vmem:[#allocation58_spill] sm:$0xff] %v4241_v45  ;;  %v486_v26 = vadd.f32 %v4040_v41, %v3895_v28  ;;  %v753_v4 = vsel %vm723_vm7, %v751_v54, %v752_v58  ;;  %v831_v44 = vsel %vm723_vm7, %v3949_v50, %v751_v54 }
 0x108   : > { %6908 = vst [vmem:[#allocation57_spill] sm:$0xff] %v4239_v12  ;;  %6910 = vst [vmem:[#allocation59_spill] sm:$0xff] %v4245_v34  ;;  %v4247_v3 = vadd.f32 %v1576_v37, %v1463_v15  ;;  %v1461_v42 = vadd.f32 %v1407_v2, %v1240_v29  ;;  %v571_v49 = vadd.f32 %v4025_v25, %v3895_v28  ;;  %v1054_v9 = vrot.slane %v831_v44, 1 }
 0x109   : > { %v1022_v15 = vmul.f32 %v3829_v60, %v831_v44  ;;  %v1023_v37 = vmul.f32 %v3829_v60, %v753_v4  ;;  %v1072_v51 = vrot.slane %v753_v4, 1  ;;  %v1293_v19 = vrot.slane %v753_v4, 2 }
 0x10a   : > { %6911 = vst [vmem:[#allocation60_spill] sm:$0xff] %v4247_v3  ;;  %v1275_v3 = vrot.slane %v831_v44, 2  ;;  %v1462_v45 = vadd.f32 %v1408_v53, %v1241_v62  ;;  %v1574_v41 = vmul.f32 %v3856_v10, %v831_v44  ;;  %v4273_v25 = vsel %vm1097_vm4, %v1090_v27, %v1054_v9 }
 0x10b   : > { %v4265_v58 = vsel %vm1097_vm4, %v1072_v51, %v1090_v27  ;;  %v4269_v29 = vsel %vm1097_vm4, %v1054_v9, %v1072_v51  ;;  %6914 = vst [vmem:[#allocation63_spill] sm:$0xff] %v4273_v25  ;;  %v1575_v54 = vmul.f32 %v3856_v10, %v753_v4  ;;  %v1191_v53 = vmul.f32 %v3836_v63, %v4273_v25 }
 0x10c   : > { %6912 = vst [vmem:[#allocation61_spill] sm:$0xff] %v4265_v58  ;;  %6913 = vst [vmem:[#allocation62_spill] sm:$0xff] %v4269_v29  ;;  %v1189_v2 = vmul.f32 %v3836_v63, %v4269_v29  ;;  %v1190_v62 = vmul.f32 %v3836_v63, %v4265_v58  ;;  %v4284_v34 = vsel %vm1318_vm5, %v1293_v19, %v1311_v0  ;;  %v628_v5 = vmax.f32 %v486_v26, 0.0 }
 0x10d   : > { %6915 = vst [vmem:[#allocation64_spill] sm:$0xff] %v4284_v34  ;;  %v4288_v51 = vsel %vm1318_vm5, %v1275_v3, %v1293_v19  ;;  %v4292_v9 = vsel %vm1318_vm5, %v1311_v0, %v1275_v3  ;;  %v4294_v27 = vadd.f32 %v1574_v41, %v1461_v42  ;;  %v4296_v29 = vadd.f32 %v1575_v54, %v1462_v45 }
 0x10e   : > { %6916 = vst [vmem:[#allocation65_spill] sm:$0xff] %v4288_v51  ;;  %6917 = vst [vmem:[#allocation66_spill] sm:$0xff] %v4292_v9  ;;  %v1243_v58 = vadd.f32 %v1189_v2, %v1022_v15  ;;  %v1244_v12 = vadd.f32 %v1190_v62, %v1023_v37  ;;  %v1412_v25 = vmul.f32 %v3847_v6, %v4292_v9  ;;  %v629_v19 = vmax.f32 %v491_v38, 0.0 }
 0x10f   : > { %6918 = vst [vmem:[#allocation67_spill] sm:$0xff] %v4294_v27  ;;  %6919 = vst [vmem:[#allocation68_spill] sm:$0xff] %v4296_v29  ;;  %v4301_v20 = vmul.f32 %v3973_v16, %v831_v44  ;;  %v4304_v47 = vmul.f32 %v3973_v16, %v753_v4  ;;  %v645_v11 = vmax.f32 %v571_v49, 0.0  ;;  %v1245_v3 = vadd.f32 %v1191_v53, %v1024_v7 }
 0x110   : > { %v566_v0 = vadd.f32 %v4042_v43, %v3895_v28  ;;  %v1410_v45 = vmul.f32 %v3847_v6, %v4288_v51  ;;  %v1411_v42 = vmul.f32 %v3847_v6, %v4284_v34  ;;  %v731_v15 = vrot.slane %v629_v19, 6 }
 0x111   : > { %6920 = vst [vmem:[#allocation69_spill] sm:$0xff] %v4301_v20  ;;  %6921 = vst [vmem:[#allocation70_spill] sm:$0xff] %v4304_v47  ;;  %v730_v37 = vrot.slane %v628_v5, 6  ;;  %v755_v44 = vrot.slane %v645_v11, 6  ;;  %v501_v4 = vadd.f32 %v4070_v8, %v3895_v28  ;;  %v1466_v41 = vadd.f32 %v1412_v25, %v1245_v3 }
 0x112   : > { %v644_v38 = vmax.f32 %v566_v0, 0.0  ;;  %v1464_v26 = vadd.f32 %v1410_v45, %v1243_v58  ;;  %v1465_v49 = vadd.f32 %v1411_v42, %v1244_v12  ;;  %v840_v7 = vsel %vm723_vm7, %v731_v15, %v3822_v57 }
 0x113   : > { %v4317_v43 = vsel %vm723_vm7, %v730_v37, %v731_v15  ;;  %v4321_v54 = vsel %vm723_vm7, %v3949_v50, %v730_v37  ;;  %v848_v11 = vsel %vm723_vm7, %v755_v44, %v3822_v57  ;;  %v4326_v5 = vsel %vm854_vm8, %v840_v7, 0.0 }
 0x114   : > { %v1001_v8 = vmul.f32 %v3829_v60, %v4321_v54  ;;  %v1002_v12 = vmul.f32 %v3829_v60, %v4317_v43  ;;  %v6697_v58 = vrot.slane %v4321_v54, 1  ;;  %v4335_v25 = vmul.f32 %v3829_v60, %v4326_v5 }
 0x115   : > { %v6696_v2 = vrot.slane %v4326_v5, 1  ;;  %v4341_v53 = vmul.f32 %v3856_v10, %v4326_v5  ;;  %v1065_v19 = vrot.slane %v4317_v43, 1  ;;  %v4348_v45 = vmul.f32 %v3856_v10, %v4321_v54 }
 0x116   : > { %v4352_v42 = vmul.f32 %v3856_v10, %v4317_v43  ;;  %v4356_v15 = vmul.f32 %v3973_v16, %v4321_v54  ;;  %v4360_v37 = vmul.f32 %v3973_v16, %v4317_v43  ;;  %v4363_v7 = vsel %vm854_vm8, %v848_v11, 0.0 }
 0x117   : > { %6922 = vst [vmem:[#allocation71_spill] sm:$0xff] %v4341_v53  ;;  %6923 = vst [vmem:[#allocation72_spill] sm:$0xff] %v4348_v45  ;;  %v4369_v62 = vsel %vm1097_vm4, %v1065_v19, %v6696_v2  ;;  %v4375_v3 = vsel %vm1097_vm4, %v6697_v58, %v1065_v19  ;;  %v4379_v0 = vmul.f32 %v3829_v60, %v4363_v7  ;;  %v754_v53 = vrot.slane %v644_v38, 6 }
 0x118   : > { %6924 = vst [vmem:[#allocation73_spill] sm:$0xff] %v4352_v42  ;;  %6925 = vst [vmem:[#allocation74_spill] sm:$0xff] %v4369_v62  ;;  %v1168_v11 = vmul.f32 %v3836_v63, %v4375_v3  ;;  %v1169_v20 = vmul.f32 %v3836_v63, %v4369_v62  ;;  %v1579_v42 = vmul.f32 %v3856_v10, %v4363_v7  ;;  %v631_v19 = vmax.f32 %v501_v4, 0.0 }
 0x119   : > { %6926 = vst [vmem:[#allocation75_spill] sm:$0xff] %v4375_v3  ;;  %6927 = vst [vmem:[#allocation76_spill] sm:$0xff] %v4379_v0  ;;  %v496_v58 = vadd.f32 %v4085_v32, %v3895_v28  ;;  %v511_v0 = vadd.f32 %v4100_v46, %v3895_v28  ;;  %v581_v2 = vadd.f32 %v4072_v40, %v3895_v28  ;;  %v4414_v40 = vpop.f32.mrb[12].mxu1 }
 0x11a   : > { %v4393_v47 = vadd.f32 %v1168_v11, %v1001_v8  ;;  %v4395_v9 = vadd.f32 %v1169_v20, %v1002_v12  ;;  %v4397_v45 = vadd.f32 %v1579_v42, %v1466_v41  ;;  %v4402_v27 = vsel %vm723_vm7, %v754_v53, %v755_v44  ;;  %6930 = vst [vmem:[#allocation79_spill] sm:$0xff] %v4414_v40 }
 0x11b   : > { %v4406_v4 = vsel %vm723_vm7, %v3949_v50, %v754_v53  ;;  %v734_v32 = vrot.slane %v631_v19, 6  ;;  %v630_v38 = vmax.f32 %v496_v58, 0.0  ;;  %v1026_v20 = vmul.f32 %v3829_v60, %v4402_v27 }
 0x11c   : > { %6928 = vst [vmem:[#allocation77_spill] sm:$0xff] %v4397_v45  ;;  %6929 = vst [vmem:[#allocation78_spill] sm:$0xff] %v4406_v4  ;;  %v1025_v46 = vmul.f32 %v3829_v60, %v4406_v4  ;;  %v6702_v41 = vrot.slane %v4406_v4, 1  ;;  %v1073_v8 = vrot.slane %v4402_v27, 1  ;;  %v1577_v53 = vmul.f32 %v3856_v10, %v4406_v4 }
 0x11d   : > { %v1578_v58 = vmul.f32 %v3856_v10, %v4402_v27  ;;  %v6931_v42 = vrot.slane %v4363_v7, 1  ;;  %v4436_v44 = vmul.f32 %v3973_v16, %v4406_v4  ;;  %v4440_v12 = vmul.f32 %v3973_v16, %v4402_v27 }
 0x11e   : > { %v4432_v19 = vsel %vm1097_vm4, %v6702_v41, %v1073_v8  ;;  %v4446_v40 = vadd.f32 %v1577_v53, %v1464_v26  ;;  %v733_v41 = vrot.slane %v630_v38, 6  ;;  %v633_v4 = vmax.f32 %v511_v0, 0.0  ;;  %v4471_v0 = vpop.f32.mrb[13].mxu1 }
 0x11f   : > { %v4426_v11 = vsel %vm1097_vm4, %v1073_v8, %v6931_v42  ;;  %6933 = vst [vmem:[#allocation81_spill] sm:$0xff] %v4432_v19  ;;  %6934 = vst [vmem:[#allocation82_spill] sm:$0xff] %v4436_v44  ;;  %v1192_v45 = vmul.f32 %v3836_v63, %v4432_v19  ;;  %v4448_v51 = vadd.f32 %v1578_v58, %v1465_v49  ;;  %v647_v44 = vmax.f32 %v581_v2, 0.0 }
 0x120   : > { %6932 = vst [vmem:[#allocation80_spill] sm:$0xff] %v4426_v11  ;;  %6935 = vst [vmem:[#allocation83_spill] sm:$0xff] %v4440_v12  ;;  %v1193_v42 = vmul.f32 %v3836_v63, %v4426_v11  ;;  %v841_v8 = vsel %vm723_vm7, %v734_v32, %v3822_v57  ;;  %v506_v19 = vadd.f32 %v4117_v55, %v3895_v28 }
 0x121   : > { %6936 = vst [vmem:[#allocation84_spill] sm:$0xff] %v4446_v40  ;;  %6937 = vst [vmem:[#allocation85_spill] sm:$0xff] %v4448_v51  ;;  %v4452_v29 = vadd.f32 %v1192_v45, %v1025_v46  ;;  %v4457_v12 = vsel %vm854_vm8, %v841_v8, 0.0  ;;  %v4474_v45 = vsel %vm723_vm7, %v733_v41, %v734_v32  ;;  %v4478_v55 = vsel %vm723_vm7, %v3949_v50, %v733_v41 }
 0x122   : > { %v4454_v34 = vadd.f32 %v1193_v42, %v1026_v20  ;;  %6938 = vst [vmem:[#allocation86_spill] sm:$0xff] %v4457_v12  ;;  %v4463_v26 = vmul.f32 %v3829_v60, %v4457_v12  ;;  %v6709_v49 = vrot.slane %v4457_v12, 1  ;;  %v4469_v2 = vmul.f32 %v3856_v10, %v4457_v12  ;;  %6941 = vst [vmem:[#allocation89_spill] sm:$0xff] %v4471_v0 }
 0x123   : > { %6942 = vst [vmem:[#allocation90_spill] sm:$0xff] %v4478_v55  ;;  %v737_v46 = vrot.slane %v633_v4, 6  ;;  %v758_v20 = vrot.slane %v647_v44, 6  ;;  %v1004_v53 = vmul.f32 %v3829_v60, %v4478_v55  ;;  %v1005_v58 = vmul.f32 %v3829_v60, %v4474_v45 }
 0x124   : > { %6939 = vst [vmem:[#allocation87_spill] sm:$0xff] %v4463_v26  ;;  %6940 = vst [vmem:[#allocation88_spill] sm:$0xff] %v4469_v2  ;;  %v6710_v42 = vrot.slane %v4478_v55, 1  ;;  %v1066_v8 = vrot.slane %v4474_v45, 1  ;;  %v4490_v41 = vmul.f32 %v3856_v10, %v4478_v55  ;;  %v4494_v4 = vmul.f32 %v3856_v10, %v4474_v45 }
 0x125   : > { %v4510_v32 = vmul.f32 %v3973_v16, %v4478_v55  ;;  %v4514_v2 = vmul.f32 %v3973_v16, %v4474_v45  ;;  %v632_v40 = vmax.f32 %v506_v19, 0.0  ;;  %v6957_v12 = vrot.slane %v4018_v17, 1 }
 0x126   : > { %6943 = vst [vmem:[#allocation91_spill] sm:$0xff] %v4490_v41  ;;  %6944 = vst [vmem:[#allocation92_spill] sm:$0xff] %v4494_v4  ;;  %v4500_v44 = vsel %vm1097_vm4, %v1066_v8, %v6709_v49  ;;  %v4506_v38 = vsel %vm1097_vm4, %v6710_v42, %v1066_v8  ;;  %v842_v41 = vsel %vm723_vm7, %v737_v46, %v3822_v57 }
 0x127   : > { %6945 = vst [vmem:[#allocation93_spill] sm:$0xff] %v4500_v44  ;;  %6946 = vst [vmem:[#allocation94_spill] sm:$0xff] %v4506_v38  ;;  %v1171_v4 = vmul.f32 %v3836_v63, %v4506_v38  ;;  %v1172_v49 = vmul.f32 %v3836_v63, %v4500_v44  ;;  %v849_v8 = vsel %vm723_vm7, %v758_v20, %v3822_v57  ;;  %v4525_v42 = vsel %vm854_vm8, %v842_v41, 0.0 }
 0x128   : > { %6947 = vst [vmem:[#allocation95_spill] sm:$0xff] %v4510_v32  ;;  %6948 = vst [vmem:[#allocation96_spill] sm:$0xff] %v4514_v2  ;;  %v4528_v51 = vsel %vm854_vm8, %v849_v8, 0.0  ;;  %v576_v2 = vadd.f32 %v4087_v30, %v3895_v28  ;;  %v4538_v44 = vmul.f32 %v3829_v60, %v4525_v42  ;;  %v4544_v8 = vmul.f32 %v3856_v10, %v4525_v42 }
 0x129   : > { %6949 = vst [vmem:[#allocation97_spill] sm:$0xff] %v4525_v42  ;;  %6950 = vst [vmem:[#allocation98_spill] sm:$0xff] %v4528_v51  ;;  %v4532_v0 = vadd.f32 %v1171_v4, %v1004_v53  ;;  %v4534_v26 = vadd.f32 %v1172_v49, %v1005_v58  ;;  %v4548_v19 = vmul.f32 %v3829_v60, %v4528_v51  ;;  %v736_v58 = vrot.slane %v632_v40, 6 }
 0x12a   : > { %6953 = vst [vmem:[#allocation101_spill] sm:$0xff] %v4538_v44  ;;  %6954 = vst [vmem:[#allocation102_spill] sm:$0xff] %v4544_v8  ;;  %v4554_v53 = vmul.f32 %v3856_v10, %v4528_v51  ;;  %v646_v4 = vmax.f32 %v576_v2, 0.0  ;;  %v521_v41 = vadd.f32 %v4153_v18, %v3895_v28  ;;  %v6958_v8 = vrot.slane %v4011_v13, 1 }
 0x12b   : > { %6951 = vst [vmem:[#allocation99_spill] sm:$0xff] %v4532_v0  ;;  %6952 = vst [vmem:[#allocation100_spill] sm:$0xff] %v4534_v26  ;;  %v2152_v49 = vmul.f32 %v3973_v16, %v4011_v13  ;;  %v4574_v40 = vsel %vm723_vm7, %v3949_v50, %v736_v58  ;;  %v6964_v32 = vrot.slane %v4525_v42, 1 }
 0x12c   : > { %6955 = vst [vmem:[#allocation103_spill] sm:$0xff] %v4548_v19  ;;  %6956 = vst [vmem:[#allocation104_spill] sm:$0xff] %v4554_v53  ;;  %v4564_v44 = vsel %vm1097_vm4, %v6958_v8, %v6957_v12  ;;  %v4570_v53 = vsel %vm723_vm7, %v736_v58, %v737_v46  ;;  %v757_v18 = vrot.slane %v646_v4, 6  ;;  %v1007_v12 = vmul.f32 %v3829_v60, %v4574_v40 }
 0x12d   : > { %6959 = vst [vmem:[#allocation105_spill] sm:$0xff] %v4564_v44  ;;  %6960 = vst [vmem:[#allocation106_spill] sm:$0xff] %v4570_v53  ;;  %v2372_v2 = vmul.f32 %v3978_v21, %v4564_v44  ;;  %v1008_v8 = vmul.f32 %v3829_v60, %v4570_v53  ;;  %v6717_v30 = vrot.slane %v4574_v40, 1  ;;  %v1067_v19 = vrot.slane %v4570_v53, 1 }
 0x12e   : > { %6961 = vst [vmem:[#allocation107_spill] sm:$0xff] %v4574_v40  ;;  %v4588_v58 = vmul.f32 %v3856_v10, %v4574_v40  ;;  %v4592_v4 = vmul.f32 %v3856_v10, %v4570_v53  ;;  %v4608_v26 = vmul.f32 %v3973_v16, %v4574_v40  ;;  %v4619_v42 = vsel %vm723_vm7, %v757_v18, %v758_v20 }
 0x12f   : > { %v4598_v0 = vsel %vm1097_vm4, %v1067_v19, %v6964_v32  ;;  %v4604_v46 = vsel %vm1097_vm4, %v6717_v30, %v1067_v19  ;;  %6969 = vst [vmem:[#allocation114_spill] sm:$0xff] %v4619_v42  ;;  %v4623_v19 = vsel %vm723_vm7, %v3949_v50, %v757_v18  ;;  %v6973_v18 = vrot.slane %v4528_v51, 1 }
 0x130   : > { %6962 = vst [vmem:[#allocation108_spill] sm:$0xff] %v4588_v58  ;;  %6963 = vst [vmem:[#allocation109_spill] sm:$0xff] %v4592_v4  ;;  %v4612_v58 = vmul.f32 %v3973_v16, %v4570_v53  ;;  %v1174_v4 = vmul.f32 %v3836_v63, %v4604_v46  ;;  %v1175_v32 = vmul.f32 %v3836_v63, %v4598_v0  ;;  %v6980_v20 = vrot.slane %v4018_v17, 2 }
 0x131   : > { %6965 = vst [vmem:[#allocation110_spill] sm:$0xff] %v4598_v0  ;;  %6966 = vst [vmem:[#allocation111_spill] sm:$0xff] %v4604_v46  ;;  %v1028_v30 = vmul.f32 %v3829_v60, %v4623_v19  ;;  %v1074_v46 = vrot.slane %v4619_v42, 1  ;;  %v6981_v53 = vrot.slane %v4011_v13, 2 }
 0x132   : > { %6967 = vst [vmem:[#allocation112_spill] sm:$0xff] %v4608_v26  ;;  %6968 = vst [vmem:[#allocation113_spill] sm:$0xff] %v4612_v58  ;;  %v1029_v26 = vmul.f32 %v3829_v60, %v4619_v42  ;;  %v6730_v58 = vrot.slane %v4623_v19, 1  ;;  %v4631_v40 = vadd.f32 %v1174_v4, %v1007_v12  ;;  %v4633_v0 = vadd.f32 %v1175_v32, %v1008_v8 }
 0x133   : > { %6970 = vst [vmem:[#allocation115_spill] sm:$0xff] %v4623_v19  ;;  %v4641_v38 = vsel %vm1097_vm4, %v1074_v46, %v6973_v18  ;;  %v4651_v12 = vmul.f32 %v3856_v10, %v4623_v19  ;;  %v4655_v8 = vmul.f32 %v3856_v10, %v4619_v42  ;;  %v4663_v18 = vmul.f32 %v3973_v16, %v4623_v19  ;;  %v7040_v19 = vld [vmem:[#allocation44_spill] sm:$0xff] }
 0x134   : > { %6971 = vst [vmem:[#allocation116_spill] sm:$0xff] %v4631_v40  ;;  %6972 = vst [vmem:[#allocation117_spill] sm:$0xff] %v4633_v0  ;;  %v4647_v55 = vsel %vm1097_vm4, %v6730_v58, %v1074_v46  ;;  %v1196_v32 = vmul.f32 %v3836_v63, %v4641_v38  ;;  %v4667_v46 = vmul.f32 %v3973_v16, %v4619_v42  ;;  %v635_v58 = vmax.f32 %v521_v41, 0.0 }
 0x135   : > { %6974 = vst [vmem:[#allocation118_spill] sm:$0xff] %v4641_v38  ;;  %6975 = vst [vmem:[#allocation119_spill] sm:$0xff] %v4647_v55  ;;  %v1195_v4 = vmul.f32 %v3836_v63, %v4647_v55  ;;  %v1164_v0 = vmul.f32 %v3836_v63, %v4564_v44 }
 0x136   : > { %6976 = vst [vmem:[#allocation120_spill] sm:$0xff] %v4651_v12  ;;  %6977 = vst [vmem:[#allocation121_spill] sm:$0xff] %v4655_v8  ;;  %v1357_v12 = vsel %vm1318_vm5, %v6981_v53, %v6980_v20  ;;  %v2206_v8 = vadd.f32 %v2152_v49, %v3985_v33  ;;  %v4680_v38 = vadd.f32 %v1196_v32, %v1029_v26  ;;  %v6985_v26 = vrot.slane %v4018_v17, 1 }
 0x137   : > { %6978 = vst [vmem:[#allocation122_spill] sm:$0xff] %v4663_v18  ;;  %6979 = vst [vmem:[#allocation123_spill] sm:$0xff] %v4667_v46  ;;  %v4678_v40 = vadd.f32 %v1195_v4, %v1028_v30  ;;  %v1385_v18 = vmul.f32 %v3847_v6, %v1357_v12  ;;  %v4684_v41 = vmul.f32 %v3916_v36, %v1357_v12  ;;  %v740_v46 = vrot.slane %v635_v58, 6 }
 0x138   : > { %6983 = vst [vmem:[#allocation125_spill] sm:$0xff] %v4680_v38  ;;  %v2426_v51 = vadd.f32 %v2372_v2, %v2206_v8  ;;  %v2592_v55 = vmul.f32 %v3981_v23, %v1357_v12  ;;  %v1218_v53 = vadd.f32 %v1164_v0, %v4029_v31  ;;  %v4690_v33 = vmul.f32 %v3884_v24, %v4564_v44  ;;  %v4713_v8 = vld [vmem:[%s6638_s4] ss:$0 sm:$0xff] }
 0x139   : > { %6982 = vst [vmem:[#allocation124_spill] sm:$0xff] %v4678_v40  ;;  %v6984_v30 = vrot.slane %v4014_v14, 1  ;;  %v6987_v20 = vrot.slane %v4014_v14, 2  ;;  %v6988_v2 = vrot.slane %v4018_v17, 2  ;;  %v2150_v31 = vmul.f32 %v3973_v16, %v4018_v17  ;;  %v7037_v40 = vld [vmem:[#allocation57_spill] sm:$0xff] }
 0x13a   : > { %v843_v0 = vsel %vm723_vm7, %v740_v46, %v3822_v57  ;;  %v2646_v12 = vadd.f32 %v2592_v55, %v2426_v51  ;;  %v1439_v4 = vadd.f32 %v1385_v18, %v1218_v53  ;;  %v516_v53 = vadd.f32 %v4160_v59, %v3895_v28 }
 0x13b   : > { %v4698_v49 = vsel %vm1097_vm4, %v6985_v26, %v6984_v30  ;;  %v1339_v58 = vsel %vm1318_vm5, %v6988_v2, %v6987_v20  ;;  %v4716_v30 = vpop.f32.mrb[14].mxu1  ;;  %v4719_v26 = vsel %vm854_vm8, %v843_v0, 0.0  ;;  %v2204_v17 = vadd.f32 %v2150_v31, %v3988_v35 }
 0x13c   : > { %6986 = vst [vmem:[#allocation126_spill] sm:$0xff] %v4698_v49  ;;  %v1383_v32 = vmul.f32 %v3847_v6, %v1339_v58  ;;  %6989 = vst [vmem:[#allocation127_spill] sm:$0xff] %v4716_v30  ;;  %v4722_v20 = vmul.f32 %v3916_v36, %v1339_v58  ;;  %v2370_v51 = vmul.f32 %v3978_v21, %v4698_v49  ;;  %v6994_v38 = vrot.slane %v4014_v14, 2 }
 0x13d   : > { %6990 = vst [vmem:[#allocation128_spill] sm:$0xff] %v4719_v26  ;;  %v4729_v55 = vmul.f32 %v3829_v60, %v4719_v26  ;;  %v4735_v2 = vmul.f32 %v3856_v10, %v4719_v26  ;;  %v2707_v0 = vadd.f32 %v4713_v8, %v2646_v12  ;;  %v4739_v44 = vadd.f32 %v4170_v61, %v1439_v4 }
 0x13e   : > { %v2424_v35 = vadd.f32 %v2370_v51, %v2204_v17  ;;  %v2590_v31 = vmul.f32 %v3981_v23, %v1339_v58  ;;  %v1162_v30 = vmul.f32 %v3836_v63, %v4698_v49  ;;  %v4746_v18 = vmul.f32 %v3884_v24, %v4698_v49 }
 0x13f   : > { %6991 = vst [vmem:[#allocation129_spill] sm:$0xff] %v4729_v55  ;;  %6992 = vst [vmem:[#allocation130_spill] sm:$0xff] %v4735_v2  ;;  %v531_v2 = vadd.f32 %v4187_v1, %v3895_v28  ;;  %v2761_v12 = vmax.f32 %v2707_v0, 0.0  ;;  %v526_v61 = vadd.f32 %v4201_v48, %v3895_v28  ;;  %v591_v58 = vadd.f32 %v4102_v22, %v3895_v28  ;;  %v4765_v1 = vpop.f32.mrb[15].mxu1 }
 0x140   : > { %v2644_v55 = vadd.f32 %v2590_v31, %v2424_v35  ;;  %v1216_v4 = vadd.f32 %v1162_v30, %v4038_v39  ;;  %v634_v17 = vmax.f32 %v516_v53, 0.0  ;;  %v6993_v49 = vrot.slane %v4011_v13, 2  ;;  %6995 = vst [vmem:[#allocation131_spill] sm:$0xff] %v4765_v1  ;;  %v6996_v35 = vld [vmem:[#allocation26_spill] sm:$0xff] }
 0x141   : > { %v637_v51 = vmax.f32 %v531_v2, 0.0  ;;  %2817 = vrot.lane.b32.xlu1 %v2761_v12, %s3710_s9  ;;  %v636_v22 = vmax.f32 %v526_v61, 0.0  ;;  %v649_v0 = vmax.f32 %v591_v58, 0.0  ;;  %v2205_v31 = vadd.f32 %v6996_v35, %v3991_v56 }
 0x142   : > { %v4763_v59 = vsel %vm1318_vm5, %v6994_v38, %v6993_v49  ;;  %v2705_v48 = vadd.f32 %v4713_v8, %v2644_v55  ;;  %v1437_v30 = vadd.f32 %v1383_v32, %v1216_v4  ;;  %v739_v13 = vrot.slane %v634_v17, 6  ;;  %v6997_v55 = vld [vmem:[#allocation49_spill] sm:$0xff] }
 0x143   : > { %v1384_v39 = vmul.f32 %v3847_v6, %v4763_v59  ;;  %v743_v53 = vrot.slane %v637_v51, 6  ;;  %v4773_v14 = vmul.f32 %v3916_v36, %v4763_v59  ;;  %v742_v49 = vrot.slane %v636_v22, 6 }
 0x144   : > { %v2759_v38 = vmax.f32 %v2705_v48, 0.0  ;;  %v4775_v2 = vrot.slane %v649_v0, 6  ;;  %v4780_v12 = vadd.f32 %v6997_v55, %v1437_v30  ;;  %v4783_v61 = vsel %vm723_vm7, %v739_v13, %v740_v46 }
 0x145   : > { %6998 = vst [vmem:[#allocation26_spill] sm:$0xff] %v4783_v61  ;;  %v4787_v32 = vsel %vm723_vm7, %v3949_v50, %v739_v13  ;;  %v844_v58 = vsel %vm723_vm7, %v743_v53, %v3822_v57  ;;  %v1011_v56 = vmul.f32 %v3829_v60, %v4783_v61  ;;  %v1068_v46 = vrot.slane %v4783_v61, 1 }
 0x146   : > { %6999 = vst [vmem:[#allocation49_spill] sm:$0xff] %v4787_v32  ;;  %2813 = vrot.lane.b32.xlu0 %v2759_v38, %s3710_s9  ;;  %v1010_v4 = vmul.f32 %v3829_v60, %v4787_v32  ;;  %v6739_v17 = vrot.slane %v4787_v32, 1  ;;  %v4802_v22 = vmul.f32 %v3856_v10, %v4787_v32  ;;  %v4806_v0 = vmul.f32 %v3856_v10, %v4783_v61 }
 0x147   : > { %v7002_v30 = vrot.slane %v4719_v26, 1  ;;  %v4822_v35 = vmul.f32 %v3973_v16, %v4787_v32  ;;  %v4826_v55 = vmul.f32 %v3973_v16, %v4783_v61  ;;  %v4833_v48 = vsel %vm854_vm8, %v844_v58, 0.0  ;;  %v7031_v61 = vld [vmem:[#allocation46_spill] sm:$0xff] }
 0x148   : > { %7000 = vst [vmem:[#allocation132_spill] sm:$0xff] %v4802_v22  ;;  %7001 = vst [vmem:[#allocation133_spill] sm:$0xff] %v4806_v0  ;;  %v4818_v38 = vsel %vm1097_vm4, %v6739_v17, %v1068_v46  ;;  %v4840_v17 = vmul.f32 %v3829_v60, %v4833_v48  ;;  %v7032_v1 = vrot.slane %v7031_v61, 2 }
 0x149   : > { %v4812_v13 = vsel %vm1097_vm4, %v1068_v46, %v7002_v30  ;;  %7004 = vst [vmem:[#allocation135_spill] sm:$0xff] %v4818_v38  ;;  %7005 = vst [vmem:[#allocation136_spill] sm:$0xff] %v4822_v35  ;;  %v1177_v51 = vmul.f32 %v3836_v63, %v4818_v38  ;;  %v4836_v46 = vsel %vm723_vm7, %v742_v49, %v743_v53 }
 0x14a   : > { %7003 = vst [vmem:[#allocation134_spill] sm:$0xff] %v4812_v13  ;;  %7006 = vst [vmem:[#allocation137_spill] sm:$0xff] %v4826_v55  ;;  %v1178_v30 = vmul.f32 %v3836_v63, %v4812_v13  ;;  %v4846_v55 = vmul.f32 %v3856_v10, %v4833_v48  ;;  %v4854_v53 = vsel %vm723_vm7, %v3949_v50, %v742_v49 }
 0x14b   : > { %7007 = vst [vmem:[#allocation138_spill] sm:$0xff] %v4833_v48  ;;  %7008 = vst [vmem:[#allocation139_spill] sm:$0xff] %v4836_v46  ;;  %v4848_v26 = vadd.f32 %v1177_v51, %v1010_v4  ;;  %v1014_v58 = vmul.f32 %v3829_v60, %v4836_v46  ;;  %v1013_v0 = vmul.f32 %v3829_v60, %v4854_v53 }
 0x14c   : > { %7009 = vst [vmem:[#allocation140_spill] sm:$0xff] %v4840_v17  ;;  %7010 = vst [vmem:[#allocation141_spill] sm:$0xff] %v4846_v55  ;;  %v4850_v13 = vadd.f32 %v1178_v30, %v1011_v56  ;;  %v1069_v17 = vrot.slane %v4836_v46, 1  ;;  %v4866_v56 = vmul.f32 %v3856_v10, %v4854_v53  ;;  %v4870_v49 = vmul.f32 %v3856_v10, %v4836_v46 }
 0x14d   : > { %7011 = vst [vmem:[#allocation142_spill] sm:$0xff] %v4848_v26  ;;  %7013 = vst [vmem:[#allocation144_spill] sm:$0xff] %v4854_v53  ;;  %v4874_v51 = vmul.f32 %v3973_v16, %v4854_v53  ;;  %v7017_v30 = vrot.slane %v4833_v48, 1  ;;  %v7019_v55 = vrot.slane %v4854_v53, 1  ;;  %v7023_v53 = vld [vmem:[#allocation27_spill] sm:$0xff]  ;;  %v2591_v35 = vmul.f32 %v3981_v23, %v4763_v59  ;;  %v7035_v59 = vld [vmem:[#allocation28_spill] sm:$0xff] }
 0x14e   : > { %7012 = vst [vmem:[#allocation143_spill] sm:$0xff] %v4850_v13  ;;  %7014 = vst [vmem:[#allocation145_spill] sm:$0xff] %v4866_v56  ;;  %v4890_v56 = vmul.f32 %v3973_v16, %v4836_v46  ;;  %v7028_v26 = vld [vmem:[#allocation31_spill] sm:$0xff]  ;;  %v7030_v46 = vld [vmem:[#allocation56_spill] sm:$0xff] }
 0x14f   : > { %7015 = vst [vmem:[#allocation146_spill] sm:$0xff] %v4870_v49  ;;  %7016 = vst [vmem:[#allocation147_spill] sm:$0xff] %v4874_v51  ;;  %v4880_v22 = vsel %vm1097_vm4, %v1069_v17, %v7017_v30  ;;  %v4886_v4 = vsel %vm1097_vm4, %v7019_v55, %v1069_v17  ;;  %v850_v49 = vsel %vm723_vm7, %v4775_v2, %v3822_v57 }
 0x150   : > { %7018 = vst [vmem:[#allocation148_spill] sm:$0xff] %v4880_v22  ;;  %7020 = vst [vmem:[#allocation149_spill] sm:$0xff] %v4886_v4  ;;  %v1180_v51 = vmul.f32 %v3836_v63, %v4886_v4  ;;  %v1181_v30 = vmul.f32 %v3836_v63, %v4880_v22  ;;  %v4900_v48 = vsel %vm854_vm8, %v850_v49, 0.0  ;;  %v2371_v17 = vmul.f32 %v3978_v21, %v7023_v53 }
 0x151   : > { %7021 = vst [vmem:[#allocation150_spill] sm:$0xff] %v4890_v56  ;;  %7022 = vst [vmem:[#allocation151_spill] sm:$0xff] %v4900_v48  ;;  %v4906_v55 = vmul.f32 %v3829_v60, %v4900_v48  ;;  %v4912_v4 = vmul.f32 %v3856_v10, %v4900_v48  ;;  %v4921_v38 = vadd.f32 %v1384_v39, %v7028_v26 }
 0x152   : > { %v4914_v13 = vadd.f32 %v1180_v51, %v1013_v0  ;;  %v4916_v22 = vadd.f32 %v1181_v30, %v1014_v58  ;;  %v2425_v49 = vadd.f32 %v2371_v17, %v2205_v31  ;;  %v541_v32 = vadd.f32 %v7030_v46, %v3895_v28 }
 0x153   : > { %7024 = vst [vmem:[#allocation152_spill] sm:$0xff] %v4906_v55  ;;  %7025 = vst [vmem:[#allocation153_spill] sm:$0xff] %v4912_v4  ;;  %v7029_v55 = vld [vmem:[#allocation37_spill] sm:$0xff]  ;;  %v7033_v4 = vld [vmem:[#allocation47_spill] sm:$0xff]  ;;  %v1821_v26 = vadd.f32 %v4746_v18, %v7035_v59 }
 0x154   : > { %7026 = vst [vmem:[#allocation154_spill] sm:$0xff] %v4914_v13  ;;  %7027 = vst [vmem:[#allocation155_spill] sm:$0xff] %v4916_v22  ;;  %v586_v56 = vadd.f32 %v7029_v55, %v3895_v28  ;;  %v7034_v0 = vrot.slane %v7033_v4, 2  ;;  %v2645_v31 = vadd.f32 %v2591_v35, %v2425_v49  ;;  %v639_v17 = vmax.f32 %v541_v32, 0.0  ;;  %v7036_v55 = vld [vmem:[#allocation52_spill] sm:$0xff]  ;;  %v7039_v49 = vld [vmem:[#allocation59_spill] sm:$0xff] }
 0x155   : > { %v2373_v46 = vmul.f32 %v3978_v21, %v7036_v55  ;;  %v2041_v35 = vadd.f32 %v4722_v20, %v1821_v26  ;;  %v536_v18 = vadd.f32 %v7039_v49, %v3895_v28  ;;  %v7042_v32 = vrot.slane %v7031_v61, 2 }
 0x156   : > { %v1340_v58 = vsel %vm1318_vm5, %v7034_v0, %v7032_v1  ;;  %v648_v30 = vmax.f32 %v586_v56, 0.0  ;;  %v2706_v13 = vadd.f32 %v4713_v8, %v2645_v31  ;;  %v746_v59 = vrot.slane %v639_v17, 6  ;;  %v7046_v17 = vld [vmem:[#allocation29_spill] sm:$0xff] }
 0x157   : > { %v1386_v51 = vmul.f32 %v3847_v6, %v1340_v58  ;;  %v4937_v39 = vmul.f32 %v3916_v36, %v1340_v58  ;;  %v2593_v22 = vmul.f32 %v3981_v23, %v1340_v58  ;;  %v7041_v56 = vrot.slane %v7040_v19, 2 }
 0x158   : > { %v760_v0 = vrot.slane %v648_v30, 6  ;;  %v1768_v58 = vmul.f32 %v3884_v24, %v7023_v53  ;;  %v2760_v31 = vmax.f32 %v2706_v13, 0.0  ;;  %v845_v61 = vsel %vm723_vm7, %v746_v59, %v3822_v57 }
 0x159   : > { %v4944_v1 = vadd.f32 %v1386_v51, %v7037_v40  ;;  %v1322_v42 = vsel %vm1318_vm5, %v7042_v32, %v7041_v56  ;;  %v7043_v40 = vld [vmem:[#allocation53_spill] sm:$0xff] }
 0x15a   : > { %v2207_v51 = vadd.f32 %v7043_v40, %v2041_v35  ;;  %v1387_v20 = vmul.f32 %v3847_v6, %v1322_v42  ;;  %v4961_v26 = vsel %vm723_vm7, %v760_v0, %v4775_v2  ;;  %v4965_v30 = vsel %vm723_vm7, %v3949_v50, %v760_v0  ;;  %2815 = vrot.lane.b32.xlu0 %v2760_v31, %s3710_s9 }
 0x15b   : > { %7038 = vst [vmem:[#allocation31_spill] sm:$0xff] %v4944_v1  ;;  %v638_v1 = vmax.f32 %v536_v18, 0.0  ;;  %7044 = vst [vmem:[#allocation37_spill] sm:$0xff] %v4961_v26  ;;  %v1822_v49 = vadd.f32 %v1768_v58, %v7046_v17  ;;  %v1031_v13 = vmul.f32 %v3829_v60, %v4965_v30  ;;  %v1032_v35 = vmul.f32 %v3829_v60, %v4961_v26 }
 0x15c   : > { %7045 = vst [vmem:[#allocation56_spill] sm:$0xff] %v4965_v30  ;;  %v6765_v2 = vrot.slane %v4965_v30, 1  ;;  %v1075_v18 = vrot.slane %v4961_v26, 1  ;;  %v4981_v32 = vmul.f32 %v3856_v10, %v4965_v30  ;;  %v4985_v58 = vmul.f32 %v3856_v10, %v4961_v26 }
 0x15d   : > { %v7049_v31 = vrot.slane %v4900_v48, 1  ;;  %v5001_v0 = vmul.f32 %v3973_v16, %v4965_v30  ;;  %v5005_v56 = vmul.f32 %v3973_v16, %v4961_v26  ;;  %v7057_v26 = vld [vmem:[#allocation58_spill] sm:$0xff] }
 0x15e   : > { %7047 = vst [vmem:[#allocation46_spill] sm:$0xff] %v4981_v32  ;;  %7048 = vst [vmem:[#allocation47_spill] sm:$0xff] %v4985_v58  ;;  %v4997_v17 = vsel %vm1097_vm4, %v6765_v2, %v1075_v18  ;;  %v5012_v58 = vsel %vm854_vm8, %v845_v61, 0.0  ;;  %v2427_v32 = vadd.f32 %v2373_v46, %v2207_v51  ;;  %v745_v61 = vrot.slane %v638_v1, 6 }
 0x15f   : > { %v4991_v40 = vsel %vm1097_vm4, %v1075_v18, %v7049_v31  ;;  %7051 = vst [vmem:[#allocation57_spill] sm:$0xff] %v4997_v17  ;;  %7052 = vst [vmem:[#allocation59_spill] sm:$0xff] %v5001_v0  ;;  %v1198_v53 = vmul.f32 %v3836_v63, %v4997_v17  ;;  %v5016_v18 = vmul.f32 %v3829_v60, %v5012_v58 }
 0x160   : > { %7050 = vst [vmem:[#allocation28_spill] sm:$0xff] %v4991_v40  ;;  %7053 = vst [vmem:[#allocation44_spill] sm:$0xff] %v5005_v56  ;;  %v1199_v31 = vmul.f32 %v3836_v63, %v4991_v40  ;;  %v5022_v56 = vmul.f32 %v3856_v10, %v5012_v58  ;;  %v2647_v40 = vadd.f32 %v2593_v22, %v2427_v32 }
 0x161   : > { %7054 = vst [vmem:[#allocation53_spill] sm:$0xff] %v5012_v58  ;;  %7055 = vst [vmem:[#allocation29_spill] sm:$0xff] %v5016_v18  ;;  %v5024_v17 = vadd.f32 %v1198_v53, %v1031_v13  ;;  %v5029_v46 = vadd.f32 %v1387_v20, %v7057_v26  ;;  %v5032_v51 = vmul.f32 %v3916_v36, %v1322_v42  ;;  %v7058_v18 = vld [vmem:[#allocation51_spill] sm:$0xff] }
 0x162   : > { %7056 = vst [vmem:[#allocation156_spill] sm:$0xff] %v5022_v56  ;;  %v5026_v30 = vadd.f32 %v1199_v31, %v1032_v35  ;;  %v2042_v2 = vadd.f32 %v4773_v14, %v1822_v49  ;;  %v2374_v0 = vmul.f32 %v3978_v21, %v7058_v18  ;;  %v2708_v48 = vadd.f32 %v4713_v8, %v2647_v40 }
 0x163   : > { %v5039_v53 = vsel %vm723_vm7, %v745_v61, %v746_v59  ;;  %v5043_v22 = vsel %vm723_vm7, %v3949_v50, %v745_v61  ;;  %v2594_v1 = vmul.f32 %v3981_v23, %v1322_v42  ;;  %v7062_v42 = vrot.slane %v5012_v58, 1 }
 0x164   : > { %7059 = vst [vmem:[#allocation58_spill] sm:$0xff] %v5039_v53  ;;  %7060 = vst [vmem:[#allocation157_spill] sm:$0xff] %v5043_v22  ;;  %v1016_v20 = vmul.f32 %v3829_v60, %v5043_v22  ;;  %v1017_v14 = vmul.f32 %v3829_v60, %v5039_v53  ;;  %v6776_v26 = vrot.slane %v5043_v22, 1  ;;  %v1070_v49 = vrot.slane %v5039_v53, 1 }
 0x165   : > { %v2762_v13 = vmax.f32 %v2708_v48, 0.0  ;;  %v5056_v32 = vmul.f32 %v3856_v10, %v5043_v22  ;;  %v5072_v48 = vmul.f32 %v3856_v10, %v5039_v53  ;;  %v5076_v61 = vmul.f32 %v3973_v16, %v5043_v22 }
 0x166   : > { %v5062_v40 = vsel %vm1097_vm4, %v1070_v49, %v7062_v42  ;;  %v5068_v31 = vsel %vm1097_vm4, %v6776_v26, %v1070_v49  ;;  %v5085_v49 = vmul.f32 %v3973_v16, %v5039_v53  ;;  %v7068_v26 = vld [vmem:[#allocation54_spill] sm:$0xff]  ;;  %v7069_v56 = vrot.slane %v7033_v4, 1 }
 0x167   : > { %7061 = vst [vmem:[#allocation158_spill] sm:$0xff] %v5056_v32  ;;  %7063 = vst [vmem:[#allocation159_spill] sm:$0xff] %v5062_v40  ;;  %2819 = vrot.lane.b32.xlu1 %v2762_v13, %s3710_s9  ;;  %v1183_v42 = vmul.f32 %v3836_v63, %v5068_v31  ;;  %v1184_v59 = vmul.f32 %v3836_v63, %v5062_v40  ;;  %v2208_v35 = vadd.f32 %v7068_v26, %v2042_v2 }
 0x168   : > { %7064 = vst [vmem:[#allocation160_spill] sm:$0xff] %v5068_v31  ;;  %7065 = vst [vmem:[#allocation161_spill] sm:$0xff] %v5072_v48  ;;  %v7070_v48 = vrot.slane %v7040_v19, 1  ;;  %v7072_v13 = vrot.slane %v7033_v4, 2  ;;  %v7073_v58 = vrot.slane %v7040_v19, 2  ;;  %v7075_v31 = vld [vmem:[#allocation25_spill] sm:$0xff]  ;;  %v2155_v2 = vmul.f32 %v3973_v16, %v7040_v19 }
 0x169   : > { %7066 = vst [vmem:[#allocation162_spill] sm:$0xff] %v5076_v61  ;;  %7067 = vst [vmem:[#allocation163_spill] sm:$0xff] %v5085_v49  ;;  %v7074_v61 = vld [vmem:[#allocation23_spill] sm:$0xff]  ;;  %v5106_v26 = vadd.f32 %v1183_v42, %v1016_v20  ;;  %v5108_v22 = vadd.f32 %v1184_v59, %v1017_v14  ;;  %v2428_v53 = vadd.f32 %v2374_v0, %v2208_v35  ;;  %v7079_v14 = vrot.slane %v4317_v43, 2 }
 0x16a   : > { %v5094_v32 = vsel %vm1097_vm4, %v7070_v48, %v7069_v56  ;;  %v1358_v40 = vsel %vm1318_vm5, %v7073_v58, %v7072_v13  ;;  %v1603_v49 = vadd.f32 %v7075_v31, %v7074_v61  ;;  %v7078_v13 = vld [vmem:[#allocation45_spill] sm:$0xff]  ;;  %v7080_v0 = vrot.slane %v4321_v54, 2 }
 0x16b   : > { %7071 = vst [vmem:[#allocation54_spill] sm:$0xff] %v5094_v32  ;;  %7076 = vst [vmem:[#allocation23_spill] sm:$0xff] %v5106_v26  ;;  %v1167_v56 = vmul.f32 %v3836_v63, %v5094_v32  ;;  %v1388_v4 = vmul.f32 %v3847_v6, %v1358_v40  ;;  %v1992_v58 = vmul.f32 %v3916_v36, %v1358_v40 }
 0x16c   : > { %7077 = vst [vmem:[#allocation25_spill] sm:$0xff] %v5108_v22  ;;  %v1823_v48 = vadd.f32 %v4690_v33, %v1603_v49  ;;  %v2375_v31 = vmul.f32 %v3978_v21, %v5094_v32  ;;  %v2648_v61 = vadd.f32 %v2594_v1, %v2428_v53  ;;  %v2595_v20 = vmul.f32 %v3981_v23, %v1358_v40 }
 0x16d   : > { %v1221_v19 = vadd.f32 %v1167_v56, %v7078_v13  ;;  %v1341_v59 = vsel %vm1318_vm5, %v7080_v0, %v7079_v14  ;;  %v1770_v42 = vmul.f32 %v3884_v24, %v7036_v55  ;;  %v2376_v49 = vmul.f32 %v3978_v21, %v4375_v3  ;;  %v7083_v55 = vld [vmem:[#allocation50_spill] sm:$0xff] }
 0x16e   : > { %v2043_v35 = vadd.f32 %v4684_v41, %v1823_v48  ;;  %v1389_v33 = vmul.f32 %v3847_v6, %v1341_v59  ;;  %v5130_v53 = vmul.f32 %v3916_v36, %v1341_v59  ;;  %v2709_v1 = vadd.f32 %v4713_v8, %v2648_v61 }
 0x16f   : > { %v5133_v40 = vadd.f32 %v1388_v4, %v1221_v19  ;;  %v2596_v56 = vmul.f32 %v3981_v23, %v1341_v59  ;;  %v1824_v48 = vadd.f32 %v1770_v42, %v4780_v12  ;;  %v7081_v14 = vrot.slane %v4326_v5, 2 }
 0x170   : > { %v2209_v13 = vadd.f32 %v2155_v2, %v2043_v35  ;;  %v5139_v41 = vadd.f32 %v1389_v33, %v4393_v47  ;;  %v7082_v0 = vrot.slane %v4317_v43, 2  ;;  %v2763_v4 = vmax.f32 %v2709_v1, 0.0 }
 0x171   : > { %v1605_v22 = vadd.f32 %v7083_v55, %v4921_v38  ;;  %v1771_v2 = vmul.f32 %v3884_v24, %v7058_v18  ;;  %v2044_v59 = vadd.f32 %v4937_v39, %v1824_v48  ;;  %v2377_v43 = vmul.f32 %v3978_v21, %v4369_v62  ;;  %v7084_v55 = vld [vmem:[#allocation43_spill] sm:$0xff]  ;;  %v7110_v18 = vld [vmem:[#allocation62_spill] sm:$0xff] }
 0x172   : > { %v1323_v61 = vsel %vm1318_vm5, %v7082_v0, %v7081_v14  ;;  %v2429_v47 = vadd.f32 %v2375_v31, %v2209_v13  ;;  %2821 = vrot.lane.b32.xlu0 %v2763_v4, %s3710_s9  ;;  %v601_v42 = vadd.f32 %v7084_v55, %v3895_v28  ;;  %v7085_v1 = vrot.slane %v4321_v54, 1 }
 0x173   : > { %v1390_v19 = vmul.f32 %v3847_v6, %v1323_v61  ;;  %v5155_v12 = vmul.f32 %v3916_v36, %v1323_v61  ;;  %v1825_v33 = vadd.f32 %v1771_v2, %v1605_v22  ;;  %v2597_v38 = vmul.f32 %v3981_v23, %v1323_v61 }
 0x174   : > { %v2649_v31 = vadd.f32 %v2595_v20, %v2429_v47  ;;  %v2210_v39 = vadd.f32 %v4356_v15, %v2044_v59  ;;  %v7086_v13 = vrot.slane %v4326_v5, 1  ;;  %v7089_v22 = vmov %v7081_v14 }
 0x175   : > { %v5161_v35 = vadd.f32 %v1390_v19, %v4395_v9  ;;  %v7088_v9 = vrot.slane %v4321_v54, 2  ;;  %v2045_v0 = vadd.f32 %v5032_v51, %v1825_v33  ;;  %v651_v20 = vmax.f32 %v601_v42, 0.0 }
 0x176   : > { %v5173_v48 = vsel %vm1097_vm4, %v7086_v13, %v7085_v1  ;;  %v2710_v4 = vadd.f32 %v4713_v8, %v2649_v31  ;;  %v2430_v19 = vadd.f32 %v2376_v49, %v2210_v39  ;;  %v1772_v2 = vmul.f32 %v3884_v24, %v5094_v32 }
 0x177   : > { %7087 = vst [vmem:[#allocation45_spill] sm:$0xff] %v5173_v48  ;;  %v1359_v14 = vsel %vm1318_vm5, %v7089_v22, %v7088_v9  ;;  %v1170_v15 = vmul.f32 %v3836_v63, %v5173_v48  ;;  %v2211_v47 = vadd.f32 %v4360_v37, %v2045_v0  ;;  %v764_v59 = vrot.slane %v651_v20, 6 }
 0x178   : > { %v1391_v61 = vmul.f32 %v3847_v6, %v1359_v14  ;;  %v5189_v54 = vmul.f32 %v3916_v36, %v1359_v14  ;;  %v2158_v33 = vmul.f32 %v3973_v16, %v4326_v5  ;;  %v2764_v55 = vmax.f32 %v2710_v4, 0.0 }
 0x179   : > { %v1224_v51 = vadd.f32 %v1170_v15, %v4335_v25  ;;  %v2650_v42 = vadd.f32 %v2596_v56, %v2430_v19  ;;  %v1826_v1 = vadd.f32 %v1772_v2, %v4739_v44  ;;  %v2378_v49 = vmul.f32 %v3978_v21, %v5173_v48  ;;  %v7091_v44 = vld [vmem:[#allocation48_spill] sm:$0xff] }
 0x17a   : > { %v2431_v31 = vadd.f32 %v2377_v43, %v2211_v47  ;;  %v851_v39 = vsel %vm723_vm7, %v764_v59, %v3822_v57  ;;  %v2598_v37 = vmul.f32 %v3981_v23, %v1359_v14  ;;  %2823 = vrot.lane.b32.xlu1 %v2764_v55, %s3710_s9  ;;  %v596_v9 = vadd.f32 %v7091_v44, %v3895_v28  ;;  %v7096_v47 = vld [vmem:[#allocation61_spill] sm:$0xff]  ;;  %v7097_v55 = vld [vmem:[#allocation64_spill] sm:$0xff] }
 0x17b   : > { %v5200_v13 = vadd.f32 %v1391_v61, %v1224_v51  ;;  %v2711_v25 = vadd.f32 %v4713_v8, %v2650_v42  ;;  %v5206_v5 = vsel %vm854_vm8, %v851_v39, 0.0  ;;  %v2046_v56 = vadd.f32 %v1992_v58, %v1826_v1 }
 0x17c   : > { %7090 = vst [vmem:[#allocation50_spill] sm:$0xff] %v5206_v5  ;;  %v2651_v22 = vadd.f32 %v2597_v38, %v2431_v31  ;;  %v5212_v43 = vmul.f32 %v3829_v60, %v5206_v5  ;;  %v6788_v0 = vrot.slane %v5206_v5, 1  ;;  %v5218_v15 = vmul.f32 %v3856_v10, %v5206_v5 }
 0x17d   : > { %v2765_v20 = vmax.f32 %v2711_v25, 0.0  ;;  %v2212_v61 = vadd.f32 %v2158_v33, %v2046_v56  ;;  %v650_v4 = vmax.f32 %v596_v9, 0.0  ;;  %v7094_v19 = vrot.slane %v4363_v7, 2  ;;  %v7098_v56 = vld [vmem:[#allocation68_spill] sm:$0xff] }
 0x17e   : > { %7092 = vst [vmem:[#allocation43_spill] sm:$0xff] %v5212_v43  ;;  %7093 = vst [vmem:[#allocation48_spill] sm:$0xff] %v5218_v15  ;;  %v2712_v58 = vadd.f32 %v4713_v8, %v2651_v22  ;;  %v7095_v38 = vrot.slane %v4402_v27, 2  ;;  %v1795_v51 = vmul.f32 %v3884_v24, %v7096_v47  ;;  %v2015_v42 = vmul.f32 %v3916_v36, %v7097_v55  ;;  %v7111_v55 = vld [vmem:[#allocation65_spill] sm:$0xff]  ;;  %v7120_v43 = vld [vmem:[#allocation31_spill] sm:$0xff] }
 0x17f   : > { %2825 = vrot.lane.b32.xlu0 %v2765_v20, %s3710_s9  ;;  %v2432_v1 = vadd.f32 %v2378_v49, %v2212_v61  ;;  %v763_v33 = vrot.slane %v650_v4, 6  ;;  %v2401_v9 = vmul.f32 %v3978_v21, %v4426_v11  ;;  %v2014_v47 = vmul.f32 %v3916_v36, %v7111_v55 }
 0x180   : > { %v1331_v2 = vsel %vm1318_vm5, %v7095_v38, %v7094_v19  ;;  %v2766_v25 = vmax.f32 %v2712_v58, 0.0  ;;  %v1849_v44 = vadd.f32 %v1795_v51, %v7098_v56 }
 0x181   : > { %v1414_v31 = vmul.f32 %v3847_v6, %v1331_v2  ;;  %v5234_v39 = vmul.f32 %v3916_v36, %v1331_v2  ;;  %v2621_v22 = vmul.f32 %v3981_v23, %v1331_v2  ;;  %v2652_v19 = vadd.f32 %v2598_v37, %v2432_v1  ;;  %v7108_v2 = vld [vmem:[#allocation78_spill] sm:$0xff] }
 0x182   : > { %v5241_v38 = vsel %vm723_vm7, %v763_v33, %v764_v59  ;;  %v5245_v49 = vsel %vm723_vm7, %v3949_v50, %v763_v33  ;;  %2827 = vrot.lane.b32.xlu1 %v2766_v25, %s3710_s9  ;;  %v7109_v51 = vrot.slane %v7108_v2, 2 }
 0x183   : > { %7099 = vst [vmem:[#allocation68_spill] sm:$0xff] %v5241_v38  ;;  %7100 = vst [vmem:[#allocation164_spill] sm:$0xff] %v5245_v49  ;;  %v5248_v20 = vadd.f32 %v1414_v31, %v4454_v34  ;;  %v1034_v61 = vmul.f32 %v3829_v60, %v5245_v49  ;;  %v1035_v4 = vmul.f32 %v3829_v60, %v5241_v38  ;;  %v6789_v37 = vrot.slane %v5245_v49, 1 }
 0x184   : > { %v1076_v59 = vrot.slane %v5241_v38, 1  ;;  %v2713_v58 = vadd.f32 %v4713_v8, %v2652_v19  ;;  %v5262_v34 = vmul.f32 %v3856_v10, %v5245_v49  ;;  %v5278_v31 = vmul.f32 %v3856_v10, %v5241_v38 }
 0x185   : > { %v5282_v25 = vmul.f32 %v3973_v16, %v5245_v49  ;;  %v5290_v14 = vmul.f32 %v3973_v16, %v5241_v38  ;;  %v7194_v38 = vld [vmem:[#allocation116_spill] sm:$0xff] }
 0x186   : > { %7101 = vst [vmem:[#allocation165_spill] sm:$0xff] %v5262_v34  ;;  %v5268_v1 = vsel %vm1097_vm4, %v1076_v59, %v6788_v0  ;;  %v5274_v33 = vsel %vm1097_vm4, %v6789_v37, %v1076_v59  ;;  %7104 = vst [vmem:[#allocation168_spill] sm:$0xff] %v5278_v31  ;;  %v2767_v56 = vmax.f32 %v2713_v58, 0.0  ;;  %v2069_v59 = vadd.f32 %v2015_v42, %v1849_v44  ;;  %v7114_v44 = vld [vmem:[#allocation83_spill] sm:$0xff]  ;;  %v7116_v31 = vld [vmem:[#allocation81_spill] sm:$0xff] }
 0x187   : > { %7102 = vst [vmem:[#allocation166_spill] sm:$0xff] %v5268_v1  ;;  %7103 = vst [vmem:[#allocation167_spill] sm:$0xff] %v5274_v33  ;;  %v1201_v19 = vmul.f32 %v3836_v63, %v5274_v33  ;;  %v1202_v0 = vmul.f32 %v3836_v63, %v5268_v1  ;;  %v7107_v37 = vrot.slane %v4402_v27, 2  ;;  %v1794_v58 = vmul.f32 %v3884_v24, %v7110_v18 }
 0x188   : > { %7105 = vst [vmem:[#allocation169_spill] sm:$0xff] %v5282_v25  ;;  %7106 = vst [vmem:[#allocation170_spill] sm:$0xff] %v5290_v14  ;;  %2829 = vrot.lane.b32.xlu0 %v2767_v56, %s3710_s9  ;;  %v2235_v34 = vadd.f32 %v7114_v44, %v2069_v59  ;;  %v2400_v18 = vmul.f32 %v3978_v21, %v7116_v31  ;;  %v7121_v14 = vld [vmem:[#allocation72_spill] sm:$0xff] }
 0x189   : > { %v1349_v32 = vsel %vm1318_vm5, %v7109_v51, %v7107_v37  ;;  %v5303_v15 = vadd.f32 %v1201_v19, %v1034_v61  ;;  %v5305_v26 = vadd.f32 %v1202_v0, %v1035_v4  ;;  %v7115_v37 = vld [vmem:[#allocation67_spill] sm:$0xff]  ;;  %v7117_v0 = vrot.slane %v4474_v45, 2  ;;  %v7118_v61 = vld [vmem:[#allocation90_spill] sm:$0xff] }
 0x18a   : > { %v1413_v42 = vmul.f32 %v3847_v6, %v1349_v32  ;;  %v5309_v27 = vmul.f32 %v3916_v36, %v1349_v32  ;;  %v1848_v51 = vadd.f32 %v1794_v58, %v7115_v37  ;;  %v2620_v55 = vmul.f32 %v3981_v23, %v1349_v32 }
 0x18b   : > { %7112 = vst [vmem:[#allocation78_spill] sm:$0xff] %v5303_v15  ;;  %7113 = vst [vmem:[#allocation171_spill] sm:$0xff] %v5305_v26  ;;  %v7119_v4 = vrot.slane %v7118_v61, 2  ;;  %v1607_v59 = vadd.f32 %v7121_v14, %v7120_v43  ;;  %v1773_v58 = vmul.f32 %v3884_v24, %v4375_v3  ;;  %v2455_v44 = vadd.f32 %v2401_v9, %v2235_v34  ;;  %v7122_v26 = vld [vmem:[#allocation94_spill] sm:$0xff]  ;;  %v7134_v15 = vld [vmem:[#allocation60_spill] sm:$0xff] }
 0x18c   : > { %v5317_v56 = vadd.f32 %v1413_v42, %v4452_v29  ;;  %v2068_v37 = vadd.f32 %v2014_v47, %v1848_v51  ;;  %v2379_v25 = vmul.f32 %v3978_v21, %v7122_v26  ;;  %v7124_v43 = vrot.slane %v4363_v7, 1  ;;  %v7126_v9 = vld [vmem:[#allocation82_spill] sm:$0xff]  ;;  %v7127_v51 = vld [vmem:[#allocation99_spill] sm:$0xff] }
 0x18d   : > { %v1342_v19 = vsel %vm1318_vm5, %v7119_v4, %v7117_v0  ;;  %v1827_v42 = vadd.f32 %v1773_v58, %v1607_v59  ;;  %v7123_v0 = vrot.slane %v7108_v2, 1  ;;  %v2675_v47 = vadd.f32 %v2621_v22, %v2455_v44  ;;  %v7131_v44 = vld [vmem:[#allocation66_spill] sm:$0xff] }
 0x18e   : > { %v1392_v32 = vmul.f32 %v3847_v6, %v1342_v19  ;;  %v5331_v29 = vmul.f32 %v3916_v36, %v1342_v19  ;;  %v2599_v1 = vmul.f32 %v3981_v23, %v1342_v19  ;;  %v2234_v34 = vadd.f32 %v7126_v9, %v2068_v37  ;;  %v7132_v9 = vld [vmem:[#allocation76_spill] sm:$0xff] }
 0x18f   : > { %v5342_v14 = vsel %vm1097_vm4, %v7124_v43, %v7123_v0  ;;  %v2047_v58 = vadd.f32 %v5130_v53, %v1827_v42  ;;  %v7128_v19 = vrot.slane %v7108_v2, 2  ;;  %v7129_v3 = vrot.slane %v4363_v7, 2  ;;  %v7130_v0 = vld [vmem:[#allocation63_spill] sm:$0xff] }
 0x190   : > { %7125 = vst [vmem:[#allocation83_spill] sm:$0xff] %v5342_v14  ;;  %v5346_v4 = vadd.f32 %v1392_v32, %v7127_v51  ;;  %v1194_v59 = vmul.f32 %v3836_v63, %v5342_v14  ;;  %v1796_v22 = vmul.f32 %v3884_v24, %v7130_v0  ;;  %v2016_v37 = vmul.f32 %v3916_v36, %v7131_v44  ;;  %v7133_v42 = vld [vmem:[#allocation95_spill] sm:$0xff] }
 0x191   : > { %v1367_v5 = vsel %vm1318_vm5, %v7129_v3, %v7128_v19  ;;  %v2736_v32 = vadd.f32 %v4713_v8, %v2675_v47  ;;  %v2454_v43 = vadd.f32 %v2400_v18, %v2234_v34  ;;  %v2213_v2 = vadd.f32 %v7133_v42, %v2047_v58 }
 0x192   : > { %v1248_v51 = vadd.f32 %v1194_v59, %v7132_v9  ;;  %v1415_v53 = vmul.f32 %v3847_v6, %v1367_v5  ;;  %v1850_v33 = vadd.f32 %v1796_v22, %v7134_v15  ;;  %v5367_v49 = vmul.f32 %v3916_v36, %v1367_v5  ;;  %v7136_v15 = vld [vmem:[#allocation86_spill] sm:$0xff] }
 0x193   : > { %v2182_v3 = vmul.f32 %v3973_v16, %v4363_v7  ;;  %v2790_v19 = vmax.f32 %v2736_v32, 0.0  ;;  %v2674_v0 = vadd.f32 %v2620_v55, %v2454_v43  ;;  %v2402_v18 = vmul.f32 %v3978_v21, %v5342_v14 }
 0x194   : > { %v5371_v44 = vadd.f32 %v1415_v53, %v1248_v51  ;;  %v2433_v47 = vadd.f32 %v2379_v25, %v2213_v2  ;;  %v2070_v34 = vadd.f32 %v2016_v37, %v1850_v33  ;;  %v2622_v59 = vmul.f32 %v3981_v23, %v1367_v5  ;;  %v7141_v37 = vld [vmem:[#allocation71_spill] sm:$0xff] }
 0x195   : > { %v7135_v58 = vrot.slane %v7118_v61, 1  ;;  %v7137_v22 = vrot.slane %v7136_v15, 1  ;;  %2875 = vrot.lane.b32.xlu1 %v2790_v19, %s3710_s9  ;;  %v2735_v7 = vadd.f32 %v4713_v8, %v2674_v0  ;;  %v7139_v25 = vrot.slane %v7118_v61, 2  ;;  %v7142_v2 = vld [vmem:[#allocation87_spill] sm:$0xff] }
 0x196   : > { %v7140_v33 = vrot.slane %v7136_v15, 2  ;;  %v1609_v32 = vadd.f32 %v7141_v37, %v5133_v40  ;;  %v2653_v43 = vadd.f32 %v2599_v1, %v2433_v47  ;;  %v2236_v51 = vadd.f32 %v2182_v3, %v2070_v34  ;;  %v7143_v34 = vld [vmem:[#allocation79_spill] sm:$0xff] }
 0x197   : > { %v5382_v9 = vsel %vm1097_vm4, %v7137_v22, %v7135_v58  ;;  %v1775_v0 = vmul.f32 %v3884_v24, %v5173_v48  ;;  %v2789_v42 = vmax.f32 %v2735_v7, 0.0  ;;  %v2161_v58 = vmul.f32 %v3973_v16, %v7136_v15 }
 0x198   : > { %7138 = vst [vmem:[#allocation67_spill] sm:$0xff] %v5382_v9  ;;  %v1173_v55 = vmul.f32 %v3836_v63, %v5382_v9  ;;  %v1360_v5 = vsel %vm1318_vm5, %v7140_v33, %v7139_v25  ;;  %v2714_v22 = vadd.f32 %v4713_v8, %v2653_v43  ;;  %v2456_v25 = vadd.f32 %v2402_v18, %v2236_v51 }
 0x199   : > { %v1394_v53 = vmul.f32 %v3847_v6, %v1360_v5  ;;  %v5401_v61 = vmul.f32 %v3916_v36, %v1360_v5  ;;  %v1829_v40 = vadd.f32 %v1775_v0, %v1609_v32  ;;  %v2381_v1 = vmul.f32 %v3978_v21, %v5382_v9  ;;  %2873 = vrot.lane.b32.xlu0 %v2789_v42, %s3710_s9  ;;  %v7146_v0 = vld [vmem:[#allocation73_spill] sm:$0xff] }
 0x19a   : > { %v1227_v19 = vadd.f32 %v1173_v55, %v7142_v2  ;;  %v2601_v47 = vmul.f32 %v3981_v23, %v1360_v5  ;;  %v611_v7 = vadd.f32 %v7143_v34, %v3895_v28  ;;  %v7144_v55 = vmov %v7140_v33  ;;  %v7149_v34 = vld [vmem:[#allocation89_spill] sm:$0xff] }
 0x19b   : > { %v7145_v33 = vrot.slane %v4474_v45, 2  ;;  %v2768_v37 = vmax.f32 %v2714_v22, 0.0  ;;  %v2676_v32 = vadd.f32 %v2622_v59, %v2456_v25  ;;  %v2049_v43 = vadd.f32 %v5189_v54, %v1829_v40  ;;  %v7147_v59 = vld [vmem:[#allocation100_spill] sm:$0xff]  ;;  %v7148_v54 = vld [vmem:[#allocation93_spill] sm:$0xff] }
 0x19c   : > { %v5409_v3 = vadd.f32 %v1394_v53, %v1227_v19  ;;  %v653_v53 = vmax.f32 %v611_v7, 0.0  ;;  %v1608_v5 = vadd.f32 %v7146_v0, %v5029_v46  ;;  %v1774_v42 = vmul.f32 %v3884_v24, %v4369_v62  ;;  %v7150_v0 = vld [vmem:[#allocation114_spill] sm:$0xff]  ;;  %v7152_v62 = vld [vmem:[#allocation115_spill] sm:$0xff] }
 0x19d   : > { %v1324_v18 = vsel %vm1318_vm5, %v7145_v33, %v7144_v55  ;;  %2831 = vrot.lane.b32.xlu1 %v2768_v37, %s3710_s9  ;;  %v2737_v45 = vadd.f32 %v4713_v8, %v2676_v32  ;;  %v2215_v2 = vadd.f32 %v2161_v58, %v2049_v43  ;;  %v2380_v22 = vmul.f32 %v3978_v21, %v7148_v54 }
 0x19e   : > { %v1393_v51 = vmul.f32 %v3847_v6, %v1324_v18  ;;  %v5427_v15 = vmul.f32 %v3916_v36, %v1324_v18  ;;  %v767_v25 = vrot.slane %v653_v53, 6  ;;  %v1828_v40 = vadd.f32 %v1774_v42, %v1608_v5 }
 0x19f   : > { %v2600_v46 = vmul.f32 %v3981_v23, %v1324_v18  ;;  %v606_v7 = vadd.f32 %v7149_v34, %v3895_v28  ;;  %v2791_v55 = vmax.f32 %v2737_v45, 0.0  ;;  %v2435_v33 = vadd.f32 %v2381_v1, %v2215_v2  ;;  %v7155_v45 = vld [vmem:[#allocation84_spill] sm:$0xff] }
 0x1a0   : > { %v5432_v19 = vadd.f32 %v1393_v51, %v7147_v59  ;;  %v7151_v37 = vrot.slane %v7150_v0, 2  ;;  %v7153_v32 = vrot.slane %v7152_v62, 2  ;;  %v1797_v43 = vmul.f32 %v3884_v24, %v7116_v31 }
 0x1a1   : > { %v852_v51 = vsel %vm723_vm7, %v767_v25, %v3822_v57  ;;  %v2048_v18 = vadd.f32 %v5155_v12, %v1828_v40  ;;  %v652_v53 = vmax.f32 %v606_v7, 0.0  ;;  %2877 = vrot.lane.b32.xlu0 %v2791_v55, %s3710_s9  ;;  %v2655_v1 = vadd.f32 %v2601_v47, %v2435_v33  ;;  %v7158_v55 = vld [vmem:[#allocation96_spill] sm:$0xff]  ;;  %v7162_v40 = vld [vmem:[#allocation98_spill] sm:$0xff] }
 0x1a2   : > { %v1350_v58 = vsel %vm1318_vm5, %v7153_v32, %v7151_v37  ;;  %v5453_v42 = vsel %vm854_vm8, %v852_v51, 0.0  ;;  %v1851_v2 = vadd.f32 %v1797_v43, %v7155_v45  ;;  %v7159_v32 = vld [vmem:[#allocation124_spill] sm:$0xff]  ;;  %v7161_v45 = vld [vmem:[#allocation119_spill] sm:$0xff]  ;;  %v7163_v48 = vrot.slane %v7162_v40, 2 }
 0x1a3   : > { %v1416_v5 = vmul.f32 %v3847_v6, %v1350_v58  ;;  %7154 = vst [vmem:[#allocation90_spill] sm:$0xff] %v5453_v42  ;;  %v5457_v59 = vmul.f32 %v3916_v36, %v1350_v58  ;;  %v5461_v34 = vmul.f32 %v3829_v60, %v5453_v42  ;;  %v5467_v7 = vmul.f32 %v3856_v10, %v5453_v42 }
 0x1a4   : > { %v2716_v47 = vadd.f32 %v4713_v8, %v2655_v1  ;;  %v2214_v33 = vadd.f32 %v7158_v55, %v2048_v18  ;;  %v766_v37 = vrot.slane %v652_v53, 6  ;;  %v2071_v51 = vadd.f32 %v5309_v27, %v1851_v2 }
 0x1a5   : > { %7156 = vst [vmem:[#allocation31_spill] sm:$0xff] %v5461_v34  ;;  %7157 = vst [vmem:[#allocation72_spill] sm:$0xff] %v5467_v7  ;;  %v5472_v43 = vadd.f32 %v1416_v5, %v7159_v32  ;;  %v2403_v31 = vmul.f32 %v3978_v21, %v7161_v45  ;;  %v2623_v12 = vmul.f32 %v3981_v23, %v1350_v58  ;;  %v7164_v34 = vrot.slane %v7150_v0, 2 }
 0x1a6   : > { %v2770_v7 = vmax.f32 %v2716_v47, 0.0  ;;  %v2434_v18 = vadd.f32 %v2380_v22, %v2214_v33  ;;  %v5485_v53 = vsel %vm723_vm7, %v766_v37, %v767_v25  ;;  %v5489_v27 = vsel %vm723_vm7, %v3949_v50, %v766_v37 }
 0x1a7   : > { %7160 = vst [vmem:[#allocation82_spill] sm:$0xff] %v5472_v43  ;;  %v1332_v1 = vsel %vm1318_vm5, %v7164_v34, %v7163_v48  ;;  %7165 = vst [vmem:[#allocation99_spill] sm:$0xff] %v5485_v53  ;;  %v1037_v5 = vmul.f32 %v3829_v60, %v5489_v27  ;;  %v1038_v58 = vmul.f32 %v3829_v60, %v5485_v53  ;;  %v6804_v0 = vrot.slane %v5489_v27, 1 }
 0x1a8   : > { %7166 = vst [vmem:[#allocation76_spill] sm:$0xff] %v5489_v27  ;;  %v1077_v2 = vrot.slane %v5485_v53, 1  ;;  %2835 = vrot.lane.b32.xlu1 %v2770_v7, %s3710_s9  ;;  %v2654_v48 = vadd.f32 %v2600_v46, %v2434_v18  ;;  %v5502_v34 = vmul.f32 %v3856_v10, %v5489_v27  ;;  %v7168_v47 = vrot.slane %v5453_v42, 1 }
 0x1a9   : > { %v5518_v46 = vmul.f32 %v3856_v10, %v5485_v53  ;;  %v5522_v33 = vmul.f32 %v3973_v16, %v5489_v27  ;;  %v1417_v22 = vmul.f32 %v3847_v6, %v1332_v1  ;;  %v1798_v25 = vmul.f32 %v3884_v24, %v4426_v11 }
 0x1aa   : > { %7167 = vst [vmem:[#allocation95_spill] sm:$0xff] %v5502_v34  ;;  %v5508_v55 = vsel %vm1097_vm4, %v1077_v2, %v7168_v47  ;;  %v5514_v7 = vsel %vm1097_vm4, %v6804_v0, %v1077_v2  ;;  %v2715_v37 = vadd.f32 %v4713_v8, %v2654_v48  ;;  %v5531_v2 = vmul.f32 %v3973_v16, %v5485_v53  ;;  %v7174_v47 = vld [vmem:[#allocation122_spill] sm:$0xff] }
 0x1ab   : > { %7169 = vst [vmem:[#allocation60_spill] sm:$0xff] %v5508_v55  ;;  %7170 = vst [vmem:[#allocation86_spill] sm:$0xff] %v5514_v7  ;;  %v1204_v32 = vmul.f32 %v3836_v63, %v5514_v7  ;;  %v1205_v18 = vmul.f32 %v3836_v63, %v5508_v55  ;;  %v2237_v0 = vadd.f32 %v7174_v47, %v2071_v51  ;;  %v7177_v7 = vld [vmem:[#allocation118_spill] sm:$0xff]  ;;  %v7180_v51 = vld [vmem:[#allocation85_spill] sm:$0xff]  ;;  %v7181_v11 = vrot.slane %v7152_v62, 1 }
 0x1ac   : > { %7171 = vst [vmem:[#allocation71_spill] sm:$0xff] %v5518_v46  ;;  %7172 = vst [vmem:[#allocation87_spill] sm:$0xff] %v5522_v33  ;;  %v5538_v46 = vmul.f32 %v3916_v36, %v1332_v1  ;;  %v2769_v48 = vmax.f32 %v2715_v37, 0.0  ;;  %v2404_v27 = vmul.f32 %v3978_v21, %v7177_v7  ;;  %v1852_v47 = vadd.f32 %v1798_v25, %v7180_v51 }
 0x1ad   : > { %7173 = vst [vmem:[#allocation79_spill] sm:$0xff] %v5531_v2  ;;  %v5540_v34 = vadd.f32 %v1204_v32, %v1037_v5  ;;  %v5542_v33 = vadd.f32 %v1205_v18, %v1038_v58  ;;  %v2457_v55 = vadd.f32 %v2403_v31, %v2237_v0  ;;  %v7178_v2 = vld [vmem:[#allocation125_spill] sm:$0xff]  ;;  %v2624_v42 = vmul.f32 %v3981_v23, %v1332_v1 }
 0x1ae   : > { %v5547_v53 = vadd.f32 %v1417_v22, %v7178_v2  ;;  %2833 = vrot.lane.b32.xlu0 %v2769_v48, %s3710_s9  ;;  %v7182_v5 = vrot.slane %v7162_v40, 1  ;;  %v7184_v37 = vrot.slane %v7152_v62, 2  ;;  %v7185_v31 = vrot.slane %v7162_v40, 2  ;;  %v7186_v62 = vld [vmem:[#allocation77_spill] sm:$0xff] }
 0x1af   : > { %7175 = vst [vmem:[#allocation73_spill] sm:$0xff] %v5540_v34  ;;  %7176 = vst [vmem:[#allocation100_spill] sm:$0xff] %v5542_v33  ;;  %v1799_v1 = vmul.f32 %v3884_v24, %v5342_v14  ;;  %v2185_v22 = vmul.f32 %v3973_v16, %v7162_v40  ;;  %v2677_v25 = vadd.f32 %v2623_v12, %v2457_v55  ;;  %v7187_v12 = vld [vmem:[#allocation123_spill] sm:$0xff] }
 0x1b0   : > { %7179 = vst [vmem:[#allocation89_spill] sm:$0xff] %v5547_v53  ;;  %v5558_v58 = vsel %vm1097_vm4, %v7182_v5, %v7181_v11  ;;  %v1368_v0 = vsel %vm1318_vm5, %v7185_v31, %v7184_v37  ;;  %v2072_v32 = vadd.f32 %v5234_v39, %v1852_v47  ;;  %v7188_v39 = vld [vmem:[#allocation103_spill] sm:$0xff]  ;;  %v7189_v37 = vld [vmem:[#allocation106_spill] sm:$0xff] }
 0x1b1   : > { %7183 = vst [vmem:[#allocation114_spill] sm:$0xff] %v5558_v58  ;;  %v1197_v11 = vmul.f32 %v3836_v63, %v5558_v58  ;;  %v1418_v18 = vmul.f32 %v3847_v6, %v1368_v0  ;;  %v1853_v2 = vadd.f32 %v1799_v1, %v7186_v62  ;;  %v5576_v48 = vmul.f32 %v3916_v36, %v1368_v0  ;;  %v7191_v14 = vld [vmem:[#allocation107_spill] sm:$0xff] }
 0x1b2   : > { %v2405_v51 = vmul.f32 %v3978_v21, %v5558_v58  ;;  %v2625_v5 = vmul.f32 %v3981_v23, %v1368_v0  ;;  %v2738_v40 = vadd.f32 %v4713_v8, %v2677_v25  ;;  %v2238_v55 = vadd.f32 %v7187_v12, %v2072_v32  ;;  %v7193_v53 = vld [vmem:[#allocation91_spill] sm:$0xff] }
 0x1b3   : > { %v1251_v47 = vadd.f32 %v1197_v11, %v7188_v39  ;;  %v7190_v31 = vrot.slane %v7189_v37, 2  ;;  %v7192_v34 = vrot.slane %v7191_v14, 2  ;;  %v2073_v62 = vadd.f32 %v5367_v49, %v1853_v2  ;;  %v7195_v2 = vld [vmem:[#allocation111_spill] sm:$0xff] }
 0x1b4   : > { %v1610_v0 = vadd.f32 %v7193_v53, %v5139_v41  ;;  %v1776_v25 = vmul.f32 %v3884_v24, %v7122_v26  ;;  %v2792_v32 = vmax.f32 %v2738_v40, 0.0  ;;  %v2458_v12 = vadd.f32 %v2404_v27, %v2238_v55  ;;  %v7196_v40 = vld [vmem:[#allocation97_spill] sm:$0xff] }
 0x1b5   : > { %v1343_v1 = vsel %vm1318_vm5, %v7192_v34, %v7190_v31  ;;  %v5596_v11 = vadd.f32 %v1418_v18, %v1251_v47  ;;  %v2239_v43 = vadd.f32 %v2185_v22, %v2073_v62  ;;  %v2382_v31 = vmul.f32 %v3978_v21, %v7195_v2  ;;  %v7199_v22 = vld [vmem:[#allocation92_spill] sm:$0xff] }
 0x1b6   : > { %v1395_v33 = vmul.f32 %v3847_v6, %v1343_v1  ;;  %v5599_v39 = vmul.f32 %v3916_v36, %v1343_v1  ;;  %v1830_v49 = vadd.f32 %v1776_v25, %v1610_v0  ;;  %2879 = vrot.lane.b32.xlu1 %v2792_v32, %s3710_s9  ;;  %v2678_v41 = vadd.f32 %v2624_v42, %v2458_v12 }
 0x1b7   : > { %v2602_v53 = vmul.f32 %v3981_v23, %v1343_v1  ;;  %v7197_v27 = vrot.slane %v7196_v40, 2  ;;  %v7198_v18 = vrot.slane %v7189_v37, 2  ;;  %v1777_v42 = vmul.f32 %v3884_v24, %v7148_v54  ;;  %v7200_v37 = vld [vmem:[#allocation110_spill] sm:$0xff] }
 0x1b8   : > { %v5602_v34 = vadd.f32 %v1395_v33, %v7194_v38  ;;  %v1611_v38 = vadd.f32 %v7199_v22, %v5161_v35  ;;  %v2459_v33 = vadd.f32 %v2405_v51, %v2239_v43  ;;  %v2050_v47 = vadd.f32 %v5331_v29, %v1830_v49  ;;  %v7201_v35 = vld [vmem:[#allocation112_spill] sm:$0xff]  ;;  %v7202_v51 = vld [vmem:[#allocation117_spill] sm:$0xff] }
 0x1b9   : > { %v1325_v55 = vsel %vm1318_vm5, %v7198_v18, %v7197_v27  ;;  %v2739_v1 = vadd.f32 %v4713_v8, %v2678_v41  ;;  %v2383_v25 = vmul.f32 %v3978_v21, %v7200_v37  ;;  %v7203_v18 = vld [vmem:[#allocation127_spill] sm:$0xff]  ;;  %v7204_v41 = vrot.slane %v7191_v14, 1 }
 0x1ba   : > { %v1396_v62 = vmul.f32 %v3847_v6, %v1325_v55  ;;  %v5622_v0 = vmul.f32 %v3916_v36, %v1325_v55  ;;  %v2603_v32 = vmul.f32 %v3981_v23, %v1325_v55  ;;  %v2679_v12 = vadd.f32 %v2625_v5, %v2459_v33 }
 0x1bb   : > { %v2216_v43 = vadd.f32 %v7201_v35, %v2050_v47  ;;  %v1831_v49 = vadd.f32 %v1777_v42, %v1611_v38  ;;  %v2793_v27 = vmax.f32 %v2739_v1, 0.0  ;;  %v621_v22 = vadd.f32 %v7203_v18, %v3895_v28 }
 0x1bc   : > { %v5629_v29 = vadd.f32 %v1396_v62, %v7202_v51  ;;  %v7205_v54 = vrot.slane %v7196_v40, 1  ;;  %v7207_v5 = vrot.slane %v7191_v14, 2  ;;  %v7208_v55 = vrot.slane %v7196_v40, 2  ;;  %v7209_v14 = vld [vmem:[#allocation88_spill] sm:$0xff] }
 0x1bd   : > { %v2740_v38 = vadd.f32 %v4713_v8, %v2679_v12  ;;  %v2436_v47 = vadd.f32 %v2382_v31, %v2216_v43  ;;  %v2051_v62 = vadd.f32 %v5427_v15, %v1831_v49  ;;  %2881 = vrot.lane.b32.xlu0 %v2793_v27, %s3710_s9  ;;  %v655_v1 = vmax.f32 %v621_v22, 0.0  ;;  %v7210_v12 = vld [vmem:[#allocation113_spill] sm:$0xff] }
 0x1be   : > { %v5639_v26 = vsel %vm1097_vm4, %v7205_v54, %v7204_v41  ;;  %v1361_v33 = vsel %vm1318_vm5, %v7208_v55, %v7207_v5  ;;  %v1612_v35 = vadd.f32 %v7209_v14, %v5200_v13  ;;  %v1778_v51 = vmul.f32 %v3884_v24, %v5382_v9  ;;  %v7211_v43 = vld [vmem:[#allocation101_spill] sm:$0xff]  ;;  %v7224_v9 = vld [vmem:[#allocation120_spill] sm:$0xff] }
 0x1bf   : > { %7206 = vst [vmem:[#allocation115_spill] sm:$0xff] %v5639_v26  ;;  %v1176_v42 = vmul.f32 %v3836_v63, %v5639_v26  ;;  %v1397_v54 = vmul.f32 %v3847_v6, %v1361_v33  ;;  %v2794_v18 = vmax.f32 %v2740_v38, 0.0  ;;  %v2656_v41 = vadd.f32 %v2602_v53, %v2436_v47 }
 0x1c0   : > { %v2217_v31 = vadd.f32 %v7210_v12, %v2051_v62  ;;  %v770_v49 = vrot.slane %v655_v1, 6  ;;  %v1832_v5 = vadd.f32 %v1778_v51, %v1612_v35  ;;  %v5660_v55 = vmul.f32 %v3916_v36, %v1361_v33  ;;  %v7215_v51 = vld [vmem:[#allocation37_spill] sm:$0xff]  ;;  %v5699_v12 = vld [vmem:[%s6638_s4] ss:$0 sm:$0xff] }
 0x1c1   : > { %v1230_v15 = vadd.f32 %v1176_v42, %v7211_v43  ;;  %v2164_v27 = vmul.f32 %v3973_v16, %v7196_v40  ;;  %2883 = vrot.lane.b32.xlu1 %v2794_v18, %s3710_s9  ;;  %v2717_v13 = vadd.f32 %v4713_v8, %v2656_v41  ;;  %v2384_v53 = vmul.f32 %v3978_v21, %v5639_v26  ;;  %v7212_v42 = vld [vmem:[#allocation131_spill] sm:$0xff] }
 0x1c2   : > { %v2437_v22 = vadd.f32 %v2383_v25, %v2217_v31  ;;  %v853_v38 = vsel %vm723_vm7, %v770_v49, %v3822_v57  ;;  %v2052_v47 = vadd.f32 %v5401_v61, %v1832_v5  ;;  %v2604_v62 = vmul.f32 %v3981_v23, %v1361_v33  ;;  %v7213_v25 = vld [vmem:[#allocation151_spill] sm:$0xff] }
 0x1c3   : > { %v5666_v14 = vadd.f32 %v1397_v54, %v1230_v15  ;;  %v616_v40 = vadd.f32 %v7212_v42, %v3895_v28  ;;  %v2771_v1 = vmax.f32 %v2717_v13, 0.0  ;;  %v5677_v8 = vsel %vm854_vm8, %v853_v38, 0.0  ;;  %v7219_v13 = vld [vmem:[#allocation121_spill] sm:$0xff] }
 0x1c4   : > { %v2657_v35 = vadd.f32 %v2603_v32, %v2437_v22  ;;  %v7214_v54 = vrot.slane %v7213_v25, 2  ;;  %v7216_v18 = vrot.slane %v7215_v51, 2  ;;  %v5687_v61 = vmul.f32 %v3829_v60, %v5677_v8 }
 0x1c5   : > { %v5693_v32 = vmul.f32 %v3856_v10, %v5677_v8  ;;  %2837 = vrot.lane.b32.xlu0 %v2771_v1, %s3710_s9  ;;  %v2218_v43 = vadd.f32 %v2164_v27, %v2052_v47  ;;  %v654_v15 = vmax.f32 %v616_v40, 0.0  ;;  %v1635_v22 = vadd.f32 %v7219_v13, %v5248_v20  ;;  %v7220_v1 = vld [vmem:[#allocation28_spill] sm:$0xff] }
 0x1c6   : > { %v1333_v41 = vsel %vm1318_vm5, %v7216_v18, %v7214_v54  ;;  %7217 = vst [vmem:[#allocation84_spill] sm:$0xff] %v5687_v61  ;;  %v2718_v31 = vadd.f32 %v5699_v12, %v2657_v35  ;;  %v1801_v38 = vmul.f32 %v3884_v24, %v7177_v7  ;;  %v2407_v54 = vmul.f32 %v3978_v21, %v7220_v1  ;;  %v7222_v35 = vld [vmem:[#allocation56_spill] sm:$0xff] }
 0x1c7   : > { %7218 = vst [vmem:[#allocation96_spill] sm:$0xff] %v5693_v32  ;;  %v1420_v5 = vmul.f32 %v3847_v6, %v1333_v41  ;;  %v5708_v42 = vmul.f32 %v3916_v36, %v1333_v41  ;;  %v2438_v28 = vadd.f32 %v2384_v53, %v2218_v43  ;;  %v769_v33 = vrot.slane %v654_v15, 6 }
 0x1c8   : > { %v2772_v18 = vmax.f32 %v2718_v31, 0.0  ;;  %v1855_v47 = vadd.f32 %v1801_v38, %v1635_v22  ;;  %v2627_v40 = vmul.f32 %v3981_v23, %v1333_v41  ;;  %v7221_v20 = vrot.slane %v7215_v51, 2 }
 0x1c9   : > { %v5713_v27 = vadd.f32 %v1420_v5, %v5026_v30  ;;  %v7223_v13 = vrot.slane %v7222_v35, 2  ;;  %v1634_v32 = vadd.f32 %v7224_v9, %v5317_v56  ;;  %v2658_v53 = vadd.f32 %v2604_v62, %v2438_v28 }
 0x1ca   : > { %2839 = vrot.lane.b32.xlu1 %v2772_v18, %s3710_s9  ;;  %v5726_v31 = vsel %vm723_vm7, %v769_v33, %v770_v49  ;;  %v5730_v30 = vsel %vm723_vm7, %v3949_v50, %v769_v33  ;;  %v7226_v33 = vrot.slane %v5677_v8, 1  ;;  %v7232_v49 = vld [vmem:[#allocation57_spill] sm:$0xff] }
 0x1cb   : > { %v1351_v7 = vsel %vm1318_vm5, %v7223_v13, %v7221_v20  ;;  %v1040_v41 = vmul.f32 %v3829_v60, %v5730_v30  ;;  %v1041_v43 = vmul.f32 %v3829_v60, %v5726_v31  ;;  %v6823_v56 = vrot.slane %v5730_v30, 1 }
 0x1cc   : > { %v1419_v51 = vmul.f32 %v3847_v6, %v1351_v7  ;;  %v1078_v9 = vrot.slane %v5726_v31, 1  ;;  %v2719_v62 = vadd.f32 %v5699_v12, %v2658_v53  ;;  %v5744_v50 = vmul.f32 %v3856_v10, %v5730_v30 }
 0x1cd   : > { %v5760_v5 = vmul.f32 %v3856_v10, %v5726_v31  ;;  %v5764_v22 = vmul.f32 %v3973_v16, %v5730_v30  ;;  %v5772_v13 = vmul.f32 %v3973_v16, %v5726_v31  ;;  %v2075_v53 = vadd.f32 %v5538_v46, %v1855_v47  ;;  %v7233_v47 = vld [vmem:[#allocation44_spill] sm:$0xff] }
 0x1ce   : > { %7225 = vst [vmem:[#allocation124_spill] sm:$0xff] %v5744_v50  ;;  %v5750_v15 = vsel %vm1097_vm4, %v1078_v9, %v7226_v33  ;;  %v5756_v60 = vsel %vm1097_vm4, %v6823_v56, %v1078_v9  ;;  %v2773_v38 = vmax.f32 %v2719_v62, 0.0  ;;  %v5776_v10 = vadd.f32 %v1419_v51, %v5024_v17  ;;  %v7234_v50 = vld [vmem:[#allocation26_spill] sm:$0xff] }
 0x1cf   : > { %7227 = vst [vmem:[#allocation98_spill] sm:$0xff] %v5750_v15  ;;  %7228 = vst [vmem:[#allocation122_spill] sm:$0xff] %v5760_v5  ;;  %v1207_v18 = vmul.f32 %v3836_v63, %v5756_v60  ;;  %v1208_v20 = vmul.f32 %v3836_v63, %v5750_v15  ;;  %v1800_v9 = vmul.f32 %v3884_v24, %v7161_v45  ;;  %v7235_v57 = vrot.slane %v7234_v50, 2  ;;  %v7236_v45 = vld [vmem:[#allocation49_spill] sm:$0xff] }
 0x1d0   : > { %7229 = vst [vmem:[#allocation125_spill] sm:$0xff] %v5764_v22  ;;  %7230 = vst [vmem:[#allocation85_spill] sm:$0xff] %v5772_v13  ;;  %v5781_v62 = vmul.f32 %v3916_v36, %v1351_v7  ;;  %2841 = vrot.lane.b32.xlu0 %v2773_v38, %s3710_s9  ;;  %v2406_v28 = vmul.f32 %v3978_v21, %v7232_v49  ;;  %v2626_v46 = vmul.f32 %v3981_v23, %v1351_v7 }
 0x1d1   : > { %v5784_v33 = vadd.f32 %v1207_v18, %v1040_v41  ;;  %v5786_v56 = vadd.f32 %v1208_v20, %v1041_v43  ;;  %v2241_v17 = vadd.f32 %v7233_v47, %v2075_v53  ;;  %v1854_v51 = vadd.f32 %v1800_v9, %v1634_v32  ;;  %v7238_v41 = vld [vmem:[#allocation108_spill] sm:$0xff]  ;;  %v7239_v20 = vld [vmem:[#allocation135_spill] sm:$0xff] }
 0x1d2   : > { %v7237_v5 = vrot.slane %v7236_v45, 2  ;;  %v1613_v38 = vadd.f32 %v7238_v41, %v5346_v4  ;;  %v1779_v18 = vmul.f32 %v3884_v24, %v7195_v2  ;;  %v2385_v32 = vmul.f32 %v3978_v21, %v7239_v20  ;;  %v7243_v41 = vld [vmem:[#allocation142_spill] sm:$0xff] }
 0x1d3   : > { %7231 = vst [vmem:[#allocation77_spill] sm:$0xff] %v5786_v56  ;;  %v2461_v53 = vadd.f32 %v2407_v54, %v2241_v17  ;;  %v2074_v9 = vadd.f32 %v5457_v59, %v1854_v51  ;;  %v7241_v4 = vrot.slane %v7213_v25, 1  ;;  %v7244_v54 = vrot.slane %v7222_v35, 2  ;;  %v7246_v51 = vld [vmem:[#allocation59_spill] sm:$0xff] }
 0x1d4   : > { %v1344_v13 = vsel %vm1318_vm5, %v7237_v5, %v7235_v57  ;;  %v7240_v57 = vrot.slane %v7222_v35, 1  ;;  %v1833_v61 = vadd.f32 %v1779_v18, %v1613_v38  ;;  %v7245_v59 = vrot.slane %v7213_v25, 2  ;;  %v7248_v18 = vld [vmem:[#allocation152_spill] sm:$0xff] }
 0x1d5   : > { %v1398_v43 = vmul.f32 %v3847_v6, %v1344_v13  ;;  %v5804_v7 = vmul.f32 %v3916_v36, %v1344_v13  ;;  %v2605_v47 = vmul.f32 %v3981_v23, %v1344_v13  ;;  %v2681_v17 = vadd.f32 %v2627_v40, %v2461_v53 }
 0x1d6   : > { %v5816_v5 = vsel %vm1097_vm4, %v7241_v4, %v7240_v57  ;;  %v1369_v13 = vsel %vm1318_vm5, %v7245_v59, %v7244_v54  ;;  %v2240_v56 = vadd.f32 %v7246_v51, %v2074_v9  ;;  %v7247_v4 = vld [vmem:[#allocation104_spill] sm:$0xff]  ;;  %v2053_v38 = vadd.f32 %v5599_v39, %v1833_v61 }
 0x1d7   : > { %7242 = vst [vmem:[#allocation123_spill] sm:$0xff] %v5816_v5  ;;  %v5819_v2 = vadd.f32 %v1398_v43, %v7243_v41  ;;  %v1200_v22 = vmul.f32 %v3836_v63, %v5816_v5  ;;  %v1421_v57 = vmul.f32 %v3847_v6, %v1369_v13  ;;  %v1636_v43 = vadd.f32 %v7247_v4, %v5371_v44  ;;  %v7249_v44 = vld [vmem:[#allocation136_spill] sm:$0xff] }
 0x1d8   : > { %v1802_v35 = vmul.f32 %v3884_v24, %v5558_v58  ;;  %v5838_v15 = vmul.f32 %v3916_v36, %v1369_v13  ;;  %v2742_v54 = vadd.f32 %v5699_v12, %v2681_v17  ;;  %v2460_v40 = vadd.f32 %v2406_v28, %v2240_v56  ;;  %v7251_v58 = vld [vmem:[#allocation128_spill] sm:$0xff] }
 0x1d9   : > { %v1254_v41 = vadd.f32 %v1200_v22, %v7248_v18  ;;  %v2188_v53 = vmul.f32 %v3973_v16, %v7213_v25  ;;  %v2408_v9 = vmul.f32 %v3978_v21, %v5816_v5  ;;  %v2219_v59 = vadd.f32 %v7249_v44, %v2053_v38  ;;  %v7257_v44 = vld [vmem:[#allocation129_spill] sm:$0xff] }
 0x1da   : > { %v1856_v61 = vadd.f32 %v1802_v35, %v1636_v43  ;;  %v2628_v22 = vmul.f32 %v3981_v23, %v1369_v13  ;;  %v2796_v51 = vmax.f32 %v2742_v54, 0.0  ;;  %v2680_v4 = vadd.f32 %v2626_v46, %v2460_v40  ;;  %v7256_v35 = vld [vmem:[#allocation102_spill] sm:$0xff] }
 0x1db   : > { %v5846_v39 = vadd.f32 %v1421_v57, %v1254_v41  ;;  %v7250_v18 = vrot.slane %v7236_v45, 1  ;;  %v7252_v17 = vrot.slane %v7251_v58, 1  ;;  %v7254_v25 = vrot.slane %v7236_v45, 2 }
 0x1dc   : > { %v7255_v28 = vrot.slane %v7251_v58, 2  ;;  %v2439_v43 = vadd.f32 %v2385_v32, %v2219_v59  ;;  %v2076_v13 = vadd.f32 %v5576_v48, %v1856_v61  ;;  %2887 = vrot.lane.b32.xlu1 %v2796_v51, %s3710_s9  ;;  %v2741_v41 = vadd.f32 %v5699_v12, %v2680_v4 }
 0x1dd   : > { %v5855_v56 = vsel %vm1097_vm4, %v7252_v17, %v7250_v18  ;;  %v1615_v45 = vadd.f32 %v7256_v35, %v5409_v3  ;;  %v1781_v54 = vmul.f32 %v3884_v24, %v5639_v26  ;;  %v2167_v61 = vmul.f32 %v3973_v16, %v7251_v58 }
 0x1de   : > { %7253 = vst [vmem:[#allocation103_spill] sm:$0xff] %v5855_v56  ;;  %v1362_v57 = vsel %vm1318_vm5, %v7255_v28, %v7254_v25  ;;  %v1179_v46 = vmul.f32 %v3836_v63, %v5855_v56  ;;  %v2659_v32 = vadd.f32 %v2605_v47, %v2439_v43  ;;  %v2242_v48 = vadd.f32 %v2188_v53, %v2076_v13 }
 0x1df   : > { %v1400_v38 = vmul.f32 %v3847_v6, %v1362_v57  ;;  %v5874_v40 = vmul.f32 %v3916_v36, %v1362_v57  ;;  %v2795_v18 = vmax.f32 %v2741_v41, 0.0  ;;  %v1835_v51 = vadd.f32 %v1781_v54, %v1615_v45 }
 0x1e0   : > { %v1233_v59 = vadd.f32 %v1179_v46, %v7257_v44  ;;  %v2387_v4 = vmul.f32 %v3978_v21, %v5855_v56  ;;  %v2607_v3 = vmul.f32 %v3981_v23, %v1362_v57  ;;  %v2720_v17 = vadd.f32 %v5699_v12, %v2659_v32  ;;  %v7260_v57 = vld [vmem:[#allocation109_spill] sm:$0xff]  ;;  %v7262_v32 = vld [vmem:[#allocation143_spill] sm:$0xff] }
 0x1e1   : > { %v2462_v25 = vadd.f32 %v2408_v9, %v2242_v48  ;;  %v7258_v47 = vrot.slane %v7251_v58, 2  ;;  %v7259_v53 = vrot.slane %v7234_v50, 2  ;;  %2885 = vrot.lane.b32.xlu0 %v2795_v18, %s3710_s9  ;;  %v2055_v13 = vadd.f32 %v5660_v55, %v1835_v51  ;;  %v7261_v50 = vld [vmem:[#allocation134_spill] sm:$0xff] }
 0x1e2   : > { %v5883_v28 = vadd.f32 %v1400_v38, %v1233_v59  ;;  %v1614_v41 = vadd.f32 %v7260_v57, %v5432_v19  ;;  %v1780_v9 = vmul.f32 %v3884_v24, %v7200_v37  ;;  %v2774_v38 = vmax.f32 %v2720_v17, 0.0  ;;  %v7263_v59 = vld [vmem:[#allocation68_spill] sm:$0xff] }
 0x1e3   : > { %v1326_v43 = vsel %vm1318_vm5, %v7259_v53, %v7258_v47  ;;  %v2682_v35 = vadd.f32 %v2628_v22, %v2462_v25  ;;  %v2386_v45 = vmul.f32 %v3978_v21, %v7261_v50  ;;  %v2221_v54 = vadd.f32 %v2167_v61, %v2055_v13  ;;  %v7265_v22 = vld [vmem:[#allocation164_spill] sm:$0xff]  ;;  %v7267_v25 = vld [vmem:[#allocation82_spill] sm:$0xff] }
 0x1e4   : > { %v1399_v46 = vmul.f32 %v3847_v6, %v1326_v43  ;;  %v5899_v58 = vmul.f32 %v3916_v36, %v1326_v43  ;;  %v1834_v55 = vadd.f32 %v1780_v9, %v1614_v41  ;;  %v2606_v44 = vmul.f32 %v3981_v23, %v1326_v43  ;;  %2843 = vrot.lane.b32.xlu1 %v2774_v38, %s3710_s9  ;;  %v7268_v47 = vld [vmem:[#allocation46_spill] sm:$0xff]  ;;  %v7269_v38 = vld [vmem:[#allocation167_spill] sm:$0xff] }
 0x1e5   : > { %v2743_v19 = vadd.f32 %v5699_v12, %v2682_v35  ;;  %v7264_v18 = vrot.slane %v7263_v59, 2  ;;  %v7266_v51 = vrot.slane %v7265_v22, 2  ;;  %v1637_v61 = vadd.f32 %v7268_v47, %v7267_v25  ;;  %v7271_v47 = vld [vmem:[#allocation78_spill] sm:$0xff] }
 0x1e6   : > { %v5904_v48 = vadd.f32 %v1399_v46, %v7262_v32  ;;  %v1803_v53 = vmul.f32 %v3884_v24, %v7232_v49  ;;  %v2441_v13 = vadd.f32 %v2387_v4, %v2221_v54  ;;  %v2054_v43 = vadd.f32 %v5622_v0, %v1834_v55  ;;  %v7272_v4 = vld [vmem:[#allocation50_spill] sm:$0xff] }
 0x1e7   : > { %v1352_v17 = vsel %vm1318_vm5, %v7266_v51, %v7264_v18  ;;  %v2797_v41 = vmax.f32 %v2743_v19, 0.0  ;;  %v2409_v35 = vmul.f32 %v3978_v21, %v7269_v38  ;;  %v7270_v51 = vld [vmem:[#allocation137_spill] sm:$0xff]  ;;  %v7273_v0 = vrot.slane %v7272_v4, 2 }
 0x1e8   : > { %v1422_v46 = vmul.f32 %v3847_v6, %v1352_v17  ;;  %v5922_v57 = vmul.f32 %v3916_v36, %v1352_v17  ;;  %v1857_v9 = vadd.f32 %v1803_v53, %v1637_v61  ;;  %v2629_v32 = vmul.f32 %v3981_v23, %v1352_v17  ;;  %v7275_v17 = vld [vmem:[#allocation89_spill] sm:$0xff] }
 0x1e9   : > { %v2661_v18 = vadd.f32 %v2607_v3, %v2441_v13  ;;  %v2220_v25 = vadd.f32 %v7270_v51, %v2054_v43  ;;  %v7274_v54 = vrot.slane %v7263_v59, 2  ;;  %2889 = vrot.lane.b32.xlu0 %v2797_v41, %s3710_s9  ;;  %v7276_v3 = vld [vmem:[#allocation47_spill] sm:$0xff]  ;;  %v1804_v13 = vmul.f32 %v3884_v24, %v7220_v1  ;;  %v7277_v51 = vld [vmem:[#allocation166_spill] sm:$0xff]  ;;  %v7278_v41 = vld [vmem:[#allocation169_spill] sm:$0xff] }
 0x1ea   : > { %v5929_v49 = vadd.f32 %v1422_v46, %v7271_v47  ;;  %v2077_v19 = vadd.f32 %v5781_v62, %v1857_v9  ;;  %v1638_v53 = vadd.f32 %v7276_v3, %v7275_v17  ;;  %v2410_v47 = vmul.f32 %v3978_v21, %v7277_v51  ;;  %v7279_v62 = vld [vmem:[#allocation171_spill] sm:$0xff] }
 0x1eb   : > { %v1334_v55 = vsel %vm1318_vm5, %v7274_v54, %v7273_v0  ;;  %v2722_v43 = vadd.f32 %v5699_v12, %v2661_v18  ;;  %v2440_v46 = vadd.f32 %v2386_v45, %v2220_v25  ;;  %v7280_v1 = vrot.slane %v7265_v22, 1 }
 0x1ec   : > { %v1423_v61 = vmul.f32 %v3847_v6, %v1334_v55  ;;  %v5946_v59 = vmul.f32 %v3916_v36, %v1334_v55  ;;  %v2243_v0 = vadd.f32 %v7278_v41, %v2077_v19  ;;  %v1858_v54 = vadd.f32 %v1804_v13, %v1638_v53 }
 0x1ed   : > { %v2630_v17 = vmul.f32 %v3981_v23, %v1334_v55  ;;  %v2776_v3 = vmax.f32 %v2722_v43, 0.0  ;;  %v2660_v37 = vadd.f32 %v2606_v44, %v2440_v46  ;;  %v7281_v45 = vrot.slane %v7272_v4, 1  ;;  %v7285_v43 = vld [vmem:[#allocation153_spill] sm:$0xff] }
 0x1ee   : > { %v5952_v9 = vadd.f32 %v1423_v61, %v7279_v62  ;;  %v7283_v25 = vrot.slane %v7265_v22, 2  ;;  %v7284_v19 = vrot.slane %v7272_v4, 2  ;;  %v2463_v53 = vadd.f32 %v2409_v35, %v2243_v0  ;;  %v7287_v62 = vld [vmem:[#allocation43_spill] sm:$0xff] }
 0x1ef   : > { %v5961_v18 = vsel %vm1097_vm4, %v7281_v45, %v7280_v1  ;;  %v2078_v55 = vadd.f32 %v5708_v42, %v1858_v54  ;;  %2847 = vrot.lane.b32.xlu1 %v2776_v3, %s3710_s9  ;;  %v2721_v1 = vadd.f32 %v5699_v12, %v2660_v37  ;;  %v1639_v22 = vadd.f32 %v7285_v43, %v5596_v11  ;;  %v7286_v42 = vld [vmem:[#allocation170_spill] sm:$0xff] }
 0x1f0   : > { %7282 = vst [vmem:[#allocation106_spill] sm:$0xff] %v5961_v18  ;;  %v1370_v61 = vsel %vm1318_vm5, %v7284_v19, %v7283_v25  ;;  %v1203_v44 = vmul.f32 %v3836_v63, %v5961_v18  ;;  %v1805_v46 = vmul.f32 %v3884_v24, %v5816_v5  ;;  %v2683_v35 = vadd.f32 %v2629_v32, %v2463_v53  ;;  %v7288_v32 = vld [vmem:[#allocation139_spill] sm:$0xff] }
 0x1f1   : > { %v1424_v13 = vmul.f32 %v3847_v6, %v1370_v61  ;;  %v5980_v41 = vmul.f32 %v3916_v36, %v1370_v61  ;;  %v2244_v0 = vadd.f32 %v7286_v42, %v2078_v55  ;;  %v2191_v45 = vmul.f32 %v3973_v16, %v7272_v4  ;;  %v7290_v55 = vld [vmem:[#allocation144_spill] sm:$0xff] }
 0x1f2   : > { %v1257_v54 = vadd.f32 %v1203_v44, %v7287_v62  ;;  %v2775_v3 = vmax.f32 %v2721_v1, 0.0  ;;  %v1859_v25 = vadd.f32 %v1805_v46, %v1639_v22  ;;  %v2411_v37 = vmul.f32 %v3978_v21, %v5961_v18 }
 0x1f3   : > { %v2631_v11 = vmul.f32 %v3981_v23, %v1370_v61  ;;  %v2744_v19 = vadd.f32 %v5699_v12, %v2683_v35  ;;  %v2464_v43 = vadd.f32 %v2410_v47, %v2244_v0  ;;  %v7289_v53 = vrot.slane %v7288_v32, 2  ;;  %v7292_v61 = vld [vmem:[#allocation132_spill] sm:$0xff]  ;;  %v7293_v0 = vld [vmem:[#allocation149_spill] sm:$0xff] }
 0x1f4   : > { %v5990_v5 = vadd.f32 %v1424_v13, %v1257_v54  ;;  %v7291_v42 = vrot.slane %v7290_v55, 2  ;;  %2845 = vrot.lane.b32.xlu0 %v2775_v3, %s3710_s9  ;;  %v2079_v4 = vadd.f32 %v5838_v15, %v1859_v25  ;;  %v1616_v22 = vadd.f32 %v7292_v61, %v5602_v34  ;;  %v7294_v3 = vld [vmem:[#allocation154_spill] sm:$0xff]  ;;  %v7298_v61 = vld [vmem:[#allocation133_spill] sm:$0xff] }
 0x1f5   : > { %v1782_v47 = vmul.f32 %v3884_v24, %v7239_v20  ;;  %v2798_v13 = vmax.f32 %v2744_v19, 0.0  ;;  %v2684_v46 = vadd.f32 %v2630_v17, %v2464_v43  ;;  %v2388_v62 = vmul.f32 %v3978_v21, %v7293_v0  ;;  %v7301_v20 = vld [vmem:[#allocation155_spill] sm:$0xff] }
 0x1f6   : > { %v1345_v44 = vsel %vm1318_vm5, %v7291_v42, %v7289_v53  ;;  %v2245_v54 = vadd.f32 %v2191_v45, %v2079_v4  ;;  %v7295_v42 = vld [vmem:[#allocation138_spill] sm:$0xff]  ;;  %v7297_v17 = vrot.slane %v7288_v32, 2  ;;  %v1617_v45 = vadd.f32 %v7298_v61, %v5629_v29  ;;  %v7299_v32 = vld [vmem:[#allocation148_spill] sm:$0xff]  ;;  %v7300_v29 = vld [vmem:[#allocation147_spill] sm:$0xff] }
 0x1f7   : > { %v1401_v1 = vmul.f32 %v3847_v6, %v1345_v44  ;;  %v6006_v35 = vmul.f32 %v3916_v36, %v1345_v44  ;;  %v1836_v15 = vadd.f32 %v1782_v47, %v1616_v22  ;;  %v2608_v25 = vmul.f32 %v3981_v23, %v1345_v44  ;;  %2891 = vrot.lane.b32.xlu1 %v2798_v13, %s3710_s9 }
 0x1f8   : > { %v2745_v34 = vadd.f32 %v5699_v12, %v2684_v46  ;;  %v7296_v19 = vrot.slane %v7295_v42, 2  ;;  %v1783_v4 = vmul.f32 %v3884_v24, %v7261_v50 }
 0x1f9   : > { %v6011_v53 = vadd.f32 %v1401_v1, %v7294_v3  ;;  %v2465_v1 = vadd.f32 %v2411_v37, %v2245_v54  ;;  %v2056_v44 = vadd.f32 %v5804_v7, %v1836_v15  ;;  %v2389_v3 = vmul.f32 %v3978_v21, %v7299_v32 }
 0x1fa   : > { %v1327_v43 = vsel %vm1318_vm5, %v7297_v17, %v7296_v19  ;;  %v2799_v13 = vmax.f32 %v2745_v34, 0.0  ;;  %v1837_v46 = vadd.f32 %v1783_v4, %v1617_v45  ;;  %v7302_v7 = vrot.slane %v7290_v55, 1  ;;  %v7307_v45 = vld [vmem:[#allocation130_spill] sm:$0xff] }
 0x1fb   : > { %v1402_v22 = vmul.f32 %v3847_v6, %v1327_v43  ;;  %v6029_v47 = vmul.f32 %v3916_v36, %v1327_v43  ;;  %v2609_v19 = vmul.f32 %v3981_v23, %v1327_v43  ;;  %v2685_v17 = vadd.f32 %v2631_v11, %v2465_v1 }
 0x1fc   : > { %v2222_v61 = vadd.f32 %v7300_v29, %v2056_v44  ;;  %v7303_v37 = vrot.slane %v7295_v42, 1  ;;  %2893 = vrot.lane.b32.xlu0 %v2799_v13, %s3710_s9  ;;  %v2057_v15 = vadd.f32 %v5899_v58, %v1837_v46  ;;  %v7305_v34 = vrot.slane %v7290_v55, 2  ;;  %v7308_v13 = vld [vmem:[#allocation150_spill] sm:$0xff]  ;;  %v7309_v29 = vld [vmem:[#allocation140_spill] sm:$0xff] }
 0x1fd   : > { %v6036_v50 = vadd.f32 %v1402_v22, %v7301_v20  ;;  %v7306_v20 = vrot.slane %v7295_v42, 2  ;;  %v1618_v4 = vadd.f32 %v7307_v45, %v5666_v14  ;;  %v2746_v1 = vadd.f32 %v5699_v12, %v2685_v17 }
 0x1fe   : > { %v6044_v54 = vsel %vm1097_vm4, %v7303_v37, %v7302_v7  ;;  %v2442_v44 = vadd.f32 %v2388_v62, %v2222_v61  ;;  %v1784_v58 = vmul.f32 %v3884_v24, %v5855_v56  ;;  %v2223_v46 = vadd.f32 %v7308_v13, %v2057_v15  ;;  %v7310_v15 = vld [vmem:[#allocation90_spill] sm:$0xff] }
 0x1ff   : > { %7304 = vst [vmem:[#allocation107_spill] sm:$0xff] %v6044_v54  ;;  %v1182_v11 = vmul.f32 %v3836_v63, %v6044_v54  ;;  %v1363_v43 = vsel %vm1318_vm5, %v7306_v20, %v7305_v34  ;;  %v2170_v37 = vmul.f32 %v3973_v16, %v7295_v42  ;;  %v2800_v34 = vmax.f32 %v2746_v1, 0.0 }
 0x200   : > { %v1403_v22 = vmul.f32 %v3847_v6, %v1363_v43  ;;  %v6065_v7 = vmul.f32 %v3916_v36, %v1363_v43  ;;  %v2662_v14 = vadd.f32 %v2608_v25, %v2442_v44  ;;  %v1838_v20 = vadd.f32 %v1784_v58, %v1618_v4  ;;  %v7315_v58 = vld [vmem:[#allocation60_spill] sm:$0xff] }
 0x201   : > { %v1236_v55 = vadd.f32 %v1182_v11, %v7309_v29  ;;  %v2390_v62 = vmul.f32 %v3978_v21, %v6044_v54  ;;  %v2443_v17 = vadd.f32 %v2389_v3, %v2223_v46  ;;  %v2610_v45 = vmul.f32 %v3981_v23, %v1363_v43  ;;  %v7312_v11 = vld [vmem:[#allocation99_spill] sm:$0xff]  ;;  %2895 = vrot.lane.b32.xlu1 %v2800_v34, %s3710_s9  ;;  %v7314_v3 = vld [vmem:[#allocation168_spill] sm:$0xff] }
 0x202   : > { %v7311_v13 = vrot.slane %v7310_v15, 2  ;;  %v7313_v29 = vrot.slane %v7312_v11, 2  ;;  %v2723_v25 = vadd.f32 %v5699_v12, %v2662_v14  ;;  %v2058_v42 = vadd.f32 %v5874_v40, %v1838_v20  ;;  %v7316_v14 = vld [vmem:[#allocation100_spill] sm:$0xff] }
 0x203   : > { %v6071_v61 = vadd.f32 %v1403_v22, %v1236_v55  ;;  %v1641_v1 = vadd.f32 %v7314_v3, %v5713_v27  ;;  %v2663_v44 = vadd.f32 %v2609_v19, %v2443_v17  ;;  %v1807_v43 = vmul.f32 %v3884_v24, %v7277_v51  ;;  %v7319_v17 = vld [vmem:[#allocation76_spill] sm:$0xff]  ;;  %v7321_v51 = vld [vmem:[#allocation165_spill] sm:$0xff] }
 0x204   : > { %v1335_v56 = vsel %vm1318_vm5, %v7313_v29, %v7311_v13  ;;  %v2413_v46 = vmul.f32 %v3978_v21, %v7315_v58  ;;  %v2777_v55 = vmax.f32 %v2723_v25, 0.0  ;;  %v2224_v34 = vadd.f32 %v2170_v37, %v2058_v42 }
 0x205   : > { %v1426_v4 = vmul.f32 %v3847_v6, %v1335_v56  ;;  %v6089_v22 = vmul.f32 %v3916_v36, %v1335_v56  ;;  %v2633_v40 = vmul.f32 %v3981_v23, %v1335_v56  ;;  %v2724_v20 = vadd.f32 %v5699_v12, %v2663_v44 }
 0x206   : > { %v1861_v27 = vadd.f32 %v1807_v43, %v1641_v1  ;;  %v7318_v19 = vmov %v7313_v29  ;;  %v7320_v29 = vrot.slane %v7319_v17, 2  ;;  %v1640_v26 = vadd.f32 %v7321_v51, %v5776_v10  ;;  %2849 = vrot.lane.b32.xlu0 %v2777_v55, %s3710_s9  ;;  %v7322_v1 = vld [vmem:[#allocation86_spill] sm:$0xff]  ;;  %v7323_v51 = vld [vmem:[#allocation73_spill] sm:$0xff] }
 0x207   : > { %v6094_v13 = vadd.f32 %v1426_v4, %v7316_v14  ;;  %v2444_v37 = vadd.f32 %v2390_v62, %v2224_v34  ;;  %v1806_v56 = vmul.f32 %v3884_v24, %v7269_v38  ;;  %v2778_v11 = vmax.f32 %v2724_v20, 0.0  ;;  %v7325_v34 = vld [vmem:[#allocation58_spill] sm:$0xff] }
 0x208   : > { %v1353_v3 = vsel %vm1318_vm5, %v7320_v29, %v7318_v19  ;;  %v2081_v4 = vadd.f32 %v5946_v59, %v1861_v27  ;;  %v2412_v44 = vmul.f32 %v3978_v21, %v7322_v1  ;;  %v7326_v14 = vrot.slane %v7325_v34, 2  ;;  %v7327_v19 = vld [vmem:[#allocation157_spill] sm:$0xff]  ;;  %v7329_v59 = vld [vmem:[#allocation79_spill] sm:$0xff] }
 0x209   : > { %7317 = vst [vmem:[#allocation91_spill] sm:$0xff] %v6094_v13  ;;  %v1425_v25 = vmul.f32 %v3847_v6, %v1353_v3  ;;  %v6111_v42 = vmul.f32 %v3916_v36, %v1353_v3  ;;  %v2632_v43 = vmul.f32 %v3981_v23, %v1353_v3  ;;  %v2664_v10 = vadd.f32 %v2610_v45, %v2444_v37  ;;  %v7330_v3 = vld [vmem:[#allocation145_spill] sm:$0xff] }
 0x20a   : > { %v1860_v62 = vadd.f32 %v1806_v56, %v1640_v26  ;;  %v7328_v29 = vrot.slane %v7327_v19, 2  ;;  %2851 = vrot.lane.b32.xlu1 %v2778_v11, %s3710_s9  ;;  %v2247_v20 = vadd.f32 %v7329_v59, %v2081_v4  ;;  %v1619_v45 = vadd.f32 %v7330_v3, %v5819_v2  ;;  %v7332_v4 = vld [vmem:[#allocation23_spill] sm:$0xff] }
 0x20b   : > { %v6118_v55 = vadd.f32 %v1425_v25, %v7323_v51  ;;  %v1785_v37 = vmul.f32 %v3884_v24, %v7293_v0  ;;  %v2725_v26 = vadd.f32 %v5699_v12, %v2664_v10  ;;  %v7331_v51 = vld [vmem:[#allocation160_spill] sm:$0xff]  ;;  %v7334_v10 = vrot.slane %v7319_v17, 1 }
 0x20c   : > { %v1346_v38 = vsel %vm1318_vm5, %v7328_v29, %v7326_v14  ;;  %v2080_v25 = vadd.f32 %v5922_v57, %v1860_v62  ;;  %v2391_v11 = vmul.f32 %v3978_v21, %v7331_v51  ;;  %v2467_v14 = vadd.f32 %v2413_v46, %v2247_v20 }
 0x20d   : > { %7324 = vst [vmem:[#allocation116_spill] sm:$0xff] %v6118_v55  ;;  %v1404_v27 = vmul.f32 %v3847_v6, %v1346_v38  ;;  %v6136_v56 = vmul.f32 %v3916_v36, %v1346_v38  ;;  %v1839_v59 = vadd.f32 %v1785_v37, %v1619_v45  ;;  %v2611_v2 = vmul.f32 %v3981_v23, %v1346_v38  ;;  %v7333_v55 = vld [vmem:[#allocation87_spill] sm:$0xff] }
 0x20e   : > { %v2779_v3 = vmax.f32 %v2725_v26, 0.0  ;;  %v2246_v0 = vadd.f32 %v7333_v55, %v2080_v25  ;;  %v7335_v57 = vrot.slane %v7310_v15, 1  ;;  %v7337_v13 = vrot.slane %v7319_v17, 2  ;;  %v7339_v26 = vld [vmem:[#allocation48_spill] sm:$0xff] }
 0x20f   : > { %v6141_v29 = vadd.f32 %v1404_v27, %v7332_v4  ;;  %v7338_v46 = vrot.slane %v7310_v15, 2  ;;  %v2687_v27 = vadd.f32 %v2633_v40, %v2467_v14  ;;  %v2059_v38 = vadd.f32 %v6006_v35, %v1839_v59  ;;  %v7340_v35 = vld [vmem:[#allocation162_spill] sm:$0xff]  ;;  %v7341_v14 = vld [vmem:[#allocation31_spill] sm:$0xff] }
 0x210   : > { %v6151_v62 = vsel %vm1097_vm4, %v7335_v57, %v7334_v10  ;;  %2853 = vrot.lane.b32.xlu0 %v2779_v3, %s3710_s9  ;;  %v2466_v37 = vadd.f32 %v2412_v44, %v2246_v0  ;;  %v1642_v25 = vadd.f32 %v7339_v26, %v5846_v39  ;;  %v1808_v17 = vmul.f32 %v3884_v24, %v5961_v18  ;;  %v7343_v18 = vld [vmem:[#allocation53_spill] sm:$0xff] }
 0x211   : > { %7336 = vst [vmem:[#allocation97_spill] sm:$0xff] %v6151_v62  ;;  %v1371_v20 = vsel %vm1318_vm5, %v7338_v46, %v7337_v13  ;;  %v1206_v55 = vmul.f32 %v3836_v63, %v6151_v62  ;;  %v2748_v13 = vadd.f32 %v5699_v12, %v2687_v27  ;;  %v2225_v40 = vadd.f32 %v7340_v35, %v2059_v38 }
 0x212   : > { %v1427_v45 = vmul.f32 %v3847_v6, %v1371_v20  ;;  %v6169_v4 = vmul.f32 %v3916_v36, %v1371_v20  ;;  %v2194_v10 = vmul.f32 %v3973_v16, %v7310_v15  ;;  %v2686_v3 = vadd.f32 %v2632_v43, %v2466_v37 }
 0x213   : > { %v1260_v59 = vadd.f32 %v1206_v55, %v7341_v14  ;;  %v1862_v0 = vadd.f32 %v1808_v17, %v1642_v25  ;;  %v2414_v39 = vmul.f32 %v3978_v21, %v6151_v62  ;;  %v2634_v44 = vmul.f32 %v3981_v23, %v1371_v20 }
 0x214   : > { %v2802_v57 = vmax.f32 %v2748_v13, 0.0  ;;  %v2445_v46 = vadd.f32 %v2391_v11, %v2225_v40  ;;  %v7342_v27 = vrot.slane %v7327_v19, 1  ;;  %v7344_v38 = vrot.slane %v7343_v18, 1  ;;  %v7348_v13 = vld [vmem:[#allocation141_spill] sm:$0xff] }
 0x215   : > { %v6179_v26 = vadd.f32 %v1427_v45, %v1260_v59  ;;  %v2747_v15 = vadd.f32 %v5699_v12, %v2686_v3  ;;  %v2082_v43 = vadd.f32 %v5980_v41, %v1862_v0  ;;  %v7346_v20 = vrot.slane %v7327_v19, 2  ;;  %v7349_v59 = vld [vmem:[#allocation29_spill] sm:$0xff]  ;;  %v6209_v0 = vpop.permute.xlu0 %2813 }
 0x216   : > { %v6187_v55 = vsel %vm1097_vm4, %v7344_v38, %v7342_v27  ;;  %v7347_v11 = vrot.slane %v7343_v18, 2  ;;  %2899 = vrot.lane.b32.xlu1 %v2802_v57, %s3710_s9  ;;  %v2665_v25 = vadd.f32 %v2611_v2, %v2445_v46  ;;  %v1621_v35 = vadd.f32 %v7348_v13, %v5883_v28  ;;  %v7352_v13 = vld [vmem:[#allocation146_spill] sm:$0xff] }
 0x217   : > { %7345 = vst [vmem:[#allocation92_spill] sm:$0xff] %v6187_v55  ;;  %v1185_v37 = vmul.f32 %v3836_v63, %v6187_v55  ;;  %v1787_v41 = vmul.f32 %v3884_v24, %v6044_v54  ;;  %v2801_v40 = vmax.f32 %v2747_v15, 0.0  ;;  %v2248_v14 = vadd.f32 %v2194_v10, %v2082_v43  ;;  %v7391_v54 = vld [vmem:[#allocation4_spill] sm:$0xff] }
 0x218   : > { %v1364_v45 = vsel %vm1318_vm5, %v7347_v11, %v7346_v20  ;;  %v2726_v57 = vadd.f32 %v5699_v12, %v2665_v25  ;;  %v2173_v46 = vmul.f32 %v3973_v16, %v7343_v18  ;;  %v2393_v28 = vmul.f32 %v3978_v21, %v6187_v55  ;;  %v7353_v18 = vld [vmem:[#allocation159_spill] sm:$0xff] }
 0x219   : > { %v1406_v17 = vmul.f32 %v3847_v6, %v1364_v45  ;;  %v1239_v19 = vadd.f32 %v1185_v37, %v7349_v59  ;;  %v6207_v3 = vmul.f32 %v3916_v36, %v1364_v45  ;;  %v1841_v2 = vadd.f32 %v1787_v41, %v1621_v35  ;;  %2897 = vrot.lane.b32.xlu0 %v2801_v40, %s3710_s9  ;;  %v7354_v40 = vld [vmem:[#allocation25_spill] sm:$0xff] }
 0x21a   : > { %v2468_v27 = vadd.f32 %v2414_v39, %v2248_v14  ;;  %v2613_v38 = vmul.f32 %v3981_v23, %v1364_v45  ;;  %v7350_v15 = vmov %v7347_v11  ;;  %v7351_v43 = vrot.slane %v7325_v34, 2 }
 0x21b   : > { %v6217_v10 = vadd.f32 %v1406_v17, %v1239_v19  ;;  %v2780_v20 = vmax.f32 %v2726_v57, 0.0  ;;  %v2061_v11 = vadd.f32 %v6065_v7, %v1841_v2  ;;  %v1620_v35 = vadd.f32 %v7352_v13, %v5904_v48 }
 0x21c   : > { %v1328_v37 = vsel %vm1318_vm5, %v7351_v43, %v7350_v15  ;;  %v2688_v39 = vadd.f32 %v2634_v44, %v2468_v27  ;;  %v1786_v17 = vmul.f32 %v3884_v24, %v7299_v32  ;;  %v2392_v34 = vmul.f32 %v3978_v21, %v7353_v18  ;;  %v7357_v27 = vld [vmem:[#allocation95_spill] sm:$0xff]  ;;  %v6252_v15 = vpop.permute.xlu0 %2815 }
 0x21d   : > { %v1405_v25 = vmul.f32 %v3847_v6, %v1328_v37  ;;  %v6233_v45 = vmul.f32 %v3916_v36, %v1328_v37  ;;  %2855 = vrot.lane.b32.xlu1 %v2780_v20, %s3710_s9  ;;  %v2227_v41 = vadd.f32 %v2173_v46, %v2061_v11  ;;  %v2612_v14 = vmul.f32 %v3981_v23, %v1328_v37 }
 0x21e   : > { %v7355_v48 = vrot.slane %v5726_v31, 2  ;;  %v7356_v44 = vrot.slane %v5730_v30, 2  ;;  %v2749_v19 = vadd.f32 %v5699_v12, %v2688_v39  ;;  %v1840_v57 = vadd.f32 %v1786_v17, %v1620_v35 }
 0x21f   : > { %v6239_v7 = vadd.f32 %v1405_v25, %v7354_v40  ;;  %v1643_v46 = vadd.f32 %v7357_v27, %v5929_v49  ;;  %v2447_v43 = vadd.f32 %v2393_v28, %v2227_v41  ;;  %v1809_v37 = vmul.f32 %v3884_v24, %v7322_v1  ;;  %v6261_v25 = vpop.permute.xlu1 %2817 }
 0x220   : > { %v1354_v59 = vsel %vm1318_vm5, %v7356_v44, %v7355_v48  ;;  %v2415_v11 = vmul.f32 %v3978_v21, %v5756_v60  ;;  %v2803_v13 = vmax.f32 %v2749_v19, 0.0  ;;  %v2060_v35 = vadd.f32 %v6029_v47, %v1840_v57  ;;  %v7360_v44 = vld [vmem:[#allocation71_spill] sm:$0xff] }
 0x221   : > { %v1428_v2 = vmul.f32 %v3847_v6, %v1354_v59  ;;  %v6257_v20 = vmul.f32 %v3916_v36, %v1354_v59  ;;  %v2635_v49 = vmul.f32 %v3981_v23, %v1354_v59  ;;  %v2667_v28 = vadd.f32 %v2613_v38, %v2447_v43  ;;  %v7361_v47 = vld [vmem:[#allocation163_spill] sm:$0xff] }
 0x222   : > { %v1863_v17 = vadd.f32 %v1809_v37, %v1643_v46  ;;  %v7358_v41 = vrot.slane %v5677_v8, 2  ;;  %v7359_v40 = vmov %v7355_v48  ;;  %v1644_v27 = vadd.f32 %v7360_v44, %v5952_v9  ;;  %2901 = vrot.lane.b32.xlu0 %v2803_v13, %s3710_s9  ;;  %v7363_v13 = vld [vmem:[#allocation77_spill] sm:$0xff] }
 0x223   : > { %v6265_v39 = vadd.f32 %v1428_v2, %v5784_v33  ;;  %v2226_v19 = vadd.f32 %v7361_v47, %v2060_v35  ;;  %v1810_v38 = vmul.f32 %v3884_v24, %v7315_v58  ;;  %v2728_v31 = vadd.f32 %v5699_v12, %v2667_v28  ;;  %v7362_v2 = vld [vmem:[#allocation98_spill] sm:$0xff]  ;;  %v6289_v43 = vpop.permute.xlu1 %2819  ;;  %v7366_v47 = vld [vmem:[#allocation125_spill] sm:$0xff] }
 0x224   : > { %v1336_v48 = vsel %vm1318_vm5, %v7359_v40, %v7358_v41  ;;  %v2083_v57 = vadd.f32 %v6111_v42, %v1863_v17  ;;  %v2416_v46 = vmul.f32 %v3978_v21, %v7362_v2  ;;  %v7364_v40 = vrot.slane %v5730_v30, 1  ;;  %v6302_v42 = vpop.permute.xlu0 %2821 }
 0x225   : > { %v1429_v33 = vmul.f32 %v3847_v6, %v1336_v48  ;;  %v6282_v59 = vmul.f32 %v3916_v36, %v1336_v48  ;;  %v2636_v9 = vmul.f32 %v3981_v23, %v1336_v48  ;;  %v2446_v37 = vadd.f32 %v2392_v34, %v2226_v19 }
 0x226   : > { %v1864_v41 = vadd.f32 %v1810_v38, %v1644_v27  ;;  %v7365_v44 = vrot.slane %v5677_v8, 1  ;;  %v2782_v17 = vmax.f32 %v2728_v31, 0.0  ;;  %v2249_v48 = vadd.f32 %v7366_v47, %v2083_v57  ;;  %v7370_v47 = vld [vmem:[#allocation84_spill] sm:$0xff] }
 0x227   : > { %v6292_v35 = vadd.f32 %v1429_v33, %v7363_v13  ;;  %v7367_v19 = vrot.slane %v5730_v30, 2  ;;  %v7368_v27 = vrot.slane %v5677_v8, 2  ;;  %v2666_v38 = vadd.f32 %v2612_v14, %v2446_v37  ;;  %v7371_v14 = vld [vmem:[#allocation85_spill] sm:$0xff] }
 0x228   : > { %v6300_v28 = vsel %vm1097_vm4, %v7365_v44, %v7364_v40  ;;  %v2084_v13 = vadd.f32 %v6089_v22, %v1864_v41  ;;  %v7369_v44 = vld [vmem:[#allocation72_spill] sm:$0xff]  ;;  %2859 = vrot.lane.b32.xlu1 %v2782_v17, %s3710_s9  ;;  %v2469_v57 = vadd.f32 %v2415_v11, %v2249_v48  ;;  %v1811_v30 = vmul.f32 %v3884_v24, %v6151_v62  ;;  %v6333_v48 = vpop.permute.xlu1 %2823 }
 0x229   : > { %v1209_v34 = vmul.f32 %v3836_v63, %v6300_v28  ;;  %v1372_v33 = vsel %vm1318_vm5, %v7368_v27, %v7367_v19  ;;  %v1645_v31 = vadd.f32 %v7369_v44, %v5990_v5  ;;  %v2727_v52 = vadd.f32 %v5699_v12, %v2666_v38  ;;  %v7372_v27 = vld [vmem:[#allocation158_spill] sm:$0xff]  ;;  %v7385_v62 = vld [vmem:[#allocation36_spill] sm:$0xff] }
 0x22a   : > { %v1430_v40 = vmul.f32 %v3847_v6, %v1372_v33  ;;  %v6322_v58 = vmul.f32 %v3916_v36, %v1372_v33  ;;  %v2250_v22 = vadd.f32 %v7371_v14, %v2084_v13  ;;  %v2197_v6 = vmul.f32 %v3973_v16, %v5677_v8  ;;  %v6339_v8 = vpop.permute.xlu0 %2825 }
 0x22b   : > { %v1263_v63 = vadd.f32 %v1209_v34, %v7370_v47  ;;  %v2417_v5 = vmul.f32 %v3978_v21, %v6300_v28  ;;  %v2689_v37 = vadd.f32 %v2635_v49, %v2469_v57  ;;  %v1865_v41 = vadd.f32 %v1811_v30, %v1645_v31 }
 0x22c   : > { %v2637_v17 = vmul.f32 %v3981_v23, %v1372_v33  ;;  %v2781_v34 = vmax.f32 %v2727_v52, 0.0  ;;  %v2470_v19 = vadd.f32 %v2416_v46, %v2250_v22  ;;  %v1622_v38 = vadd.f32 %v7372_v27, %v6011_v53  ;;  %v7374_v33 = vld [vmem:[#allocation41_spill] sm:$0xff]  ;;  %v7376_v22 = vld [vmem:[#allocation38_spill] sm:$0xff] }
 0x22d   : > { %v6330_v11 = vadd.f32 %v1430_v40, %v1263_v63  ;;  %v1788_v13 = vmul.f32 %v3884_v24, %v7331_v51  ;;  %v2750_v44 = vadd.f32 %v5699_v12, %v2689_v37  ;;  %v2085_v49 = vadd.f32 %v6169_v4, %v1865_v41  ;;  %v7373_v40 = vld [vmem:[#allocation39_spill] sm:$0xff]  ;;  %v7375_v53 = vld [vmem:[#allocation161_spill] sm:$0xff]  ;;  %v7377_v37 = vld [vmem:[#allocation40_spill] sm:$0xff] }
 0x22e   : > { %v2394_v31 = vmul.f32 %v3978_v21, %v7373_v40  ;;  %v2614_v57 = vmul.f32 %v3981_v23, %v7374_v33  ;;  %2857 = vrot.lane.b32.xlu0 %v2781_v34, %s3710_s9  ;;  %v2690_v46 = vadd.f32 %v2636_v9, %v2470_v19  ;;  %v1623_v63 = vadd.f32 %v7375_v53, %v6036_v50  ;;  %v7378_v19 = vld [vmem:[#allocation156_spill] sm:$0xff] }
 0x22f   : > { %v1842_v47 = vadd.f32 %v1788_v13, %v1622_v38  ;;  %v1789_v30 = vmul.f32 %v3884_v24, %v7353_v18  ;;  %v2804_v52 = vmax.f32 %v2750_v44, 0.0  ;;  %v2251_v14 = vadd.f32 %v2197_v6, %v2085_v49  ;;  %v7379_v13 = vld [vmem:[#allocation24_spill] sm:$0xff]  ;;  %v7380_v49 = vld [vmem:[#allocation33_spill] sm:$0xff]  ;;  %v6367_v18 = vpop.permute.xlu1 %2827 }
 0x230   : > { %v2395_v4 = vmul.f32 %v3978_v21, %v7376_v22  ;;  %v2615_v41 = vmul.f32 %v3981_v23, %v7377_v37  ;;  %v2751_v27 = vadd.f32 %v5699_v12, %v2690_v46  ;;  %v1624_v38 = vadd.f32 %v7378_v19, %v6071_v61  ;;  %v7382_v61 = vld [vmem:[#allocation42_spill] sm:$0xff]  ;;  %v7383_v19 = vld [vmem:[#allocation91_spill] sm:$0xff] }
 0x231   : > { %v2062_v34 = vadd.f32 %v6136_v56, %v1842_v47  ;;  %v1843_v9 = vadd.f32 %v1789_v30, %v1623_v63  ;;  %2903 = vrot.lane.b32.xlu1 %v2804_v52, %s3710_s9  ;;  %v2471_v50 = vadd.f32 %v2417_v5, %v2251_v14  ;;  %v1790_v6 = vmul.f32 %v3884_v24, %v6187_v55  ;;  %v7381_v56 = vld [vmem:[#allocation35_spill] sm:$0xff]  ;;  %v6373_v5 = vpop.permute.xlu0 %2829  ;;  %v7384_v55 = vld [vmem:[#allocation122_spill] sm:$0xff] }
 0x232   : > { %v2176_v44 = vmul.f32 %v3973_v16, %v7379_v13  ;;  %v2396_v53 = vmul.f32 %v3978_v21, %v7380_v49  ;;  %v2805_v46 = vmax.f32 %v2751_v27, 0.0  ;;  %v2616_v30 = vmul.f32 %v3981_v23, %v7382_v61 }
 0x233   : > { %v2228_v47 = vadd.f32 %v7381_v56, %v2062_v34  ;;  %v2063_v63 = vadd.f32 %v6233_v45, %v1843_v9  ;;  %v2691_v52 = vadd.f32 %v2637_v17, %v2471_v50  ;;  %v1844_v14 = vadd.f32 %v1790_v6, %v1624_v38  ;;  %v7386_v56 = vld [vmem:[#allocation3_spill] sm:$0xff]  ;;  %v7387_v9 = vld [vmem:[#allocation9_spill] sm:$0xff] }
 0x234   : > { %v1647_v13 = vadd.f32 %v7384_v55, %v7383_v19  ;;  %v1813_v51 = vmul.f32 %v3884_v24, %v7362_v2  ;;  %2905 = vrot.lane.b32.xlu0 %v2805_v46, %s3710_s9  ;;  %v2199_v45 = vmul.f32 %v3973_v16, %v7386_v56  ;;  %v2419_v1 = vmul.f32 %v3978_v21, %v7387_v9  ;;  %v7388_v55 = vld [vmem:[#allocation15_spill] sm:$0xff]  ;;  %v7389_v46 = vld [vmem:[#allocation116_spill] sm:$0xff] }
 0x235   : > { %v2448_v27 = vadd.f32 %v2394_v31, %v2228_v47  ;;  %v2229_v34 = vadd.f32 %v7385_v62, %v2063_v63  ;;  %v2752_v17 = vadd.f32 %v5699_v12, %v2691_v52  ;;  %v2064_v38 = vadd.f32 %v6207_v3, %v1844_v14  ;;  %v7390_v31 = vld [vmem:[#allocation124_spill] sm:$0xff]  ;;  %v6396_v3 = vpop.permute.xlu1 %2875 }
 0x236   : > { %v1867_v50 = vadd.f32 %v1813_v51, %v1647_v13  ;;  %v2639_v6 = vmul.f32 %v3981_v23, %v7388_v55  ;;  %v1646_v47 = vadd.f32 %v7390_v31, %v7389_v46  ;;  %v1812_v62 = vmul.f32 %v3884_v24, %v5756_v60 }
 0x237   : > { %v2668_v19 = vadd.f32 %v2614_v57, %v2448_v27  ;;  %v2449_v2 = vadd.f32 %v2395_v4, %v2229_v34  ;;  %v2806_v63 = vmax.f32 %v2752_v17, 0.0  ;;  %v2230_v56 = vadd.f32 %v2176_v44, %v2064_v38  ;;  %v7392_v4 = vld [vmem:[#allocation8_spill] sm:$0xff]  ;;  %v6401_v27 = vpop.permute.xlu0 %2873  ;;  %v7393_v17 = vld [vmem:[#allocation10_spill] sm:$0xff] }
 0x238   : > { %v2087_v32 = vadd.f32 %v6282_v59, %v1867_v50  ;;  %v2198_v52 = vmul.f32 %v3973_v16, %v7391_v54  ;;  %v1866_v57 = vadd.f32 %v1812_v62, %v1646_v47  ;;  %v2418_v13 = vmul.f32 %v3978_v21, %v7392_v4  ;;  %v7394_v54 = vld [vmem:[#allocation32_spill] sm:$0xff]  ;;  %v7396_v62 = vld [vmem:[#allocation65_spill] sm:$0xff] }
 0x239   : > { %v2729_v51 = vadd.f32 %v5699_v12, %v2668_v19  ;;  %v2669_v14 = vadd.f32 %v2615_v41, %v2449_v2  ;;  %2907 = vrot.lane.b32.xlu1 %v2806_v63, %s3710_s9  ;;  %v2450_v34 = vadd.f32 %v2396_v53, %v2230_v56  ;;  %v2638_v59 = vmul.f32 %v3981_v23, %v7393_v17 }
 0x23a   : > { %v2253_v44 = vadd.f32 %v2199_v45, %v2087_v32  ;;  %v1625_v38 = vadd.f32 %v7394_v54, %v6141_v29  ;;  %v2086_v2 = vadd.f32 %v6257_v20, %v1866_v57  ;;  %v1791_v41 = vmul.f32 %v3884_v24, %v7373_v40  ;;  %v7395_v32 = vld [vmem:[#allocation62_spill] sm:$0xff] }
 0x23b   : > { %v2783_v50 = vmax.f32 %v2729_v51, 0.0  ;;  %v2730_v55 = vadd.f32 %v5699_v12, %v2669_v14  ;;  %v2670_v19 = vadd.f32 %v2616_v30, %v2450_v34  ;;  %v2011_v53 = vmul.f32 %v3916_v36, %v7374_v33  ;;  %v7397_v30 = vld [vmem:[#allocation96_spill] sm:$0xff]  ;;  %v6424_v51 = vpop.permute.xlu1 %2831  ;;  %v6431_v54 = vpop.permute.xlu0 %2877 }
 0x23c   : > { %v2473_v46 = vadd.f32 %v2419_v1, %v2253_v44  ;;  %v2397_v45 = vmul.f32 %v3978_v21, %v7395_v32  ;;  %v2252_v29 = vadd.f32 %v2198_v52, %v2086_v2  ;;  %v1845_v47 = vadd.f32 %v1791_v41, %v1625_v38  ;;  %v7398_v52 = vld [vmem:[#allocation6_spill] sm:$0xff]  ;;  %v7399_v44 = vld [vmem:[#allocation13_spill] sm:$0xff] }
 0x23d   : > { %2861 = vrot.lane.b32.xlu0 %v2783_v50, %s3710_s9  ;;  %v2784_v31 = vmax.f32 %v2730_v55, 0.0  ;;  %v2617_v63 = vmul.f32 %v3981_v23, %v7396_v62  ;;  %v2731_v20 = vadd.f32 %v5699_v12, %v2670_v19  ;;  %v1648_v1 = vadd.f32 %v7397_v30, %v6179_v26  ;;  %v7400_v50 = vld [vmem:[#allocation16_spill] sm:$0xff]  ;;  %v7401_v41 = vld [vmem:[#allocation69_spill] sm:$0xff]  ;;  %v7403_v62 = vld [vmem:[#allocation55_spill] sm:$0xff] }
 0x23e   : > { %v2693_v56 = vadd.f32 %v2639_v6, %v2473_v46  ;;  %v1814_v33 = vmul.f32 %v3884_v24, %v6300_v28  ;;  %v2472_v14 = vadd.f32 %v2418_v13, %v2252_v29  ;;  %v2065_v57 = vadd.f32 %v2011_v53, %v1845_v47  ;;  %v7402_v13 = vld [vmem:[#allocation30_spill] sm:$0xff] }
 0x23f   : > { %2863 = vrot.lane.b32.xlu1 %v2784_v31, %s3710_s9  ;;  %v2200_v34 = vmul.f32 %v3973_v16, %v7398_v52  ;;  %v2420_v17 = vmul.f32 %v3978_v21, %v7399_v44  ;;  %v2785_v6 = vmax.f32 %v2731_v20, 0.0  ;;  %v2640_v55 = vmul.f32 %v3981_v23, %v7400_v50 }
 0x240   : > { %v2754_v26 = vadd.f32 %v5699_v12, %v2693_v56  ;;  %v1868_v38 = vadd.f32 %v1814_v33, %v1648_v1  ;;  %v2692_v2 = vadd.f32 %v2638_v59, %v2472_v14  ;;  %v2231_v19 = vadd.f32 %v7401_v41, %v2065_v57  ;;  %v7404_v1 = vld [vmem:[#allocation63_spill] sm:$0xff]  ;;  %v7405_v14 = vld [vmem:[#allocation66_spill] sm:$0xff] }
 0x241   : > { %v1627_v46 = vadd.f32 %v7402_v13, %v6217_v10  ;;  %v1793_v53 = vmul.f32 %v3884_v24, %v7380_v49  ;;  %2865 = vrot.lane.b32.xlu0 %v2785_v6, %s3710_s9  ;;  %v2013_v47 = vmul.f32 %v3916_v36, %v7382_v61  ;;  %v2179_v20 = vmul.f32 %v3973_v16, %v7403_v62  ;;  %v7406_v57 = vld [vmem:[#allocation34_spill] sm:$0xff]  ;;  %v6457_v6 = vpop.permute.xlu1 %2835  ;;  %v7411_v62 = vld [vmem:[#allocation7_spill] sm:$0xff] }
 0x242   : > { %v2808_v31 = vmax.f32 %v2754_v26, 0.0  ;;  %v2088_v29 = vadd.f32 %v6322_v58, %v1868_v38  ;;  %v2753_v59 = vadd.f32 %v5699_v12, %v2692_v2  ;;  %v2451_v56 = vadd.f32 %v2397_v45, %v2231_v19  ;;  %v6461_v2 = vpop.permute.xlu0 %2833  ;;  %v7407_v19 = vld [vmem:[#allocation61_spill] sm:$0xff] }
 0x243   : > { %v1847_v30 = vadd.f32 %v1793_v53, %v1627_v46  ;;  %v2399_v10 = vmul.f32 %v3978_v21, %v7404_v1  ;;  %v2619_v58 = vmul.f32 %v3981_v23, %v7405_v14  ;;  %v1626_v61 = vadd.f32 %v7406_v57, %v6239_v7  ;;  %v7408_v46 = vld [vmem:[#allocation64_spill] sm:$0xff] }
 0x244   : > { %2911 = vrot.lane.b32.xlu1 %v2808_v31, %s3710_s9  ;;  %v2254_v33 = vadd.f32 %v2200_v34, %v2088_v29  ;;  %v1792_v52 = vmul.f32 %v3884_v24, %v7376_v22  ;;  %v2807_v45 = vmax.f32 %v2753_v59, 0.0  ;;  %v2671_v26 = vadd.f32 %v2617_v63, %v2451_v56  ;;  %v7409_v53 = vld [vmem:[#allocation12_spill] sm:$0xff]  ;;  %v7410_v29 = vld [vmem:[#allocation5_spill] sm:$0xff] }
 0x245   : > { %v2067_v38 = vadd.f32 %v2013_v47, %v1847_v30  ;;  %v2012_v50 = vmul.f32 %v3916_v36, %v7377_v37  ;;  %v2398_v13 = vmul.f32 %v3978_v21, %v7407_v19  ;;  %v2618_v7 = vmul.f32 %v3981_v23, %v7408_v46 }
 0x246   : > { %v2474_v34 = vadd.f32 %v2420_v17, %v2254_v33  ;;  %v1846_v41 = vadd.f32 %v1792_v52, %v1626_v61  ;;  %2909 = vrot.lane.b32.xlu0 %v2807_v45, %s3710_s9  ;;  %v2732_v24 = vadd.f32 %v5699_v12, %v2671_v26  ;;  %v1649_v31 = vadd.f32 %v7409_v53, %v6265_v39  ;;  %v7412_v33 = vld [vmem:[#allocation18_spill] sm:$0xff]  ;;  %v6483_v39 = vld [vmem:[%s6638_s4] ss:$0 sm:$0xff]  ;;  %v7416_v52 = vld [vmem:[#allocation21_spill] sm:$0xff] }
 0x247   : > { %v2233_v63 = vadd.f32 %v2179_v20, %v2067_v38  ;;  %v2201_v36 = vmul.f32 0.0, %v3973_v16  ;;  %v2421_v47 = vmul.f32 %v3978_v21, %v7410_v29  ;;  %v2641_v59 = vmul.f32 %v3981_v23, %v7411_v62  ;;  %v7413_v12 = vld [vmem:[#allocation14_spill] sm:$0xff]  ;;  %v7415_v21 = vld [vmem:[#allocation11_spill] sm:$0xff]  ;;  %v7420_v29 = vld [vmem:[#allocation20_spill] sm:$0xff] }
 0x248   : > { %v2694_v37 = vadd.f32 %v2640_v55, %v2474_v34  ;;  %v2066_v17 = vadd.f32 %v2012_v50, %v1846_v41  ;;  %v2786_v56 = vmax.f32 %v2732_v24, 0.0  ;;  %v1869_v14 = vadd.f32 %v7412_v33, %v1649_v31  ;;  %v7414_v55 = vld [vmem:[#allocation70_spill] sm:$0xff]  ;;  %v7417_v26 = vld [vmem:[#allocation19_spill] sm:$0xff]  ;;  %v6503_v50 = vpop.permute.xlu0 %2881  ;;  %v7418_v41 = vld [vmem:[#allocation17_spill] sm:$0xff] }
 0x249   : > { %v2453_v30 = vadd.f32 %v2399_v10, %v2233_v63  ;;  %v1650_v20 = vadd.f32 %v7413_v12, %v6292_v35  ;;  %v1651_v61 = vadd.f32 %v7415_v21, %v6330_v11  ;;  %v2923_v23 = vadd.f32 %v6261_v25, %v7399_v44  ;;  %v6491_v10 = vpop.permute.xlu1 %2879  ;;  %v7419_v31 = vld [vmem:[#allocation22_spill] sm:$0xff] }
 0x24a   : > { %v2755_v16 = vadd.f32 %v6483_v39, %v2694_v37  ;;  %v2232_v57 = vadd.f32 %v7414_v55, %v2066_v17  ;;  %2867 = vrot.lane.b32.xlu1 %v2786_v56, %s3710_s9  ;;  %v2089_v45 = vadd.f32 %v7416_v52, %v1869_v14  ;;  %v2921_v11 = vadd.f32 %v6209_v0, %v7392_v4  ;;  %v7421_v62 = vld [vmem:[#allocation126_spill] sm:$0xff]  ;;  %v7422_v56 = vld [vmem:[#allocation27_spill] sm:$0xff] }
 0x24b   : > { %v2673_v35 = vadd.f32 %v2619_v58, %v2453_v30  ;;  %v1870_v38 = vadd.f32 %v7417_v26, %v1650_v20  ;;  %v1871_v46 = vadd.f32 %v7418_v41, %v1651_v61  ;;  %v3419_v24 = vpack.c.bf16 %v2923_v23, %v2923_v23  ;;  %v7424_v23 = vld [vmem:[#allocation52_spill] sm:$0xff] }
 0x24c   : > { %v2809_v25 = vmax.f32 %v2755_v16, 0.0  ;;  %v2452_v34 = vadd.f32 %v2398_v13, %v2232_v57  ;;  %v2255_v53 = vadd.f32 %v2201_v36, %v2089_v45  ;;  %v2922_v37 = vadd.f32 %v6252_v15, %v7387_v9  ;;  %v2838_v52 = vpop.permute.xlu0 %2837 }
 0x24d   : > { %v2734_v63 = vadd.f32 %v6483_v39, %v2673_v35  ;;  %v2090_v58 = vadd.f32 %v7419_v31, %v1870_v38  ;;  %v2091_v0 = vadd.f32 %v7420_v29, %v1871_v46  ;;  %3211 = vst [vmem:[%s6496_s17 + $0x8] sm:$0x1] %v3419_v24  ;;  %v2924_v13 = vadd.f32 %v6289_v43, %v7421_v62  ;;  %v2884_v57 = vpop.permute.xlu1 %2883  ;;  %v7423_v43 = vld [vmem:[#allocation105_spill] sm:$0xff] }
 0x24e   : > { %2913 = vrot.lane.b32.xlu0 %v2809_v25, %s3710_s9  ;;  %v2672_v17 = vadd.f32 %v2618_v7, %v2452_v34  ;;  %v2925_v30 = vadd.f32 %v6302_v42, %v7422_v56  ;;  %v2475_v14 = vadd.f32 %v2421_v47, %v2255_v53  ;;  %v3538_v20 = vpack.c.bf16 %v2922_v37, %v2921_v11  ;;  %v7426_v11 = vld [vmem:[#allocation54_spill] sm:$0xff]  ;;  %v7427_v53 = vld [vmem:[#allocation75_spill] sm:$0xff]  ;;  %v7431_v56 = vld [vmem:[#allocation80_spill] sm:$0xff] }
 0x24f   : > { %v2788_v33 = vmax.f32 %v2734_v63, 0.0  ;;  %v2256_v12 = vadd.f32 %v2201_v36, %v2090_v58  ;;  %v2257_v16 = vadd.f32 %v2201_v36, %v2091_v0  ;;  %v3420_v7 = vpack.c.bf16 %v2924_v13, %v2924_v13  ;;  %v7425_v36 = vld [vmem:[#allocation51_spill] sm:$0xff] }
 0x250   : > { %v2733_v15 = vadd.f32 %v6483_v39, %v2672_v17  ;;  %v3421_v55 = vpack.c.bf16 %v2925_v30, %v2925_v30  ;;  %v2695_v21 = vadd.f32 %v2641_v59, %v2475_v14  ;;  %3539 = vst [vmem:[%s6496_s17] sm:$0xff] %v3538_v20   ;;  %v2926_v42 = vadd.f32 %v6333_v48, %v7423_v43  ;;  %v2842_v0 = vpop.permute.xlu0 %2841  ;;  %v7434_v20 = vld [vmem:[#allocation93_spill] sm:$0xff] }
 0x251   : > { %2871 = vrot.lane.b32.xlu1 %v2788_v33, %s3710_s9  ;;  %v2476_v61 = vadd.f32 %v2421_v47, %v2256_v12  ;;  %v2927_v35 = vadd.f32 %v6339_v8, %v7424_v23  ;;  %v2477_v26 = vadd.f32 %v2421_v47, %v2257_v16  ;;  %3212 = vst [vmem:[%s6496_s17 + $0xc] sm:$0xf] %v3420_v7  ;;  %v2840_v17 = vpop.permute.xlu1 %2839  ;;  %v7432_v33 = vld [vmem:[#allocation83_spill] sm:$0xff] }
 0x252   : > { %v2787_v45 = vmax.f32 %v2733_v15, 0.0  ;;  %3213 = vst [vmem:[%s6496_s17 + $0x10] sm:$0xf] %v3421_v55  ;;  %v2928_v38 = vadd.f32 %v6367_v18, %v7425_v36  ;;  %v2929_v25 = vadd.f32 %v6373_v5, %v7426_v11  ;;  %v2756_v34 = vadd.f32 %v6483_v39, %v2695_v21  ;;  %v7435_v7 = vld [vmem:[#allocation67_spill] sm:$0xff] }
 0x253   : > { %v2696_v48 = vadd.f32 %v2641_v59, %v2476_v61  ;;  %v3422_v41 = vpack.c.bf16 %v2926_v42, %v2926_v42  ;;  %v2952_v8 = vadd.f32 %v6396_v3, %v7407_v19  ;;  %v2697_v47 = vadd.f32 %v2641_v59, %v2477_v26  ;;  %v7428_v59 = vld [vmem:[#allocation45_spill] sm:$0xff]  ;;  %v7436_v42 = vld [vmem:[#allocation118_spill] sm:$0xff]  ;;  %v7438_v36 = vld [vmem:[#allocation111_spill] sm:$0xff] }
 0x254   : > { %2869 = vrot.lane.b32.xlu0 %v2787_v45, %s3710_s9  ;;  %v3543_v46 = vpack.c.bf16 %v2928_v38, %v2927_v35  ;;  %v3425_v24 = vpack.c.bf16 %v2929_v25, %v2929_v25  ;;  %v2951_v18 = vadd.f32 %v6401_v27, %v7395_v32  ;;  %v2810_v63 = vmax.f32 %v2756_v34, 0.0  ;;  %v7429_v32 = vld [vmem:[#allocation74_spill] sm:$0xff]  ;;  %v2886_v43 = vpop.permute.xlu0 %2885  ;;  %v7437_v35 = vld [vmem:[#allocation119_spill] sm:$0xff] }
 0x255   : > { %v2757_v5 = vadd.f32 %v6483_v39, %v2696_v48  ;;  %3214 = vst [vmem:[%s6496_s17 + $0x14] sm:$0x1] %v3422_v41  ;;  %v2930_v31 = vadd.f32 %v6424_v51, %v7427_v53  ;;  %v2953_v58 = vadd.f32 %v6431_v54, %v7404_v1  ;;  %v2758_v3 = vadd.f32 %v6483_v39, %v2697_v47  ;;  %v7430_v1 = vld [vmem:[#allocation81_spill] sm:$0xff]  ;;  %v7439_v34 = vld [vmem:[#allocation114_spill] sm:$0xff]  ;;  %v7440_v47 = vld [vmem:[#allocation115_spill] sm:$0xff] }
 0x256   : > { %3595 = vst [vmem:[%s6496_s17 + $0x18] sm:$0xff] %v3543_v46   ;;  %3217 = vst [vmem:[%s6496_s17 + $0x20] sm:$0x1] %v3425_v24  ;;  %v3563_v19 = vpack.c.bf16 %v2952_v8, %v2951_v18  ;;  %v2932_v27 = vadd.f32 %v6457_v6, %v7428_v59  ;;  %v2931_v37 = vadd.f32 %v6461_v2, %v7429_v32  ;;  %2915 = vrot.lane.b32.xlu1 %v2810_v63, %s3710_s9  ;;  %v7441_v63 = vld [vmem:[#allocation110_spill] sm:$0xff] }
 0x257   : > { %v2811_v51 = vmax.f32 %v2757_v5, 0.0  ;;  %v3426_v29 = vpack.c.bf16 %v2930_v31, %v2930_v31  ;;  %v3449_v54 = vpack.c.bf16 %v2953_v58, %v2953_v58  ;;  %v2954_v39 = vadd.f32 %v6491_v10, %v7430_v1  ;;  %v7433_v10 = vld [vmem:[#allocation94_spill] sm:$0xff]  ;;  %v7442_v58 = vld [vmem:[#allocation57_spill] sm:$0xff] }
 0x258   : > { %v2812_v62 = vmax.f32 %v2758_v3, 0.0  ;;  %3599 = vst [vmem:[%s6496_s17 + $0x78] sm:$0xff] %v3563_v19   ;;  %v3428_v6 = vpack.c.bf16 %v2932_v27, %v2932_v27  ;;  %v3427_v13 = vpack.c.bf16 %v2931_v37, %v2931_v37  ;;  %v2955_v2 = vadd.f32 %v6503_v50, %v7431_v56  ;;  %v7443_v27 = vld [vmem:[#allocation28_spill] sm:$0xff] }
 0x259   : > { %2917 = vrot.lane.b32.xlu0 %v2811_v51, %s3710_s9  ;;  %3218 = vst [vmem:[%s6496_s17 + $0x24] sm:$0xf] %v3426_v29  ;;  %3241 = vst [vmem:[%s6496_s17 + $0x80] sm:$0x1] %v3449_v54  ;;  %v3450_v30 = vpack.c.bf16 %v2954_v39, %v2954_v39  ;;  %v2956_v14 = vadd.f32 %v2884_v57, %v7432_v33  ;;  %v2933_v12 = vadd.f32 %v2838_v52, %v7433_v10  ;;  %v2888_v57 = vpop.permute.xlu1 %2887  ;;  %v7444_v51 = vld [vmem:[#allocation123_spill] sm:$0xff] }
 0x25a   : > { %v2934_v15 = vadd.f32 %v2840_v17, %v7434_v20  ;;  %3220 = vst [vmem:[%s6496_s17 + $0x2c] sm:$0x1] %v3428_v6  ;;  %3219 = vst [vmem:[%s6496_s17 + $0x28] sm:$0xf] %v3427_v13  ;;  %v3451_v16 = vpack.c.bf16 %v2955_v2, %v2955_v2  ;;  %v2935_v50 = vadd.f32 %v2842_v0, %v7435_v7  ;;  %2919 = vrot.lane.b32.xlu1 %v2812_v62, %s3710_s9  ;;  %v7445_v0 = vld [vmem:[#allocation135_spill] sm:$0xff]  ;;  %v7446_v6 = vld [vmem:[#allocation134_spill] sm:$0xff] }
 0x25b   : > { %3242 = vst [vmem:[%s6496_s17 + $0x84] sm:$0xf] %v3450_v30  ;;  %v3452_v55 = vpack.c.bf16 %v2956_v14, %v2956_v14  ;;  %v2958_v23 = vadd.f32 %v2888_v57, %v7436_v42  ;;  %v2957_v52 = vadd.f32 %v2886_v43, %v7437_v35  ;;  %v2890_v25 = vpop.permute.xlu0 %2889  ;;  %v7447_v30 = vld [vmem:[#allocation103_spill] sm:$0xff]  ;;  %v7448_v20 = vld [vmem:[#allocation166_spill] sm:$0xff] }
 0x25c   : > { %v3548_v21 = vpack.c.bf16 %v2934_v15, %v2933_v12  ;;  %3243 = vst [vmem:[%s6496_s17 + $0x88] sm:$0xf] %v3451_v16  ;;  %v3431_v61 = vpack.c.bf16 %v2935_v50, %v2935_v50  ;;  %v2959_v48 = vadd.f32 %v2890_v25, %v7439_v34  ;;  %v7449_v16 = vld [vmem:[#allocation167_spill] sm:$0xff]  ;;  %v7451_v42 = vld [vmem:[#allocation106_spill] sm:$0xff] }
 0x25d   : > { %3244 = vst [vmem:[%s6496_s17 + $0x8c] sm:$0x1] %v3452_v55  ;;  %v3568_v45 = vpack.c.bf16 %v2958_v23, %v2957_v52  ;;  %v2844_v26 = vpop.permute.xlu1 %2843 }
 0x25e   : > { %3596 = vst [vmem:[%s6496_s17 + $0x30] sm:$0xff] %v3548_v21   ;;  %3223 = vst [vmem:[%s6496_s17 + $0x38] sm:$0x1] %v3431_v61  ;;  %v2936_v38 = vadd.f32 %v2844_v26, %v7438_v36  ;;  %v3455_v41 = vpack.c.bf16 %v2959_v48, %v2959_v48  ;;  %v7450_v21 = vld [vmem:[#allocation149_spill] sm:$0xff] }
 0x25f   : > { %3600 = vst [vmem:[%s6496_s17 + $0x90] sm:$0xff] %v3568_v45   ;;  %v7452_v45 = vld [vmem:[#allocation107_spill] sm:$0xff] }
 0x260   : > { %v3432_v11 = vpack.c.bf16 %v2936_v38, %v2936_v38  ;;  %3247 = vst [vmem:[%s6496_s17 + $0x98] sm:$0x1] %v3455_v41  ;;  %v7454_v41 = vld [vmem:[#allocation86_spill] sm:$0xff] }
 0x261   : > { %v2848_v8 = vpop.permute.xlu1 %2847 }
 0x262   : > { %3224 = vst [vmem:[%s6496_s17 + $0x3c] sm:$0xf] %v3432_v11  ;;  %v2938_v46 = vadd.f32 %v2848_v8, %v7440_v47  ;;  %v7453_v11 = vld [vmem:[#allocation148_spill] sm:$0xff] }
 0x264   : > { %v3434_v24 = vpack.c.bf16 %v2938_v46, %v2938_v46 }
 0x266   : > { %v2846_v18 = vpop.permute.xlu0 %2845  ;;  %3226 = vst [vmem:[%s6496_s17 + $0x44] sm:$0x1] %v3434_v24  ;;  %v7455_v24 = vld [vmem:[#allocation60_spill] sm:$0xff] }
 0x267   : > { %v2937_v5 = vadd.f32 %v2846_v18, %v7441_v63 }
 0x269   : > { %v3433_v53 = vpack.c.bf16 %v2937_v5, %v2937_v5  ;;  %v2892_v31 = vpop.permute.xlu1 %2891 }
 0x26a   : > { %v2960_v3 = vadd.f32 %v2892_v31, %v7442_v58 }
 0x26b   : > { %3225 = vst [vmem:[%s6496_s17 + $0x40] sm:$0xf] %v3433_v53  ;;  %v7456_v53 = vld [vmem:[#allocation97_spill] sm:$0xff] }
 0x26c   : > { %v3456_v19 = vpack.c.bf16 %v2960_v3, %v2960_v3 }
 0x26e   : > { %v2894_v59 = vpop.permute.xlu0 %2893  ;;  %3248 = vst [vmem:[%s6496_s17 + $0x9c] sm:$0xf] %v3456_v19 }
 0x26f   : > { %v2961_v32 = vadd.f32 %v2894_v59, %v7443_v27  ;;  %v7457_v59 = vld [vmem:[#allocation160_spill] sm:$0xff] }
 0x271   : > { %v3457_v37 = vpack.c.bf16 %v2961_v32, %v2961_v32  ;;  %v7458_v32 = vld [vmem:[#allocation159_spill] sm:$0xff] }
 0x273   : > { %3249 = vst [vmem:[%s6496_s17 + $0xa0] sm:$0xf] %v3457_v37  ;;  %v2896_v17 = vpop.permute.xlu1 %2895 }
 0x274   : > { %v2962_v29 = vadd.f32 %v2896_v17, %v7444_v51 }
 0x276   : > { %v3458_v54 = vpack.c.bf16 %v2962_v29, %v2962_v29  ;;  %v7459_v29 = vld [vmem:[#allocation92_spill] sm:$0xff] }
 0x278   : > { %3250 = vst [vmem:[%s6496_s17 + $0xa4] sm:$0x1] %v3458_v54  ;;  %v2850_v1 = vpop.permute.xlu0 %2849 }
 0x279   : > { %v2939_v62 = vadd.f32 %v2850_v1, %v7445_v0 }
 0x27c   : > { %v2852_v39 = vpop.permute.xlu1 %2851 }
 0x27d   : > { %v2940_v13 = vadd.f32 %v2852_v39, %v7446_v6 }
 0x27f   : > { %v3553_v56 = vpack.c.bf16 %v2940_v13, %v2939_v62  ;;  %v7460_v62 = vld [vmem:[#allocation98_spill] sm:$0xff] }
 0x281   : > { %3597 = vst [vmem:[%s6496_s17 + $0x48] sm:$0xff] %v3553_v56  }
 0x282   : > { %v2854_v2 = vpop.permute.xlu0 %2853 }
 0x283   : > { %v2941_v33 = vadd.f32 %v2854_v2, %v7447_v30 }
 0x285   : > { %v3437_v14 = vpack.c.bf16 %v2941_v33, %v2941_v33 }
 0x287   : > { %3229 = vst [vmem:[%s6496_s17 + $0x50] sm:$0x1] %v3437_v14 }
 0x288   : > { %v2900_v10 = vpop.permute.xlu1 %2899 }
 0x289   : > { %v2964_v15 = vadd.f32 %v2900_v10, %v7448_v20 }
 0x28b   : > { %v2898_v12 = vpop.permute.xlu0 %2897 }
 0x28c   : > { %v2963_v7 = vadd.f32 %v2898_v12, %v7449_v16 }
 0x28e   : > { %v3573_v50 = vpack.c.bf16 %v2964_v15, %v2963_v7 }
 0x28f   : > { %v2856_v55 = vpop.permute.xlu1 %2855 }
 0x290   : > { %v2942_v61 = vadd.f32 %v2856_v55, %v7450_v21  ;;  %3601 = vst [vmem:[%s6496_s17 + $0xa8] sm:$0xff] %v3573_v50  }
 0x292   : > { %v3438_v57 = vpack.c.bf16 %v2942_v61, %v2942_v61 }
 0x294   : > { %3230 = vst [vmem:[%s6496_s17 + $0x54] sm:$0xf] %v3438_v57  ;;  %v2902_v43 = vpop.permute.xlu0 %2901 }
 0x295   : > { %v2965_v23 = vadd.f32 %v2902_v43, %v7451_v42 }
 0x297   : > { %v3461_v35 = vpack.c.bf16 %v2965_v23, %v2965_v23 }
 0x299   : > { %3253 = vst [vmem:[%s6496_s17 + $0xb0] sm:$0x1] %v3461_v35 }
 0x29a   : > { %v2860_v52 = vpop.permute.xlu1 %2859 }
 0x29b   : > { %v2944_v26 = vadd.f32 %v2860_v52, %v7452_v45 }
 0x29d   : > { %v3440_v36 = vpack.c.bf16 %v2944_v26, %v2944_v26 }
 0x29f   : > { %3232 = vst [vmem:[%s6496_s17 + $0x5c] sm:$0x1] %v3440_v36 }
 0x2a0   : > { %v2858_v38 = vpop.permute.xlu0 %2857 }
 0x2a1   : > { %v2943_v25 = vadd.f32 %v2858_v38, %v7453_v11 }
 0x2a3   : > { %v3439_v34 = vpack.c.bf16 %v2943_v25, %v2943_v25  ;;  %v2904_v48 = vpop.permute.xlu1 %2903 }
 0x2a4   : > { %v2966_v8 = vadd.f32 %v2904_v48, %v7454_v41 }
 0x2a5   : > { %3231 = vst [vmem:[%s6496_s17 + $0x58] sm:$0xf] %v3439_v34 }
 0x2a6   : > { %v3462_v47 = vpack.c.bf16 %v2966_v8, %v2966_v8  ;;  %v2906_v46 = vpop.permute.xlu0 %2905 }
 0x2a7   : > { %v2967_v18 = vadd.f32 %v2906_v46, %v7455_v24 }
 0x2a8   : > { %3254 = vst [vmem:[%s6496_s17 + $0xb4] sm:$0xf] %v3462_v47 }
 0x2a9   : > { %v3463_v63 = vpack.c.bf16 %v2967_v18, %v2967_v18 }
 0x2ab   : > { %3255 = vst [vmem:[%s6496_s17 + $0xb8] sm:$0xf] %v3463_v63  ;;  %v2908_v5 = vpop.permute.xlu1 %2907 }
 0x2ac   : > { %v2968_v31 = vadd.f32 %v2908_v5, %v7456_v53 }
 0x2ae   : > { %v3464_v58 = vpack.c.bf16 %v2968_v31, %v2968_v31 }
 0x2af   : > { %v2862_v3 = vpop.permute.xlu0 %2861 }
 0x2b0   : > { %3256 = vst [vmem:[%s6496_s17 + $0xbc] sm:$0x1] %v3464_v58  ;;  %v2945_v27 = vadd.f32 %v2862_v3, %v7457_v59 }
 0x2b1   : > { %v2864_v19 = vpop.permute.xlu1 %2863 }
 0x2b2   : > { %v2946_v37 = vadd.f32 %v2864_v19, %v7458_v32 }
 0x2b3   : > { %v2866_v51 = vpop.permute.xlu0 %2865 }
 0x2b4   : > { %v3558_v17 = vpack.c.bf16 %v2946_v37, %v2945_v27  ;;  %v2947_v54 = vadd.f32 %v2866_v51, %v7459_v29 }
 0x2b6   : > { %3598 = vst [vmem:[%s6496_s17 + $0x60] sm:$0xff] %v3558_v17   ;;  %v3443_v1 = vpack.c.bf16 %v2947_v54, %v2947_v54  ;;  %v2912_v39 = vpop.permute.xlu1 %2911 }
 0x2b7   : > { %v2970_v6 = vadd.f32 %v2912_v39, %v7460_v62 }
 0x2b8   : > { %3235 = vst [vmem:[%s6496_s17 + $0x68] sm:$0x1] %v3443_v1  ;;  %v2910_v0 = vpop.permute.xlu0 %2909 }
 0x2b9   : > { %v2969_v13 = vadd.f32 %v2910_v0, %v5756_v60 }
 0x2bb   : > { %v3578_v56 = vpack.c.bf16 %v2970_v6, %v2969_v13 }
 0x2bc   : > { %v2868_v2 = vpop.permute.xlu1 %2867 }
 0x2bd   : > { %3602 = vst [vmem:[%s6496_s17 + $0xc0] sm:$0xff] %v3578_v56   ;;  %v2948_v30 = vadd.f32 %v2868_v2, %v7373_v40 }
 0x2bf   : > { %v3444_v33 = vpack.c.bf16 %v2948_v30, %v2948_v30 }
 0x2c0   : > { %v2914_v14 = vpop.permute.xlu0 %2913 }
 0x2c1   : > { %v2971_v10 = vadd.f32 %v2914_v14, %v6300_v28  ;;  %3236 = vst [vmem:[%s6496_s17 + $0x6c] sm:$0xf] %v3444_v33 }
 0x2c3   : > { %v3467_v12 = vpack.c.bf16 %v2971_v10, %v2971_v10  ;;  %v2872_v20 = vpop.permute.xlu1 %2871 }
 0x2c4   : > { %v2950_v15 = vadd.f32 %v2872_v20, %v7380_v49 }
 0x2c5   : > { %3259 = vst [vmem:[%s6496_s17 + $0xc8] sm:$0x1] %v3467_v12 }
 0x2c6   : > { %v3446_v60 = vpack.c.bf16 %v2950_v15, %v2950_v15  ;;  %v2870_v16 = vpop.permute.xlu0 %2869 }
 0x2c7   : > { %v2949_v7 = vadd.f32 %v2870_v16, %v7376_v22 }
 0x2c8   : > { %3238 = vst [vmem:[%s6496_s17 + $0x74] sm:$0x1] %v3446_v60  ;;  %v2916_v50 = vpop.permute.xlu1 %2915 }
 0x2c9   : > { %v3445_v40 = vpack.c.bf16 %v2949_v7, %v2949_v7  ;;  %v2972_v55 = vadd.f32 %v2916_v50, %v7392_v4 }
 0x2cb   : > { %3237 = vst [vmem:[%s6496_s17 + $0x70] sm:$0xf] %v3445_v40  ;;  %v2918_v28 = vpop.permute.xlu0 %2917  ;;  %v3468_v21 = vpack.c.bf16 %v2972_v55, %v2972_v55 }
 0x2cc   : > { %v2973_v61 = vadd.f32 %v2918_v28, %v7387_v9  ;;  %v2920_v57 = vpop.permute.xlu1 %2919 }
 0x2cd   : > { %3260 = vst [vmem:[%s6496_s17 + $0xcc] sm:$0xf] %v3468_v21  ;;  %v2974_v43 = vadd.f32 %v2920_v57, %v7399_v44 }
 0x2ce   : > { %v3469_v49 = vpack.c.bf16 %v2973_v61, %v2973_v61 }
 0x2cf   : > { %v3470_v42 = vpack.c.bf16 %v2974_v43, %v2974_v43 }
 0x2d0   : > { %3261 = vst [vmem:[%s6496_s17 + $0xd0] sm:$0xf] %v3469_v49 }
 0x2d1   : > { %3262 = vst [vmem:[%s6496_s17 + $0xd4] sm:$0x1] %v3470_v42 }
 0x2d2 PF: > { %s15_s18 = sadd.s32 1, %s3707_s18  }
 0x2d3   : > { %p12_p4 = scmp.ge.s32.totalorder %s15_s18, 4  }
 0x2d5   :  { %14 = sbr.rel (!%p12_p4) target bundleno = 1 (0x1), region = 73 }

</bundles_post_ra>
